<compile_context>
chip_gen: v7x
topology: tpu7x:2x2x1
jax: 0.10.0
libtpu: 0.0.40
codegen_flags: <defaults>
</compile_context>

<pallas_src>
import functools
import math

import jax
import jax.numpy as jnp
import numpy as np
from jax.experimental import pallas as pl
from jax.experimental.pallas import tpu as pltpu

# bf16 MXU operands with f32 accumulation (review item for v6e/v7x; also valid on
# v5e).  Set to jnp.float32 for exact parity with the f32 PyTorch module.
_MXU_DTYPE = jnp.bfloat16


def _bmm(a, b):
    """Leading-batch matmul: (P, M, K) @ (P, K, N) -> (P, M, N), f32 accumulation."""
    return jnp.einsum("bik,bkj->bij", a.astype(_MXU_DTYPE), b.astype(_MXU_DTYPE),
                      preferred_element_type=jnp.float32)


def _bmm_t(a, b):
    """Leading-batch a @ b^T: (P, Q, D), (P, K, D) -> (P, Q, K), f32 accumulation."""
    return jnp.einsum("bqd,bkd->bqk", a.astype(_MXU_DTYPE), b.astype(_MXU_DTYPE),
                      preferred_element_type=jnp.float32)


# ----------------------------------------------------------------------------
# Fused GMT kernel: lin1 -> pools (GMPool_I / SelfAtt) -> lin2, whole batch in
# a single invocation (no grid).  All activations stay in VMEM.
# ----------------------------------------------------------------------------
def _gmt_kernel(counts_ref, x_ref, lin1_ref, lin2_ref, wqkv_ref, bqkv_ref,
                wo_ref, seeds_ref, out_ref, *,
                pool_types, pool_num_seeds, num_heads):
    B, n_max, c_in = x_ref.shape
    dim_v = lin1_ref.shape[1]
    H = num_heads
    ds = dim_v // H
    scale = 1.0 / math.sqrt(dim_v)   # PyTorch scales by 1/sqrt(dim_V), not head_dim

    def bcast_b(a):
        # (H, ...) -> (B*H, ...), b-major / h-minor ordering (leading-dim only ops).
        return jnp.broadcast_to(a[None], (B,) + a.shape).reshape((B * H,) + a.shape[1:])

    # Row mask rebuilt from per-graph node counts held in SMEM (no dense mask DMA).
    row_ids = jax.lax.broadcasted_iota(jnp.int32, (n_max, 1), 0)
    row_mask = jnp.stack(
        [(row_ids < counts_ref[b]).astype(jnp.float32) for b in range(B)], axis=0)

    # lin1 fused in-kernel, batched over B via a broadcast weight (3-D batched dot).
    lin1 = lin1_ref[...]                                  # (c_in + 1, dim_v)
    w1 = jnp.broadcast_to(lin1[:c_in][None], (B, c_in, dim_v))
    b1 = lin1[c_in:c_in + 1]                              # (1, dim_v)
    h = (_bmm(x_ref[...], w1) + b1) * row_mask            # (B, n_max, dim_v)

    for p, ptype in enumerate(pool_types):
        n_kv = h.shape[1]
        wq = wqkv_ref[(3 * p + 0) * H:(3 * p + 1) * H]    # (H, dim_v, ds)
        wk = wqkv_ref[(3 * p + 1) * H:(3 * p + 2) * H]
        wv = wqkv_ref[(3 * p + 2) * H:(3 * p + 3) * H]
        bq = bqkv_ref[3 * p + 0][:, None, :]              # (H, 1, ds)
        bk = bqkv_ref[3 * p + 1][:, None, :]
        bv = bqkv_ref[3 * p + 2][:, None, :]
        wo_slab = wo_ref[p]                               # (dim_v + 1, dim_v)
        wo = wo_slab[:dim_v]
        bo = wo_slab[dim_v:dim_v + 1]

        # Head split lives in the (H, dim_v, ds) weight layout; every projection is
        # a leading-batch (B*H) 3-D dot_general -- no per-head lane slicing/stacks.
        h_bh = jnp.broadcast_to(h[:, None], (B, H, n_kv, dim_v)).reshape(B * H, n_kv, dim_v)
        k_h = _bmm(h_bh, bcast_b(wk)) + bcast_b(bk)       # (B*H, n_kv, ds)
        v_h = _bmm(h_bh, bcast_b(wv)) + bcast_b(bv)

        if ptype == "GMPool_I":
            n_q = pool_num_seeds[p]
            seeds = seeds_ref[p, :n_q, :]                 # (n_q, dim_v), shared over B
            seeds_h = jnp.broadcast_to(seeds[None], (H, n_q, dim_v))
            q_h = bcast_b(_bmm(seeds_h, wq) + bq)         # (B*H, n_q, ds)
        elif ptype == "SelfAtt":
            n_q = n_kv
            q_h = _bmm(h_bh, bcast_b(wq)) + bcast_b(bq)
        else:
            # TODO(synk): GMPool_G (GCNConv over edge_index) is not implemented.
            raise NotImplementedError("GMPool_G is not supported")

        s = _bmm_t(q_h, k_h) * scale                      # (B*H, n_q, n_kv)
        # torch.softmax(..., dim=1) == softmax over the QUERY axis; the reference's
        # additive key mask is a per-column constant under this softmax and cancels
        # exactly (see header note), so it is intentionally omitted.
        s = s - jnp.max(s, axis=1, keepdims=True)
        e = jnp.exp(s)
        # approx reciprocal -> EUP slot; rel-err ~1e-4.  Use exact division if
        # bit-tight parity with PyTorch is required.
        attn = e * pl.reciprocal(jnp.sum(e, axis=1, keepdims=True), approx=True)
        ctx = _bmm(attn, v_h)                             # (B*H, n_q, ds)
        o_h = (q_h + ctx).reshape(B, H, n_q, ds)

        # Merge heads back to the flat layout: one lane-axis concat per MAB.
        out = jnp.concatenate([o_h[:, hh] for hh in range(H)], axis=-1)  # (B, n_q, dim_v)
        proj = _bmm(out, jnp.broadcast_to(wo[None], (B, dim_v, dim_v))) + bo
        h = out + jnp.maximum(proj, 0.0)

    lin2 = lin2_ref[...]                                  # (dim_v + 1, c_out)
    c_out = lin2.shape[1]
    w2 = jnp.broadcast_to(lin2[:dim_v][None], (B, dim_v, c_out))
    b2 = lin2[dim_v:dim_v + 1]
    y = _bmm(h, w2) + b2                                  # (B, 1, c_out)
    out_ref[...] = y[:, 0, :].astype(out_ref.dtype)       # single-shot (B, c_out) store


def _cost_counts(B, n_max, c_in, dim_v, c_out, H, pool_types, pool_num_seeds):
    ds = dim_v // H
    flops = 2 * B * n_max * c_in * dim_v
    trans = 0
    n = n_max
    for p, ptype in enumerate(pool_types):
        n_q = pool_num_seeds[p] if ptype == "GMPool_I" else n
        flops += 2 * 2 * B * H * n * dim_v * ds           # K, V projections
        flops += 2 * B * H * n_q * dim_v * ds             # Q projection
        flops += 2 * 2 * B * H * n_q * n * ds             # scores + context
        flops += 2 * B * n_q * dim_v * dim_v              # fc_o
        trans += B * H * n_q * n + B * H * n              # exp + reciprocal
        n = n_q
    flops += 2 * B * n * dim_v * c_out
    return int(flops), int(trans)


def gmt_forward(x_dense, counts, packed, *, pool_types, pool_num_seeds, num_heads):
    """x_dense: (B, Nmax, Cin), counts: (B,) int32 node counts -> (B, Cout)."""
    B, n_max, c_in = x_dense.shape
    dim_v = packed["lin1"].shape[1]
    c_out = packed["lin2"].shape[1]

    kernel = functools.partial(
        _gmt_kernel, pool_types=tuple(pool_types),
        pool_num_seeds=tuple(pool_num_seeds), num_heads=num_heads)

    args = (counts, x_dense, packed["lin1"], packed["lin2"], packed["wqkv"],
            packed["bqkv"], packed["wo"], packed["seeds"])
    in_specs = ([pl.BlockSpec(memory_space=pltpu.MemorySpace.SMEM)]
                + [pl.BlockSpec(memory_space=pltpu.MemorySpace.VMEM)
                   for _ in range(len(args) - 1)])

    flops, transcendentals = _cost_counts(B, n_max, c_in, dim_v, c_out, num_heads,
                                          pool_types, pool_num_seeds)
    bytes_accessed = (sum(int(np.prod(a.shape)) * a.dtype.itemsize for a in args)
                      + B * c_out * x_dense.dtype.itemsize)

    return pl.pallas_call(
        kernel,
        out_shape=jax.ShapeDtypeStruct((B, c_out), x_dense.dtype),
        in_specs=in_specs,
        out_specs=pl.BlockSpec(memory_space=pltpu.MemorySpace.VMEM),
        cost_estimate=pl.CostEstimate(flops=flops, transcendentals=transcendentals,
                                      bytes_accessed=int(bytes_accessed)),
    )(*args)


# ----------------------------------------------------------------------------
# Host-side helpers: dense batching, parameter init, parameter packing
# ----------------------------------------------------------------------------
def to_dense_batch(x, index_np, batch_size):
    """x: (N_total, F), sorted index -> dense (B, Nmax, F), per-graph counts (B,)."""
    counts = np.bincount(index_np, minlength=batch_size)
    max_nodes = int(counts.max())
    pos = np.concatenate([np.arange(c) for c in counts]).astype(np.int32)
    dense = jnp.zeros((batch_size, max_nodes, x.shape[1]), x.dtype)
    dense = dense.at[jnp.asarray(index_np), jnp.asarray(pos)].set(x)
    return dense, jnp.asarray(counts.astype(np.int32))


def _init_linear(key, din, dout, dtype=jnp.float32):
    kw, kb = jax.random.split(key)
    bound = 1.0 / math.sqrt(din)
    w = jax.random.uniform(kw, (din, dout), dtype, -bound, bound)
    b = jax.random.uniform(kb, (1, dout), dtype, -bound, bound)
    return w, b


def _init_mab(key, dq, dk, dv):
    keys = jax.random.split(key, 4)
    wq, bq = _init_linear(keys[0], dq, dv)
    wk, bk = _init_linear(keys[1], dk, dv)
    wv, bv = _init_linear(keys[2], dk, dv)
    wo, bo = _init_linear(keys[3], dv, dv)
    return dict(wq=wq, bq=bq, wk=wk, bk=bk, wv=wv, bv=bv, wo=wo, bo=bo)


def init_gmt_params(key, in_channels, hidden, out_channels,
                    pool_sequences, num_nodes, pooling_ratio):
    keys = jax.random.split(key, 2 + len(pool_sequences))
    params = {}
    params["lin1_w"], params["lin1_b"] = _init_linear(keys[0], in_channels, hidden)
    params["lin2_w"], params["lin2_b"] = _init_linear(keys[1], hidden, out_channels)
    pools = []
    num_out_nodes = math.ceil(num_nodes * pooling_ratio)
    for i, name in enumerate(pool_sequences):
        if i == len(pool_sequences) - 1:
            num_out_nodes = 1
        kS, kM = jax.random.split(keys[2 + i])
        if name == "GMPool_I":
            limit = math.sqrt(6.0 / (num_out_nodes * hidden + hidden))  # xavier_uniform
            S = jax.random.uniform(kS, (1, num_out_nodes, hidden),
                                   jnp.float32, -limit, limit)
            pools.append(dict(type=name, S=S,
                              mab=_init_mab(kM, hidden, hidden, hidden)))
            num_out_nodes = math.ceil(num_out_nodes * pooling_ratio)
        elif name == "SelfAtt":
            pools.append(dict(type=name, mab=_init_mab(kM, hidden, hidden, hidden)))
        else:
            raise NotImplementedError("GMPool_G (GCNConv) path not implemented")
    params["pools"] = pools
    return params


def pack_params(params, *, num_heads):
    """Coalesce all weights/biases/seeds into a handful of slabs (few, larger DMAs)."""
    H = num_heads
    dim_v = params["lin1_w"].shape[1]
    ds = dim_v // H

    def head_major(w):            # (d_in, dim_v) -> (H, d_in, ds)
        return jnp.transpose(w.reshape(w.shape[0], H, ds), (1, 0, 2))

    seed_counts = [p["S"].shape[1] for p in params["pools"] if p["type"] == "GMPool_I"]
    k_max = max(seed_counts) if seed_counts else 1

    wqkv, bqkv, wo, seeds = [], [], [], []
    for pool in params["pools"]:
        mab = pool["mab"]
        for wname, bname in (("wq", "bq"), ("wk", "bk"), ("wv", "bv")):
            wqkv.append(head_major(mab[wname]))           # (H, dim_v, ds)
            bqkv.append(mab[bname].reshape(H, ds))        # (H, ds)
        wo.append(jnp.concatenate([mab["wo"], mab["bo"]], axis=0))   # (dim_v+1, dim_v)
        if pool["type"] == "GMPool_I":
            S = pool["S"][0]
            S = jnp.pad(S, ((0, k_max - S.shape[0]), (0, 0)))
        else:
            S = jnp.zeros((k_max, dim_v), jnp.float32)
        seeds.append(S)

    return dict(
        lin1=jnp.concatenate([params["lin1_w"], params["lin1_b"]], axis=0),
        lin2=jnp.concatenate([params["lin2_w"], params["lin2_b"]], axis=0),
        wqkv=jnp.concatenate(wqkv, axis=0),               # (P*3*H, dim_v, ds)
        bqkv=jnp.stack(bqkv, axis=0),                     # (P*3,   H,     ds)
        wo=jnp.stack(wo, axis=0),                         # (P, dim_v+1, dim_v)
        seeds=jnp.stack(seeds, axis=0),                   # (P, k_max,   dim_v)
    )


# ----------------------------------------------------------------------------
# Pure-JAX reference (same bf16 operand casts), used only for a sanity check
# ----------------------------------------------------------------------------
def _mab_ref(q_in, k_in, mab, num_heads):
    dim_v = mab["wq"].shape[1]
    H = num_heads
    ds = dim_v // H

    def proj(x, w, b):
        y = jnp.einsum("bnd,de->bne", x.astype(_MXU_DTYPE), w.astype(_MXU_DTYPE),
                       preferred_element_type=jnp.float32) + b
        return y.reshape(y.shape[0], y.shape[1], H, ds)

    q = proj(q_in, mab["wq"], mab["bq"])
    k = proj(k_in, mab["wk"], mab["bk"])
    v = proj(k_in, mab["wv"], mab["bv"])
    s = jnp.einsum("bqhd,bkhd->bhqk", q.astype(_MXU_DTYPE), k.astype(_MXU_DTYPE),
                   preferred_element_type=jnp.float32) / math.sqrt(dim_v)
    attn = jax.nn.softmax(s, axis=2)                      # softmax over the QUERY axis
    ctx = jnp.einsum("bhqk,bkhd->bqhd", attn.astype(_MXU_DTYPE), v.astype(_MXU_DTYPE),
                     preferred_element_type=jnp.float32)
    out = (q + ctx).reshape(q_in.shape[0], q.shape[1], dim_v)
    proj_o = jnp.einsum("bne,ef->bnf", out.astype(_MXU_DTYPE),
                        mab["wo"].astype(_MXU_DTYPE),
                        preferred_element_type=jnp.float32) + mab["bo"]
    return out + jnp.maximum(proj_o, 0.0)


def gmt_reference(x_dense, counts, params, num_heads):
    B, n_max, _ = x_dense.shape
    row_mask = (jnp.arange(n_max)[None, :, None] < counts[:, None, None]).astype(jnp.float32)
    h = jnp.einsum("bnc,cd->bnd", x_dense.astype(_MXU_DTYPE),
                   params["lin1_w"].astype(_MXU_DTYPE),
                   preferred_element_type=jnp.float32) + params["lin1_b"]
    h = h * row_mask
    for pool in params["pools"]:
        if pool["type"] == "GMPool_I":
            q_in = jnp.broadcast_to(pool["S"], (B,) + pool["S"].shape[1:])
        else:
            q_in = h
        h = _mab_ref(q_in, h, pool["mab"], num_heads)
    y = jnp.einsum("bnc,cd->bnd", h.astype(_MXU_DTYPE),
                   params["lin2_w"].astype(_MXU_DTYPE),
                   preferred_element_type=jnp.float32) + params["lin2_b"]
    return y[:, 0, :]


# ----------------------------------------------------------------------------
# main
# ----------------------------------------------------------------------------
if __name__ == "__main__":
    in_channels, hidden_channels, out_channels = 8, 32, 16
    num_heads = 4
    num_nodes, pooling_ratio = 16, 0.25
    pool_sequences = ["GMPool_I", "SelfAtt", "GMPool_I"]
    batch_size = 2

    key = jax.random.PRNGKey(0)
    k_param, k_x = jax.random.split(key)

    params = init_gmt_params(k_param, in_channels, hidden_channels, out_channels,
                             pool_sequences, num_nodes, pooling_ratio)

    # 13 nodes split into 2 graphs (sorted batch index, as required by to_dense_batch).
    index_np = np.array([0] * 8 + [1] * 5, dtype=np.int32)
    x = jax.random.normal(k_x, (index_np.shape[0], in_channels), jnp.float32)

    x_dense, counts = to_dense_batch(x, index_np, batch_size)
    pool_types = tuple(p["type"] for p in params["pools"])
    pool_num_seeds = tuple(p["S"].shape[1] if p["type"] == "GMPool_I" else 0
                           for p in params["pools"])
    packed = pack_params(params, num_heads=num_heads)

    out = gmt_forward(x_dense, counts, packed, pool_types=pool_types,
                      pool_num_seeds=pool_num_seeds, num_heads=num_heads)
    out = jax.block_until_ready(out)

    ref = jax.block_until_ready(gmt_reference(x_dense, counts, params, num_heads))

    assert out.shape == (batch_size, out_channels)
    assert bool(jnp.all(jnp.isfinite(out)))
    assert np.allclose(np.asarray(out), np.asarray(ref), rtol=2e-2, atol=2e-2), \
        (np.asarray(out), np.asarray(ref))
    print("KERNEL_OK")
</pallas_src>

<mosaic_0001>
module attributes {stable_mosaic.version = 11 : i64} {
  func.func @_gmt_kernel(%arg0: memref<2xi32, #tpu.memory_space<smem>>, %arg1: memref<2x8x8xf32, #tpu.memory_space<vmem>>, %arg2: memref<9x32xf32, #tpu.memory_space<vmem>>, %arg3: memref<33x16xf32, #tpu.memory_space<vmem>>, %arg4: memref<36x32x8xf32, #tpu.memory_space<vmem>>, %arg5: memref<9x4x8xf32, #tpu.memory_space<vmem>>, %arg6: memref<3x33x32xf32, #tpu.memory_space<vmem>>, %arg7: memref<3x4x32xf32, #tpu.memory_space<vmem>>, %arg8: memref<2x16xf32, #tpu.memory_space<vmem>>) attributes {dimension_semantics = [], scalar_prefetch = 0 : i64, scratch_operands = 0 : i64, tpu.core_type = #tpu.core_type<tc>} {
    %0 = tpu.iota {dimensions = array<i32: 0>} : vector<8x1xi32>
    %c0 = arith.constant 0 : index
    %1 = memref.load %arg0[%c0] : memref<2xi32, #tpu.memory_space<smem>>
    %2 = vector.broadcast %1 : i32 to vector<8x1xi32>
    %3 = arith.cmpi slt, %0, %2 : vector<8x1xi32>
    %4 = arith.extui %3 : vector<8x1xi1> to vector<8x1xi32>
    %5 = arith.sitofp %4 : vector<8x1xi32> to vector<8x1xf32>
    %c1 = arith.constant 1 : index
    %6 = memref.load %arg0[%c1] : memref<2xi32, #tpu.memory_space<smem>>
    %7 = vector.broadcast %6 : i32 to vector<8x1xi32>
    %8 = arith.cmpi slt, %0, %7 : vector<8x1xi32>
    %9 = arith.extui %8 : vector<8x1xi1> to vector<8x1xi32>
    %10 = arith.sitofp %9 : vector<8x1xi32> to vector<8x1xf32>
    %11 = vector.shape_cast %5 : vector<8x1xf32> to vector<1x8x1xf32>
    %12 = vector.shape_cast %10 : vector<8x1xf32> to vector<1x8x1xf32>
    %13 = tpu.concatenate %11, %12 in 0 : vector<1x8x1xf32>, vector<1x8x1xf32> -> vector<2x8x1xf32>
    %c0_0 = arith.constant 0 : index
    %c0_1 = arith.constant 0 : index
    %14 = vector.load %arg2[%c0_0, %c0_1] : memref<9x32xf32, #tpu.memory_space<vmem>>, vector<9x32xf32>
    %15 = vector.extract_strided_slice %14 {offsets = [0, 0], sizes = [8, 32], strides = [1, 1]} : vector<9x32xf32> to vector<8x32xf32>
    %16 = vector.shape_cast %15 : vector<8x32xf32> to vector<1x8x32xf32>
    %17 = vector.shape_cast %16 : vector<1x8x32xf32> to vector<1x8x32xf32>
    %18 = vector.broadcast %17 : vector<1x8x32xf32> to vector<2x8x32xf32>
    %19 = vector.extract_strided_slice %14 {offsets = [8, 0], sizes = [1, 32], strides = [1, 1]} : vector<9x32xf32> to vector<1x32xf32>
    %c0_2 = arith.constant 0 : index
    %c0_3 = arith.constant 0 : index
    %c0_4 = arith.constant 0 : index
    %20 = vector.load %arg1[%c0_2, %c0_3, %c0_4] : memref<2x8x8xf32, #tpu.memory_space<vmem>>, vector<2x8x8xf32>
    %21 = arith.truncf %20 : vector<2x8x8xf32> to vector<2x8x8xbf16>
    %22 = arith.truncf %18 : vector<2x8x32xf32> to vector<2x8x32xbf16>
    "tpu.trace_start"() <{level = 10 : i32, message = "bik,bkj->bij"}> : () -> ()
    %cst = arith.constant dense<0.000000e+00> : vector<2x8x32xf32>
    %23 = tpu.matmul %21, %22, %cst {dimension_numbers = #tpu.dot_dimension_numbers<[2], [1], [1], [2], [0, 0, 0, 1, 1, 2], [0], [0]>} : vector<2x8x8xbf16>, vector<2x8x32xbf16>, vector<2x8x32xf32> -> vector<2x8x32xf32>
    "tpu.trace_stop"() : () -> ()
    %24 = vector.shape_cast %19 : vector<1x32xf32> to vector<1x1x32xf32>
    %25 = vector.broadcast %24 : vector<1x1x32xf32> to vector<2x8x32xf32>
    %26 = arith.addf %23, %25 : vector<2x8x32xf32>
    %27 = vector.broadcast %13 : vector<2x8x1xf32> to vector<2x8x32xf32>
    %28 = arith.mulf %26, %27 : vector<2x8x32xf32>
    %c0_5 = arith.constant 0 : index
    %c0_6 = arith.constant 0 : index
    %c0_7 = arith.constant 0 : index
    %29 = vector.load %arg4[%c0_5, %c0_6, %c0_7] : memref<36x32x8xf32, #tpu.memory_space<vmem>>, vector<4x32x8xf32>
    %c4 = arith.constant 4 : index
    %c0_8 = arith.constant 0 : index
    %c0_9 = arith.constant 0 : index
    %30 = vector.load %arg4[%c4, %c0_8, %c0_9] : memref<36x32x8xf32, #tpu.memory_space<vmem>>, vector<4x32x8xf32>
    %c8 = arith.constant 8 : index
    %c0_10 = arith.constant 0 : index
    %c0_11 = arith.constant 0 : index
    %31 = vector.load %arg4[%c8, %c0_10, %c0_11] : memref<36x32x8xf32, #tpu.memory_space<vmem>>, vector<4x32x8xf32>
    %c0_12 = arith.constant 0 : index
    %c0_13 = arith.constant 0 : index
    %c0_14 = arith.constant 0 : index
    %32 = vector.load %arg5[%c0_12, %c0_13, %c0_14] : memref<9x4x8xf32, #tpu.memory_space<vmem>>, vector<1x4x8xf32>
    %33 = vector.shape_cast %32 : vector<1x4x8xf32> to vector<4x8xf32>
    %34 = vector.shape_cast %33 : vector<4x8xf32> to vector<4x1x8xf32>
    %c1_15 = arith.constant 1 : index
    %c0_16 = arith.constant 0 : index
    %c0_17 = arith.constant 0 : index
    %35 = vector.load %arg5[%c1_15, %c0_16, %c0_17] : memref<9x4x8xf32, #tpu.memory_space<vmem>>, vector<1x4x8xf32>
    %36 = vector.shape_cast %35 : vector<1x4x8xf32> to vector<4x8xf32>
    %37 = vector.shape_cast %36 : vector<4x8xf32> to vector<4x1x8xf32>
    %c2 = arith.constant 2 : index
    %c0_18 = arith.constant 0 : index
    %c0_19 = arith.constant 0 : index
    %38 = vector.load %arg5[%c2, %c0_18, %c0_19] : memref<9x4x8xf32, #tpu.memory_space<vmem>>, vector<1x4x8xf32>
    %39 = vector.shape_cast %38 : vector<1x4x8xf32> to vector<4x8xf32>
    %40 = vector.shape_cast %39 : vector<4x8xf32> to vector<4x1x8xf32>
    %c0_20 = arith.constant 0 : index
    %c0_21 = arith.constant 0 : index
    %c0_22 = arith.constant 0 : index
    %41 = vector.load %arg6[%c0_20, %c0_21, %c0_22] : memref<3x33x32xf32, #tpu.memory_space<vmem>>, vector<1x33x32xf32>
    %42 = vector.shape_cast %41 : vector<1x33x32xf32> to vector<33x32xf32>
    %43 = vector.extract_strided_slice %42 {offsets = [0, 0], sizes = [32, 32], strides = [1, 1]} : vector<33x32xf32> to vector<32x32xf32>
    %44 = vector.extract_strided_slice %42 {offsets = [32, 0], sizes = [1, 32], strides = [1, 1]} : vector<33x32xf32> to vector<1x32xf32>
    %45 = vector.shape_cast %28 : vector<2x8x32xf32> to vector<2x1x8x32xf32>
    %46 = vector.shape_cast %45 : vector<2x1x8x32xf32> to vector<2x1x8x32xf32>
    %47 = vector.broadcast %46 : vector<2x1x8x32xf32> to vector<2x4x8x32xf32>
    %48 = vector.shape_cast %47 : vector<2x4x8x32xf32> to vector<8x8x32xf32>
    %49 = vector.shape_cast %30 : vector<4x32x8xf32> to vector<1x4x32x8xf32>
    %50 = vector.shape_cast %49 : vector<1x4x32x8xf32> to vector<1x4x32x8xf32>
    %51 = vector.broadcast %50 : vector<1x4x32x8xf32> to vector<2x4x32x8xf32>
    %52 = vector.shape_cast %51 : vector<2x4x32x8xf32> to vector<8x32x8xf32>
    %53 = arith.truncf %48 : vector<8x8x32xf32> to vector<8x8x32xbf16>
    %54 = arith.truncf %52 : vector<8x32x8xf32> to vector<8x32x8xbf16>
    "tpu.trace_start"() <{level = 10 : i32, message = "bik,bkj->bij"}> : () -> ()
    %cst_23 = arith.constant dense<0.000000e+00> : vector<8x8x8xf32>
    %55 = tpu.matmul %53, %54, %cst_23 {dimension_numbers = #tpu.dot_dimension_numbers<[2], [1], [1], [2], [0, 0, 0, 1, 1, 2], [0], [0]>} : vector<8x8x32xbf16>, vector<8x32x8xbf16>, vector<8x8x8xf32> -> vector<8x8x8xf32>
    "tpu.trace_stop"() : () -> ()
    %56 = vector.shape_cast %37 : vector<4x1x8xf32> to vector<1x4x1x8xf32>
    %57 = vector.shape_cast %56 : vector<1x4x1x8xf32> to vector<1x4x1x8xf32>
    %58 = vector.broadcast %57 : vector<1x4x1x8xf32> to vector<2x4x1x8xf32>
    %59 = vector.shape_cast %58 : vector<2x4x1x8xf32> to vector<8x1x8xf32>
    %60 = vector.broadcast %59 : vector<8x1x8xf32> to vector<8x8x8xf32>
    %61 = arith.addf %55, %60 : vector<8x8x8xf32>
    %62 = vector.shape_cast %31 : vector<4x32x8xf32> to vector<1x4x32x8xf32>
    %63 = vector.shape_cast %62 : vector<1x4x32x8xf32> to vector<1x4x32x8xf32>
    %64 = vector.broadcast %63 : vector<1x4x32x8xf32> to vector<2x4x32x8xf32>
    %65 = vector.shape_cast %64 : vector<2x4x32x8xf32> to vector<8x32x8xf32>
    %66 = arith.truncf %48 : vector<8x8x32xf32> to vector<8x8x32xbf16>
    %67 = arith.truncf %65 : vector<8x32x8xf32> to vector<8x32x8xbf16>
    "tpu.trace_start"() <{level = 10 : i32, message = "bik,bkj->bij"}> : () -> ()
    %cst_24 = arith.constant dense<0.000000e+00> : vector<8x8x8xf32>
    %68 = tpu.matmul %66, %67, %cst_24 {dimension_numbers = #tpu.dot_dimension_numbers<[2], [1], [1], [2], [0, 0, 0, 1, 1, 2], [0], [0]>} : vector<8x8x32xbf16>, vector<8x32x8xbf16>, vector<8x8x8xf32> -> vector<8x8x8xf32>
    "tpu.trace_stop"() : () -> ()
    %69 = vector.shape_cast %40 : vector<4x1x8xf32> to vector<1x4x1x8xf32>
    %70 = vector.shape_cast %69 : vector<1x4x1x8xf32> to vector<1x4x1x8xf32>
    %71 = vector.broadcast %70 : vector<1x4x1x8xf32> to vector<2x4x1x8xf32>
    %72 = vector.shape_cast %71 : vector<2x4x1x8xf32> to vector<8x1x8xf32>
    %73 = vector.broadcast %72 : vector<8x1x8xf32> to vector<8x8x8xf32>
    %74 = arith.addf %68, %73 : vector<8x8x8xf32>
    %c0_25 = arith.constant 0 : index
    %c0_26 = arith.constant 0 : index
    %c0_27 = arith.constant 0 : index
    %75 = vector.load %arg7[%c0_25, %c0_26, %c0_27] : memref<3x4x32xf32, #tpu.memory_space<vmem>>, vector<1x4x32xf32>
    %76 = vector.shape_cast %75 : vector<1x4x32xf32> to vector<4x32xf32>
    %77 = vector.shape_cast %76 : vector<4x32xf32> to vector<1x4x32xf32>
    %78 = vector.shape_cast %77 : vector<1x4x32xf32> to vector<1x4x32xf32>
    %79 = vector.broadcast %78 : vector<1x4x32xf32> to vector<4x4x32xf32>
    %80 = arith.truncf %79 : vector<4x4x32xf32> to vector<4x4x32xbf16>
    %81 = arith.truncf %29 : vector<4x32x8xf32> to vector<4x32x8xbf16>
    "tpu.trace_start"() <{level = 10 : i32, message = "bik,bkj->bij"}> : () -> ()
    %cst_28 = arith.constant dense<0.000000e+00> : vector<4x4x8xf32>
    %82 = tpu.matmul %80, %81, %cst_28 {dimension_numbers = #tpu.dot_dimension_numbers<[2], [1], [1], [2], [0, 0, 0, 1, 1, 2], [0], [0]>} : vector<4x4x32xbf16>, vector<4x32x8xbf16>, vector<4x4x8xf32> -> vector<4x4x8xf32>
    "tpu.trace_stop"() : () -> ()
    %83 = vector.broadcast %34 : vector<4x1x8xf32> to vector<4x4x8xf32>
    %84 = arith.addf %82, %83 : vector<4x4x8xf32>
    %85 = vector.shape_cast %84 : vector<4x4x8xf32> to vector<1x4x4x8xf32>
    %86 = vector.shape_cast %85 : vector<1x4x4x8xf32> to vector<1x4x4x8xf32>
    %87 = vector.broadcast %86 : vector<1x4x4x8xf32> to vector<2x4x4x8xf32>
    %88 = vector.shape_cast %87 : vector<2x4x4x8xf32> to vector<8x4x8xf32>
    %89 = arith.truncf %88 : vector<8x4x8xf32> to vector<8x4x8xbf16>
    %90 = arith.truncf %61 : vector<8x8x8xf32> to vector<8x8x8xbf16>
    "tpu.trace_start"() <{level = 10 : i32, message = "bqd,bkd->bqk"}> : () -> ()
    %cst_29 = arith.constant dense<0.000000e+00> : vector<8x4x8xf32>
    %91 = tpu.matmul %89, %90, %cst_29 {dimension_numbers = #tpu.dot_dimension_numbers<[2], [2], [1], [1], [0, 0, 0, 1, 1, 1], [0], [0]>} : vector<8x4x8xbf16>, vector<8x8x8xbf16>, vector<8x4x8xf32> -> vector<8x4x8xf32>
    "tpu.trace_stop"() : () -> ()
    %cst_30 = arith.constant 0.176776692 : f32
    %92 = vector.broadcast %cst_30 : f32 to vector<8x4x8xf32>
    %93 = arith.mulf %91, %92 : vector<8x4x8xf32>
    %cst_31 = arith.constant dense<0xFF800000> : vector<8x8xf32>
    %94 = vector.multi_reduction <maximumf>, %93, %cst_31 [1] : vector<8x4x8xf32> to vector<8x8xf32>
    %95 = vector.shape_cast %94 : vector<8x8xf32> to vector<8x1x8xf32>
    %96 = vector.broadcast %95 : vector<8x1x8xf32> to vector<8x4x8xf32>
    %97 = arith.subf %93, %96 : vector<8x4x8xf32>
    %98 = math.exp %97 : vector<8x4x8xf32>
    %cst_32 = arith.constant dense<0.000000e+00> : vector<8x8xf32>
    %99 = vector.multi_reduction <add>, %98, %cst_32 [1] : vector<8x4x8xf32> to vector<8x8xf32>
    %100 = vector.shape_cast %99 : vector<8x8xf32> to vector<8x1x8xf32>
    %101 = tpu.reciprocal %100 {approx = true} : vector<8x1x8xf32> -> vector<8x1x8xf32>
    %102 = vector.broadcast %101 : vector<8x1x8xf32> to vector<8x4x8xf32>
    %103 = arith.mulf %98, %102 : vector<8x4x8xf32>
    %104 = arith.truncf %103 : vector<8x4x8xf32> to vector<8x4x8xbf16>
    %105 = arith.truncf %74 : vector<8x8x8xf32> to vector<8x8x8xbf16>
    "tpu.trace_start"() <{level = 10 : i32, message = "bik,bkj->bij"}> : () -> ()
    %cst_33 = arith.constant dense<0.000000e+00> : vector<8x4x8xf32>
    %106 = tpu.matmul %104, %105, %cst_33 {dimension_numbers = #tpu.dot_dimension_numbers<[2], [1], [1], [2], [0, 0, 0, 1, 1, 2], [0], [0]>} : vector<8x4x8xbf16>, vector<8x8x8xbf16>, vector<8x4x8xf32> -> vector<8x4x8xf32>
    "tpu.trace_stop"() : () -> ()
    %107 = arith.addf %88, %106 : vector<8x4x8xf32>
    %108 = vector.shape_cast %107 : vector<8x4x8xf32> to vector<2x4x4x8xf32>
    %109 = vector.extract_strided_slice %108 {offsets = [0, 0, 0, 0], sizes = [2, 1, 4, 8], strides = [1, 1, 1, 1]} : vector<2x4x4x8xf32> to vector<2x1x4x8xf32>
    %110 = vector.shape_cast %109 : vector<2x1x4x8xf32> to vector<2x4x8xf32>
    %111 = vector.extract_strided_slice %108 {offsets = [0, 1, 0, 0], sizes = [2, 1, 4, 8], strides = [1, 1, 1, 1]} : vector<2x4x4x8xf32> to vector<2x1x4x8xf32>
    %112 = vector.shape_cast %111 : vector<2x1x4x8xf32> to vector<2x4x8xf32>
    %113 = vector.extract_strided_slice %108 {offsets = [0, 2, 0, 0], sizes = [2, 1, 4, 8], strides = [1, 1, 1, 1]} : vector<2x4x4x8xf32> to vector<2x1x4x8xf32>
    %114 = vector.shape_cast %113 : vector<2x1x4x8xf32> to vector<2x4x8xf32>
    %115 = vector.extract_strided_slice %108 {offsets = [0, 3, 0, 0], sizes = [2, 1, 4, 8], strides = [1, 1, 1, 1]} : vector<2x4x4x8xf32> to vector<2x1x4x8xf32>
    %116 = vector.shape_cast %115 : vector<2x1x4x8xf32> to vector<2x4x8xf32>
    %117 = tpu.concatenate %110, %112, %114, %116 in 2 : vector<2x4x8xf32>, vector<2x4x8xf32>, vector<2x4x8xf32>, vector<2x4x8xf32> -> vector<2x4x32xf32>
    %118 = vector.shape_cast %43 : vector<32x32xf32> to vector<1x32x32xf32>
    %119 = vector.shape_cast %118 : vector<1x32x32xf32> to vector<1x32x32xf32>
    %120 = vector.broadcast %119 : vector<1x32x32xf32> to vector<2x32x32xf32>
    %121 = arith.truncf %117 : vector<2x4x32xf32> to vector<2x4x32xbf16>
    %122 = arith.truncf %120 : vector<2x32x32xf32> to vector<2x32x32xbf16>
    "tpu.trace_start"() <{level = 10 : i32, message = "bik,bkj->bij"}> : () -> ()
    %cst_34 = arith.constant dense<0.000000e+00> : vector<2x4x32xf32>
    %123 = tpu.matmul %121, %122, %cst_34 {dimension_numbers = #tpu.dot_dimension_numbers<[2], [1], [1], [2], [0, 0, 0, 1, 1, 2], [0], [0]>} : vector<2x4x32xbf16>, vector<2x32x32xbf16>, vector<2x4x32xf32> -> vector<2x4x32xf32>
    "tpu.trace_stop"() : () -> ()
    %124 = vector.shape_cast %44 : vector<1x32xf32> to vector<1x1x32xf32>
    %125 = vector.broadcast %124 : vector<1x1x32xf32> to vector<2x4x32xf32>
    %126 = arith.addf %123, %125 : vector<2x4x32xf32>
    %cst_35 = arith.constant 0.000000e+00 : f32
    %127 = vector.broadcast %cst_35 : f32 to vector<2x4x32xf32>
    %128 = arith.maximumf %126, %127 : vector<2x4x32xf32>
    %129 = arith.addf %117, %128 : vector<2x4x32xf32>
    %c12 = arith.constant 12 : index
    %c0_36 = arith.constant 0 : index
    %c0_37 = arith.constant 0 : index
    %130 = vector.load %arg4[%c12, %c0_36, %c0_37] : memref<36x32x8xf32, #tpu.memory_space<vmem>>, vector<4x32x8xf32>
    %c16 = arith.constant 16 : index
    %c0_38 = arith.constant 0 : index
    %c0_39 = arith.constant 0 : index
    %131 = vector.load %arg4[%c16, %c0_38, %c0_39] : memref<36x32x8xf32, #tpu.memory_space<vmem>>, vector<4x32x8xf32>
    %c20 = arith.constant 20 : index
    %c0_40 = arith.constant 0 : index
    %c0_41 = arith.constant 0 : index
    %132 = vector.load %arg4[%c20, %c0_40, %c0_41] : memref<36x32x8xf32, #tpu.memory_space<vmem>>, vector<4x32x8xf32>
    %c3 = arith.constant 3 : index
    %c0_42 = arith.constant 0 : index
    %c0_43 = arith.constant 0 : index
    %133 = vector.load %arg5[%c3, %c0_42, %c0_43] : memref<9x4x8xf32, #tpu.memory_space<vmem>>, vector<1x4x8xf32>
    %134 = vector.shape_cast %133 : vector<1x4x8xf32> to vector<4x8xf32>
    %135 = vector.shape_cast %134 : vector<4x8xf32> to vector<4x1x8xf32>
    %c4_44 = arith.constant 4 : index
    %c0_45 = arith.constant 0 : index
    %c0_46 = arith.constant 0 : index
    %136 = vector.load %arg5[%c4_44, %c0_45, %c0_46] : memref<9x4x8xf32, #tpu.memory_space<vmem>>, vector<1x4x8xf32>
    %137 = vector.shape_cast %136 : vector<1x4x8xf32> to vector<4x8xf32>
    %138 = vector.shape_cast %137 : vector<4x8xf32> to vector<4x1x8xf32>
    %c5 = arith.constant 5 : index
    %c0_47 = arith.constant 0 : index
    %c0_48 = arith.constant 0 : index
    %139 = vector.load %arg5[%c5, %c0_47, %c0_48] : memref<9x4x8xf32, #tpu.memory_space<vmem>>, vector<1x4x8xf32>
    %140 = vector.shape_cast %139 : vector<1x4x8xf32> to vector<4x8xf32>
    %141 = vector.shape_cast %140 : vector<4x8xf32> to vector<4x1x8xf32>
    %c1_49 = arith.constant 1 : index
    %c0_50 = arith.constant 0 : index
    %c0_51 = arith.constant 0 : index
    %142 = vector.load %arg6[%c1_49, %c0_50, %c0_51] : memref<3x33x32xf32, #tpu.memory_space<vmem>>, vector<1x33x32xf32>
    %143 = vector.shape_cast %142 : vector<1x33x32xf32> to vector<33x32xf32>
    %144 = vector.extract_strided_slice %143 {offsets = [0, 0], sizes = [32, 32], strides = [1, 1]} : vector<33x32xf32> to vector<32x32xf32>
    %145 = vector.extract_strided_slice %143 {offsets = [32, 0], sizes = [1, 32], strides = [1, 1]} : vector<33x32xf32> to vector<1x32xf32>
    %146 = vector.shape_cast %129 : vector<2x4x32xf32> to vector<2x1x4x32xf32>
    %147 = vector.shape_cast %146 : vector<2x1x4x32xf32> to vector<2x1x4x32xf32>
    %148 = vector.broadcast %147 : vector<2x1x4x32xf32> to vector<2x4x4x32xf32>
    %149 = vector.shape_cast %148 : vector<2x4x4x32xf32> to vector<8x4x32xf32>
    %150 = vector.shape_cast %131 : vector<4x32x8xf32> to vector<1x4x32x8xf32>
    %151 = vector.shape_cast %150 : vector<1x4x32x8xf32> to vector<1x4x32x8xf32>
    %152 = vector.broadcast %151 : vector<1x4x32x8xf32> to vector<2x4x32x8xf32>
    %153 = vector.shape_cast %152 : vector<2x4x32x8xf32> to vector<8x32x8xf32>
    %154 = arith.truncf %149 : vector<8x4x32xf32> to vector<8x4x32xbf16>
    %155 = arith.truncf %153 : vector<8x32x8xf32> to vector<8x32x8xbf16>
    "tpu.trace_start"() <{level = 10 : i32, message = "bik,bkj->bij"}> : () -> ()
    %cst_52 = arith.constant dense<0.000000e+00> : vector<8x4x8xf32>
    %156 = tpu.matmul %154, %155, %cst_52 {dimension_numbers = #tpu.dot_dimension_numbers<[2], [1], [1], [2], [0, 0, 0, 1, 1, 2], [0], [0]>} : vector<8x4x32xbf16>, vector<8x32x8xbf16>, vector<8x4x8xf32> -> vector<8x4x8xf32>
    "tpu.trace_stop"() : () -> ()
    %157 = vector.shape_cast %138 : vector<4x1x8xf32> to vector<1x4x1x8xf32>
    %158 = vector.shape_cast %157 : vector<1x4x1x8xf32> to vector<1x4x1x8xf32>
    %159 = vector.broadcast %158 : vector<1x4x1x8xf32> to vector<2x4x1x8xf32>
    %160 = vector.shape_cast %159 : vector<2x4x1x8xf32> to vector<8x1x8xf32>
    %161 = vector.broadcast %160 : vector<8x1x8xf32> to vector<8x4x8xf32>
    %162 = arith.addf %156, %161 : vector<8x4x8xf32>
    %163 = vector.shape_cast %132 : vector<4x32x8xf32> to vector<1x4x32x8xf32>
    %164 = vector.shape_cast %163 : vector<1x4x32x8xf32> to vector<1x4x32x8xf32>
    %165 = vector.broadcast %164 : vector<1x4x32x8xf32> to vector<2x4x32x8xf32>
    %166 = vector.shape_cast %165 : vector<2x4x32x8xf32> to vector<8x32x8xf32>
    %167 = arith.truncf %149 : vector<8x4x32xf32> to vector<8x4x32xbf16>
    %168 = arith.truncf %166 : vector<8x32x8xf32> to vector<8x32x8xbf16>
    "tpu.trace_start"() <{level = 10 : i32, message = "bik,bkj->bij"}> : () -> ()
    %cst_53 = arith.constant dense<0.000000e+00> : vector<8x4x8xf32>
    %169 = tpu.matmul %167, %168, %cst_53 {dimension_numbers = #tpu.dot_dimension_numbers<[2], [1], [1], [2], [0, 0, 0, 1, 1, 2], [0], [0]>} : vector<8x4x32xbf16>, vector<8x32x8xbf16>, vector<8x4x8xf32> -> vector<8x4x8xf32>
    "tpu.trace_stop"() : () -> ()
    %170 = vector.shape_cast %141 : vector<4x1x8xf32> to vector<1x4x1x8xf32>
    %171 = vector.shape_cast %170 : vector<1x4x1x8xf32> to vector<1x4x1x8xf32>
    %172 = vector.broadcast %171 : vector<1x4x1x8xf32> to vector<2x4x1x8xf32>
    %173 = vector.shape_cast %172 : vector<2x4x1x8xf32> to vector<8x1x8xf32>
    %174 = vector.broadcast %173 : vector<8x1x8xf32> to vector<8x4x8xf32>
    %175 = arith.addf %169, %174 : vector<8x4x8xf32>
    %176 = vector.shape_cast %130 : vector<4x32x8xf32> to vector<1x4x32x8xf32>
    %177 = vector.shape_cast %176 : vector<1x4x32x8xf32> to vector<1x4x32x8xf32>
    %178 = vector.broadcast %177 : vector<1x4x32x8xf32> to vector<2x4x32x8xf32>
    %179 = vector.shape_cast %178 : vector<2x4x32x8xf32> to vector<8x32x8xf32>
    %180 = arith.truncf %149 : vector<8x4x32xf32> to vector<8x4x32xbf16>
    %181 = arith.truncf %179 : vector<8x32x8xf32> to vector<8x32x8xbf16>
    "tpu.trace_start"() <{level = 10 : i32, message = "bik,bkj->bij"}> : () -> ()
    %cst_54 = arith.constant dense<0.000000e+00> : vector<8x4x8xf32>
    %182 = tpu.matmul %180, %181, %cst_54 {dimension_numbers = #tpu.dot_dimension_numbers<[2], [1], [1], [2], [0, 0, 0, 1, 1, 2], [0], [0]>} : vector<8x4x32xbf16>, vector<8x32x8xbf16>, vector<8x4x8xf32> -> vector<8x4x8xf32>
    "tpu.trace_stop"() : () -> ()
    %183 = vector.shape_cast %135 : vector<4x1x8xf32> to vector<1x4x1x8xf32>
    %184 = vector.shape_cast %183 : vector<1x4x1x8xf32> to vector<1x4x1x8xf32>
    %185 = vector.broadcast %184 : vector<1x4x1x8xf32> to vector<2x4x1x8xf32>
    %186 = vector.shape_cast %185 : vector<2x4x1x8xf32> to vector<8x1x8xf32>
    %187 = vector.broadcast %186 : vector<8x1x8xf32> to vector<8x4x8xf32>
    %188 = arith.addf %182, %187 : vector<8x4x8xf32>
    %189 = arith.truncf %188 : vector<8x4x8xf32> to vector<8x4x8xbf16>
    %190 = arith.truncf %162 : vector<8x4x8xf32> to vector<8x4x8xbf16>
    "tpu.trace_start"() <{level = 10 : i32, message = "bqd,bkd->bqk"}> : () -> ()
    %cst_55 = arith.constant dense<0.000000e+00> : vector<8x4x4xf32>
    %191 = tpu.matmul %189, %190, %cst_55 {dimension_numbers = #tpu.dot_dimension_numbers<[2], [2], [1], [1], [0, 0, 0, 1, 1, 1], [0], [0]>} : vector<8x4x8xbf16>, vector<8x4x8xbf16>, vector<8x4x4xf32> -> vector<8x4x4xf32>
    "tpu.trace_stop"() : () -> ()
    %cst_56 = arith.constant 0.176776692 : f32
    %192 = vector.broadcast %cst_56 : f32 to vector<8x4x4xf32>
    %193 = arith.mulf %191, %192 : vector<8x4x4xf32>
    %cst_57 = arith.constant dense<0xFF800000> : vector<8x4xf32>
    %194 = vector.multi_reduction <maximumf>, %193, %cst_57 [1] : vector<8x4x4xf32> to vector<8x4xf32>
    %195 = vector.shape_cast %194 : vector<8x4xf32> to vector<8x1x4xf32>
    %196 = vector.broadcast %195 : vector<8x1x4xf32> to vector<8x4x4xf32>
    %197 = arith.subf %193, %196 : vector<8x4x4xf32>
    %198 = math.exp %197 : vector<8x4x4xf32>
    %cst_58 = arith.constant dense<0.000000e+00> : vector<8x4xf32>
    %199 = vector.multi_reduction <add>, %198, %cst_58 [1] : vector<8x4x4xf32> to vector<8x4xf32>
    %200 = vector.shape_cast %199 : vector<8x4xf32> to vector<8x1x4xf32>
    %201 = tpu.reciprocal %200 {approx = true} : vector<8x1x4xf32> -> vector<8x1x4xf32>
    %202 = vector.broadcast %201 : vector<8x1x4xf32> to vector<8x4x4xf32>
    %203 = arith.mulf %198, %202 : vector<8x4x4xf32>
    %204 = arith.truncf %203 : vector<8x4x4xf32> to vector<8x4x4xbf16>
    %205 = arith.truncf %175 : vector<8x4x8xf32> to vector<8x4x8xbf16>
    "tpu.trace_start"() <{level = 10 : i32, message = "bik,bkj->bij"}> : () -> ()
    %cst_59 = arith.constant dense<0.000000e+00> : vector<8x4x8xf32>
    %206 = tpu.matmul %204, %205, %cst_59 {dimension_numbers = #tpu.dot_dimension_numbers<[2], [1], [1], [2], [0, 0, 0, 1, 1, 2], [0], [0]>} : vector<8x4x4xbf16>, vector<8x4x8xbf16>, vector<8x4x8xf32> -> vector<8x4x8xf32>
    "tpu.trace_stop"() : () -> ()
    %207 = arith.addf %188, %206 : vector<8x4x8xf32>
    %208 = vector.shape_cast %207 : vector<8x4x8xf32> to vector<2x4x4x8xf32>
    %209 = vector.extract_strided_slice %208 {offsets = [0, 0, 0, 0], sizes = [2, 1, 4, 8], strides = [1, 1, 1, 1]} : vector<2x4x4x8xf32> to vector<2x1x4x8xf32>
    %210 = vector.shape_cast %209 : vector<2x1x4x8xf32> to vector<2x4x8xf32>
    %211 = vector.extract_strided_slice %208 {offsets = [0, 1, 0, 0], sizes = [2, 1, 4, 8], strides = [1, 1, 1, 1]} : vector<2x4x4x8xf32> to vector<2x1x4x8xf32>
    %212 = vector.shape_cast %211 : vector<2x1x4x8xf32> to vector<2x4x8xf32>
    %213 = vector.extract_strided_slice %208 {offsets = [0, 2, 0, 0], sizes = [2, 1, 4, 8], strides = [1, 1, 1, 1]} : vector<2x4x4x8xf32> to vector<2x1x4x8xf32>
    %214 = vector.shape_cast %213 : vector<2x1x4x8xf32> to vector<2x4x8xf32>
    %215 = vector.extract_strided_slice %208 {offsets = [0, 3, 0, 0], sizes = [2, 1, 4, 8], strides = [1, 1, 1, 1]} : vector<2x4x4x8xf32> to vector<2x1x4x8xf32>
    %216 = vector.shape_cast %215 : vector<2x1x4x8xf32> to vector<2x4x8xf32>
    %217 = tpu.concatenate %210, %212, %214, %216 in 2 : vector<2x4x8xf32>, vector<2x4x8xf32>, vector<2x4x8xf32>, vector<2x4x8xf32> -> vector<2x4x32xf32>
    %218 = vector.shape_cast %144 : vector<32x32xf32> to vector<1x32x32xf32>
    %219 = vector.shape_cast %218 : vector<1x32x32xf32> to vector<1x32x32xf32>
    %220 = vector.broadcast %219 : vector<1x32x32xf32> to vector<2x32x32xf32>
    %221 = arith.truncf %217 : vector<2x4x32xf32> to vector<2x4x32xbf16>
    %222 = arith.truncf %220 : vector<2x32x32xf32> to vector<2x32x32xbf16>
    "tpu.trace_start"() <{level = 10 : i32, message = "bik,bkj->bij"}> : () -> ()
    %cst_60 = arith.constant dense<0.000000e+00> : vector<2x4x32xf32>
    %223 = tpu.matmul %221, %222, %cst_60 {dimension_numbers = #tpu.dot_dimension_numbers<[2], [1], [1], [2], [0, 0, 0, 1, 1, 2], [0], [0]>} : vector<2x4x32xbf16>, vector<2x32x32xbf16>, vector<2x4x32xf32> -> vector<2x4x32xf32>
    "tpu.trace_stop"() : () -> ()
    %224 = vector.shape_cast %145 : vector<1x32xf32> to vector<1x1x32xf32>
    %225 = vector.broadcast %224 : vector<1x1x32xf32> to vector<2x4x32xf32>
    %226 = arith.addf %223, %225 : vector<2x4x32xf32>
    %cst_61 = arith.constant 0.000000e+00 : f32
    %227 = vector.broadcast %cst_61 : f32 to vector<2x4x32xf32>
    %228 = arith.maximumf %226, %227 : vector<2x4x32xf32>
    %229 = arith.addf %217, %228 : vector<2x4x32xf32>
    %c24 = arith.constant 24 : index
    %c0_62 = arith.constant 0 : index
    %c0_63 = arith.constant 0 : index
    %230 = vector.load %arg4[%c24, %c0_62, %c0_63] : memref<36x32x8xf32, #tpu.memory_space<vmem>>, vector<4x32x8xf32>
    %c28 = arith.constant 28 : index
    %c0_64 = arith.constant 0 : index
    %c0_65 = arith.constant 0 : index
    %231 = vector.load %arg4[%c28, %c0_64, %c0_65] : memref<36x32x8xf32, #tpu.memory_space<vmem>>, vector<4x32x8xf32>
    %c32 = arith.constant 32 : index
    %c0_66 = arith.constant 0 : index
    %c0_67 = arith.constant 0 : index
    %232 = vector.load %arg4[%c32, %c0_66, %c0_67] : memref<36x32x8xf32, #tpu.memory_space<vmem>>, vector<4x32x8xf32>
    %c6 = arith.constant 6 : index
    %c0_68 = arith.constant 0 : index
    %c0_69 = arith.constant 0 : index
    %233 = vector.load %arg5[%c6, %c0_68, %c0_69] : memref<9x4x8xf32, #tpu.memory_space<vmem>>, vector<1x4x8xf32>
    %234 = vector.shape_cast %233 : vector<1x4x8xf32> to vector<4x8xf32>
    %235 = vector.shape_cast %234 : vector<4x8xf32> to vector<4x1x8xf32>
    %c7 = arith.constant 7 : index
    %c0_70 = arith.constant 0 : index
    %c0_71 = arith.constant 0 : index
    %236 = vector.load %arg5[%c7, %c0_70, %c0_71] : memref<9x4x8xf32, #tpu.memory_space<vmem>>, vector<1x4x8xf32>
    %237 = vector.shape_cast %236 : vector<1x4x8xf32> to vector<4x8xf32>
    %238 = vector.shape_cast %237 : vector<4x8xf32> to vector<4x1x8xf32>
    %c8_72 = arith.constant 8 : index
    %c0_73 = arith.constant 0 : index
    %c0_74 = arith.constant 0 : index
    %239 = vector.load %arg5[%c8_72, %c0_73, %c0_74] : memref<9x4x8xf32, #tpu.memory_space<vmem>>, vector<1x4x8xf32>
    %240 = vector.shape_cast %239 : vector<1x4x8xf32> to vector<4x8xf32>
    %241 = vector.shape_cast %240 : vector<4x8xf32> to vector<4x1x8xf32>
    %c2_75 = arith.constant 2 : index
    %c0_76 = arith.constant 0 : index
    %c0_77 = arith.constant 0 : index
    %242 = vector.load %arg6[%c2_75, %c0_76, %c0_77] : memref<3x33x32xf32, #tpu.memory_space<vmem>>, vector<1x33x32xf32>
    %243 = vector.shape_cast %242 : vector<1x33x32xf32> to vector<33x32xf32>
    %244 = vector.extract_strided_slice %243 {offsets = [0, 0], sizes = [32, 32], strides = [1, 1]} : vector<33x32xf32> to vector<32x32xf32>
    %245 = vector.extract_strided_slice %243 {offsets = [32, 0], sizes = [1, 32], strides = [1, 1]} : vector<33x32xf32> to vector<1x32xf32>
    %246 = vector.shape_cast %229 : vector<2x4x32xf32> to vector<2x1x4x32xf32>
    %247 = vector.shape_cast %246 : vector<2x1x4x32xf32> to vector<2x1x4x32xf32>
    %248 = vector.broadcast %247 : vector<2x1x4x32xf32> to vector<2x4x4x32xf32>
    %249 = vector.shape_cast %248 : vector<2x4x4x32xf32> to vector<8x4x32xf32>
    %250 = vector.shape_cast %231 : vector<4x32x8xf32> to vector<1x4x32x8xf32>
    %251 = vector.shape_cast %250 : vector<1x4x32x8xf32> to vector<1x4x32x8xf32>
    %252 = vector.broadcast %251 : vector<1x4x32x8xf32> to vector<2x4x32x8xf32>
    %253 = vector.shape_cast %252 : vector<2x4x32x8xf32> to vector<8x32x8xf32>
    %254 = arith.truncf %249 : vector<8x4x32xf32> to vector<8x4x32xbf16>
    %255 = arith.truncf %253 : vector<8x32x8xf32> to vector<8x32x8xbf16>
    "tpu.trace_start"() <{level = 10 : i32, message = "bik,bkj->bij"}> : () -> ()
    %cst_78 = arith.constant dense<0.000000e+00> : vector<8x4x8xf32>
    %256 = tpu.matmul %254, %255, %cst_78 {dimension_numbers = #tpu.dot_dimension_numbers<[2], [1], [1], [2], [0, 0, 0, 1, 1, 2], [0], [0]>} : vector<8x4x32xbf16>, vector<8x32x8xbf16>, vector<8x4x8xf32> -> vector<8x4x8xf32>
    "tpu.trace_stop"() : () -> ()
    %257 = vector.shape_cast %238 : vector<4x1x8xf32> to vector<1x4x1x8xf32>
    %258 = vector.shape_cast %257 : vector<1x4x1x8xf32> to vector<1x4x1x8xf32>
    %259 = vector.broadcast %258 : vector<1x4x1x8xf32> to vector<2x4x1x8xf32>
    %260 = vector.shape_cast %259 : vector<2x4x1x8xf32> to vector<8x1x8xf32>
    %261 = vector.broadcast %260 : vector<8x1x8xf32> to vector<8x4x8xf32>
    %262 = arith.addf %256, %261 : vector<8x4x8xf32>
    %263 = vector.shape_cast %232 : vector<4x32x8xf32> to vector<1x4x32x8xf32>
    %264 = vector.shape_cast %263 : vector<1x4x32x8xf32> to vector<1x4x32x8xf32>
    %265 = vector.broadcast %264 : vector<1x4x32x8xf32> to vector<2x4x32x8xf32>
    %266 = vector.shape_cast %265 : vector<2x4x32x8xf32> to vector<8x32x8xf32>
    %267 = arith.truncf %249 : vector<8x4x32xf32> to vector<8x4x32xbf16>
    %268 = arith.truncf %266 : vector<8x32x8xf32> to vector<8x32x8xbf16>
    "tpu.trace_start"() <{level = 10 : i32, message = "bik,bkj->bij"}> : () -> ()
    %cst_79 = arith.constant dense<0.000000e+00> : vector<8x4x8xf32>
    %269 = tpu.matmul %267, %268, %cst_79 {dimension_numbers = #tpu.dot_dimension_numbers<[2], [1], [1], [2], [0, 0, 0, 1, 1, 2], [0], [0]>} : vector<8x4x32xbf16>, vector<8x32x8xbf16>, vector<8x4x8xf32> -> vector<8x4x8xf32>
    "tpu.trace_stop"() : () -> ()
    %270 = vector.shape_cast %241 : vector<4x1x8xf32> to vector<1x4x1x8xf32>
    %271 = vector.shape_cast %270 : vector<1x4x1x8xf32> to vector<1x4x1x8xf32>
    %272 = vector.broadcast %271 : vector<1x4x1x8xf32> to vector<2x4x1x8xf32>
    %273 = vector.shape_cast %272 : vector<2x4x1x8xf32> to vector<8x1x8xf32>
    %274 = vector.broadcast %273 : vector<8x1x8xf32> to vector<8x4x8xf32>
    %275 = arith.addf %269, %274 : vector<8x4x8xf32>
    %c2_80 = arith.constant 2 : index
    %c0_81 = arith.constant 0 : index
    %c0_82 = arith.constant 0 : index
    %276 = vector.load %arg7[%c2_80, %c0_81, %c0_82] : memref<3x4x32xf32, #tpu.memory_space<vmem>>, vector<1x1x32xf32>
    %277 = vector.shape_cast %276 : vector<1x1x32xf32> to vector<1x32xf32>
    %278 = vector.shape_cast %277 : vector<1x32xf32> to vector<1x1x32xf32>
    %279 = vector.shape_cast %278 : vector<1x1x32xf32> to vector<1x1x32xf32>
    %280 = vector.broadcast %279 : vector<1x1x32xf32> to vector<4x1x32xf32>
    %281 = arith.truncf %280 : vector<4x1x32xf32> to vector<4x1x32xbf16>
    %282 = arith.truncf %230 : vector<4x32x8xf32> to vector<4x32x8xbf16>
    "tpu.trace_start"() <{level = 10 : i32, message = "bik,bkj->bij"}> : () -> ()
    %cst_83 = arith.constant dense<0.000000e+00> : vector<4x1x8xf32>
    %283 = tpu.matmul %281, %282, %cst_83 {dimension_numbers = #tpu.dot_dimension_numbers<[2], [1], [1], [2], [0, 0, 0, 1, 1, 2], [0], [0]>} : vector<4x1x32xbf16>, vector<4x32x8xbf16>, vector<4x1x8xf32> -> vector<4x1x8xf32>
    "tpu.trace_stop"() : () -> ()
    %284 = arith.addf %283, %235 : vector<4x1x8xf32>
    %285 = vector.shape_cast %284 : vector<4x1x8xf32> to vector<1x4x1x8xf32>
    %286 = vector.shape_cast %285 : vector<1x4x1x8xf32> to vector<1x4x1x8xf32>
    %287 = vector.broadcast %286 : vector<1x4x1x8xf32> to vector<2x4x1x8xf32>
    %288 = vector.shape_cast %287 : vector<2x4x1x8xf32> to vector<8x1x8xf32>
    %289 = arith.truncf %288 : vector<8x1x8xf32> to vector<8x1x8xbf16>
    %290 = arith.truncf %262 : vector<8x4x8xf32> to vector<8x4x8xbf16>
    "tpu.trace_start"() <{level = 10 : i32, message = "bqd,bkd->bqk"}> : () -> ()
    %cst_84 = arith.constant dense<0.000000e+00> : vector<8x1x4xf32>
    %291 = tpu.matmul %289, %290, %cst_84 {dimension_numbers = #tpu.dot_dimension_numbers<[2], [2], [1], [1], [0, 0, 0, 1, 1, 1], [0], [0]>} : vector<8x1x8xbf16>, vector<8x4x8xbf16>, vector<8x1x4xf32> -> vector<8x1x4xf32>
    "tpu.trace_stop"() : () -> ()
    %cst_85 = arith.constant 0.176776692 : f32
    %292 = vector.broadcast %cst_85 : f32 to vector<8x1x4xf32>
    %293 = arith.mulf %291, %292 : vector<8x1x4xf32>
    %cst_86 = arith.constant dense<0xFF800000> : vector<8x4xf32>
    %294 = vector.multi_reduction <maximumf>, %293, %cst_86 [1] : vector<8x1x4xf32> to vector<8x4xf32>
    %295 = vector.shape_cast %294 : vector<8x4xf32> to vector<8x1x4xf32>
    %296 = arith.subf %293, %295 : vector<8x1x4xf32>
    %297 = math.exp %296 : vector<8x1x4xf32>
    %cst_87 = arith.constant dense<0.000000e+00> : vector<8x4xf32>
    %298 = vector.multi_reduction <add>, %297, %cst_87 [1] : vector<8x1x4xf32> to vector<8x4xf32>
    %299 = vector.shape_cast %298 : vector<8x4xf32> to vector<8x1x4xf32>
    %300 = tpu.reciprocal %299 {approx = true} : vector<8x1x4xf32> -> vector<8x1x4xf32>
    %301 = arith.mulf %297, %300 : vector<8x1x4xf32>
    %302 = arith.truncf %301 : vector<8x1x4xf32> to vector<8x1x4xbf16>
    %303 = arith.truncf %275 : vector<8x4x8xf32> to vector<8x4x8xbf16>
    "tpu.trace_start"() <{level = 10 : i32, message = "bik,bkj->bij"}> : () -> ()
    %cst_88 = arith.constant dense<0.000000e+00> : vector<8x1x8xf32>
    %304 = tpu.matmul %302, %303, %cst_88 {dimension_numbers = #tpu.dot_dimension_numbers<[2], [1], [1], [2], [0, 0, 0, 1, 1, 2], [0], [0]>} : vector<8x1x4xbf16>, vector<8x4x8xbf16>, vector<8x1x8xf32> -> vector<8x1x8xf32>
    "tpu.trace_stop"() : () -> ()
    %305 = arith.addf %288, %304 : vector<8x1x8xf32>
    %306 = vector.shape_cast %305 : vector<8x1x8xf32> to vector<2x4x1x8xf32>
    %307 = vector.extract_strided_slice %306 {offsets = [0, 0, 0, 0], sizes = [2, 1, 1, 8], strides = [1, 1, 1, 1]} : vector<2x4x1x8xf32> to vector<2x1x1x8xf32>
    %308 = vector.shape_cast %307 : vector<2x1x1x8xf32> to vector<2x1x8xf32>
    %309 = vector.extract_strided_slice %306 {offsets = [0, 1, 0, 0], sizes = [2, 1, 1, 8], strides = [1, 1, 1, 1]} : vector<2x4x1x8xf32> to vector<2x1x1x8xf32>
    %310 = vector.shape_cast %309 : vector<2x1x1x8xf32> to vector<2x1x8xf32>
    %311 = vector.extract_strided_slice %306 {offsets = [0, 2, 0, 0], sizes = [2, 1, 1, 8], strides = [1, 1, 1, 1]} : vector<2x4x1x8xf32> to vector<2x1x1x8xf32>
    %312 = vector.shape_cast %311 : vector<2x1x1x8xf32> to vector<2x1x8xf32>
    %313 = vector.extract_strided_slice %306 {offsets = [0, 3, 0, 0], sizes = [2, 1, 1, 8], strides = [1, 1, 1, 1]} : vector<2x4x1x8xf32> to vector<2x1x1x8xf32>
    %314 = vector.shape_cast %313 : vector<2x1x1x8xf32> to vector<2x1x8xf32>
    %315 = tpu.concatenate %308, %310, %312, %314 in 2 : vector<2x1x8xf32>, vector<2x1x8xf32>, vector<2x1x8xf32>, vector<2x1x8xf32> -> vector<2x1x32xf32>
    %316 = vector.shape_cast %244 : vector<32x32xf32> to vector<1x32x32xf32>
    %317 = vector.shape_cast %316 : vector<1x32x32xf32> to vector<1x32x32xf32>
    %318 = vector.broadcast %317 : vector<1x32x32xf32> to vector<2x32x32xf32>
    %319 = arith.truncf %315 : vector<2x1x32xf32> to vector<2x1x32xbf16>
    %320 = arith.truncf %318 : vector<2x32x32xf32> to vector<2x32x32xbf16>
    "tpu.trace_start"() <{level = 10 : i32, message = "bik,bkj->bij"}> : () -> ()
    %cst_89 = arith.constant dense<0.000000e+00> : vector<2x1x32xf32>
    %321 = tpu.matmul %319, %320, %cst_89 {dimension_numbers = #tpu.dot_dimension_numbers<[2], [1], [1], [2], [0, 0, 0, 1, 1, 2], [0], [0]>} : vector<2x1x32xbf16>, vector<2x32x32xbf16>, vector<2x1x32xf32> -> vector<2x1x32xf32>
    "tpu.trace_stop"() : () -> ()
    %322 = vector.shape_cast %245 : vector<1x32xf32> to vector<1x1x32xf32>
    %323 = vector.broadcast %322 : vector<1x1x32xf32> to vector<2x1x32xf32>
    %324 = arith.addf %321, %323 : vector<2x1x32xf32>
    %cst_90 = arith.constant 0.000000e+00 : f32
    %325 = vector.broadcast %cst_90 : f32 to vector<2x1x32xf32>
    %326 = arith.maximumf %324, %325 : vector<2x1x32xf32>
    %327 = arith.addf %315, %326 : vector<2x1x32xf32>
    %c0_91 = arith.constant 0 : index
    %c0_92 = arith.constant 0 : index
    %328 = vector.load %arg3[%c0_91, %c0_92] : memref<33x16xf32, #tpu.memory_space<vmem>>, vector<33x16xf32>
    %329 = vector.extract_strided_slice %328 {offsets = [0, 0], sizes = [32, 16], strides = [1, 1]} : vector<33x16xf32> to vector<32x16xf32>
    %330 = vector.shape_cast %329 : vector<32x16xf32> to vector<1x32x16xf32>
    %331 = vector.shape_cast %330 : vector<1x32x16xf32> to vector<1x32x16xf32>
    %332 = vector.broadcast %331 : vector<1x32x16xf32> to vector<2x32x16xf32>
    %333 = vector.extract_strided_slice %328 {offsets = [32, 0], sizes = [1, 16], strides = [1, 1]} : vector<33x16xf32> to vector<1x16xf32>
    %334 = arith.truncf %327 : vector<2x1x32xf32> to vector<2x1x32xbf16>
    %335 = arith.truncf %332 : vector<2x32x16xf32> to vector<2x32x16xbf16>
    "tpu.trace_start"() <{level = 10 : i32, message = "bik,bkj->bij"}> : () -> ()
    %cst_93 = arith.constant dense<0.000000e+00> : vector<2x1x16xf32>
    %336 = tpu.matmul %334, %335, %cst_93 {dimension_numbers = #tpu.dot_dimension_numbers<[2], [1], [1], [2], [0, 0, 0, 1, 1, 2], [0], [0]>} : vector<2x1x32xbf16>, vector<2x32x16xbf16>, vector<2x1x16xf32> -> vector<2x1x16xf32>
    "tpu.trace_stop"() : () -> ()
    %337 = vector.shape_cast %333 : vector<1x16xf32> to vector<1x1x16xf32>
    %338 = vector.broadcast %337 : vector<1x1x16xf32> to vector<2x1x16xf32>
    %339 = arith.addf %336, %338 : vector<2x1x16xf32>
    %340 = vector.shape_cast %339 : vector<2x1x16xf32> to vector<2x16xf32>
    %c0_94 = arith.constant 0 : index
    %c0_95 = arith.constant 0 : index
    %341 = vector.load %arg8[%c0_94, %c0_95] : memref<2x16xf32, #tpu.memory_space<vmem>>, vector<2x16xf32>
    tpu.vector_store %arg8[%c0_94, %c0_95], %340 {strides = array<i32>} : memref<2x16xf32, #tpu.memory_space<vmem>>, vector<2x16xf32>,
    return
  }
}

</mosaic_0001>

<bundles_post_ra>
// kernel: tpu_custom_call.1
= control target key start
LH: loop header
LB: loop body
LE: loop exit
PB: predicated region body
PF: predicated region fallthrough
CT: control target
= control target key end

     0   :  { %13 = vsyncpa [#allocation4], 0  ;;  %s10003_s0 = inlined_call_operand.vmem [shape: s32[2], index: 0, kind: input, shape index: {}]   ;;  %s10004_s1 = inlined_call_operand.vmem [shape: f32[2,8,8], index: 1, kind: input, shape index: {}]   ;;  %s10005_s2 = inlined_call_operand.vmem [shape: f32[9,32], index: 2, kind: input, shape index: {}]   ;;  %s10006_s3 = inlined_call_operand.vmem [shape: f32[33,16], index: 3, kind: input, shape index: {}]   ;;  %s10007_s4 = inlined_call_operand.vmem [shape: f32[36,32,8], index: 4, kind: input, shape index: {}]   ;;  %s10008_s5 = inlined_call_operand.vmem [shape: f32[9,4,8], index: 5, kind: input, shape index: {}]   ;;  %s10009_s6 = inlined_call_operand.vmem [shape: f32[3,33,32], index: 6, kind: input, shape index: {}]   ;;  %s10010_s7 = inlined_call_operand.vmem [shape: f32[3,4,32], index: 7, kind: input, shape index: {}]   ;;  %s10011_s8 = inlined_call_operand.hbm [shape: f32[2,16], index: 8, kind: output, shape index: {}]  }
   0x1   :  { %14 = vsyncpa [#allocation3], 0  ;;  %s21_s29 = sshll.u32 %s10003_s0, 4  ;;  %s22_s29 = int_to_ptr.vmem [resolvable:$true] %s21_s29 }
   0x2   :  { %s8171_s30 = scalar_lea.vmem %s22_s29, 16  ;;  %p8176_p1 = scmp.lt.s32.totalorder %s22_s29, %s22_s29 }
   0x3   :  { %p8172_p0 = scmp.ne.s32.totalorder %s22_s29, %s8171_s30  ;;  %p8177_p2 = scmp.lt.s32.totalorder %s8171_s30, %s8171_s30 }
   0x5   :  { %p8178_p3 = por %p8177_p2, %p8176_p1 }
   0x7   :  { %p8179_p4 = pnand %p8178_p3, %p8172_p0 }
   0x9   :  { %8182 = shalt.err (!%p8179_p4)
}
   0xa   :  { %s8209_s9 = smov [#allocation2]  }
   0xb   :  { %24 = dma.vmem_to_smem %s22_s29, 16, %s8209_s9, [#allocation4]  }
   0xc   :  { %8205 = dma.done.wait [#allocation4], 16  }
   0xd   :  { %8206 = vsyncadd [#allocation4], 4294967280 }
   0xe   :  { %42 = sfence }
   0xf   :  { %v56_v0 = vld [vmem:[%s10005_s2] sm:$0xff]  ;;  %vm71_vm0 = vcmask 1043456   ;;  %v8210_v2 = vmov 0.0   ;;  %v59_v4 = vld [vmem:[%s10004_s1 + $0x8] sm:$0xff]  ;;  %v44_v5 = vlaneseq  ;;  %s46_s15 = sld [smem:[#allocation2]]  ;;  %s6590_s16 = sld [smem:[#allocation2 + $0x1]] }
  0x10   :  { %v58_v1 = vld [vmem:[%s10004_s1] sm:$0xff]  ;;  %7189 = vmatprep.subr.bf16.mxu0 %v8210_v2  ;;  %7195 = vmatprep.subr.bf16.mxu1 %v8210_v2  ;;  %v62_v3 = vpack.c.bf16 %v56_v0, %v56_v0  ;;  %vm8211_vm1 = vmmov 0   ;;  %v61_v8 = vpack.c.bf16 %v59_v4, %v59_v4  ;;  %v8212_v9 = vmov 0   ;;  %v6596_v15 = vld [vmem:[%s10007_s4 + $0x88] sm:$0xff]  ;;  %v6597_v21 = vld [vmem:[%s10007_s4 + $0x90] sm:$0xff]  ;;  %s8214_s30 = smov 8  }
  0x11   :  { %7191 = vmatprep.mubr.msk.bf16.mxu0 %vm8211_vm1, %v8210_v2  ;;  %7197 = vmatprep.mubr.msk.bf16.mxu1 %vm8211_vm1, %v8210_v2  ;;  %v60_v7 = vpack.c.bf16 %v58_v1, %v58_v1  ;;  %vm67_vm2 = vcmask 64512   ;;  %v8282_v10 = vshrl.u32 %v44_v5, 7  ;;  %v6595_v14 = vld [vmem:[%s10007_s4 + $0x80] sm:$0xff]  ;;  %v6600_v19 = vld [vmem:[%s10007_s4 + $0xa8] sm:$0xff]  ;;  %v6598_v22 = vld [vmem:[%s10007_s4 + $0x98] sm:$0xff]  ;;  %vm310_vm5 = vcmask 261120  }
  0x12   :  { %v73_v6 = vsel %vm71_vm0, %v62_v3, 0  ;;  %8074 = vset.pattern.permute.xlu0 %v8212_v9  ;;  %v257_v16 = vpack.c.bf16 %v6596_v15, %v6595_v14  ;;  %v6599_v18 = vld [vmem:[%s10007_s4 + $0xa0] sm:$0xff]  ;;  %v6601_v23 = vld [vmem:[%s10007_s4 + $0xb0] sm:$0xff]  ;;  %v258_v24 = vpack.c.bf16 %v6598_v22, %v6597_v21  ;;  %v6602_v25 = vld [vmem:[%s10007_s4 + $0xb8] sm:$0xff]  ;;  %vm1579_vm6 = vcmask 60416   ;;  %s8215_s9 = smov 16  }
  0x13   :  { %7190 = vmatpush3.bf16.msra.mxu0 %v73_v6  ;;  %7196 = vmatpush3.bf16.msra.mxu1 %v73_v6  ;;  %v259_v20 = vpack.c.bf16 %v6600_v19, %v6599_v18  ;;  %v260_v26 = vpack.c.bf16 %v6602_v25, %v6601_v23  ;;  %v6592_v27 = vld [vmem:[%s10005_s2 + $0x8] ss:$0 sm:$0xff]  ;;  %v6603_v31 = vld [vmem:[%s10007_s4 + $0xc0] sm:$0xff]  ;;  %v6605_v45 = vld [vmem:[%s10007_s4 + $0xd0] sm:$0xff]  ;;  %s8216_s10 = smov 24   ;;  %vm2150_vm7 = vcmask 130048  }
  0x14   :  { %7201 = vmatprep.subr.bf16.mxu0 %v8210_v2  ;;  %7209 = vmatprep.subr.bf16.mxu1 %v8210_v2  ;;  %v6604_v34 = vld [vmem:[%s10007_s4 + $0xc8] sm:$0xff]  ;;  %v6607_v35 = vld [vmem:[%s10007_s4 + $0xe0] sm:$0xff]  ;;  %v6606_v47 = vld [vmem:[%s10007_s4 + $0xd8] sm:$0xff]  ;;  %vm2153_vm8 = vcmask 195584   ;;  %vm4009_vm9 = vcmask 1041408   ;;  %vm3836_vm10 = vcmask 27648  }
  0x15   :  { %v47_v11 = vstv %s46_s15  ;;  %v52_v12 = vstv %s6590_s16  ;;  %v6608_v36 = vld [vmem:[%s10007_s4 + $0xe8] sm:$0xff]  ;;  %v261_v43 = vpack.c.bf16 %v6604_v34, %v6603_v31  ;;  %v6609_v48 = vld [vmem:[%s10007_s4 + $0xf0] sm:$0xff]  ;;  %v262_v50 = vpack.c.bf16 %v6606_v47, %v6605_v45  ;;  %s8217_s18 = smov [#allocation5]  }
  0x16   :  { %7192 = vmatmul.mubr.msk.bf16.vlgmr.msra.gmra.mrb[0].mxu0 %vm67_vm2, %v60_v7  ;;  %7198 = vmatmul.mubr.msk.bf16.vlgmr.msra.gmra.mrb[0].mxu1 %vm67_vm2, %v61_v8  ;;  %vm48_vm3 = vcmp.lt.s32.totalorder %v8282_v10, %v47_v11  ;;  %vm53_vm4 = vcmp.lt.s32.totalorder %v8282_v10, %v52_v12  ;;  %v263_v44 = vpack.c.bf16 %v6608_v36, %v6607_v35  ;;  %v6610_v49 = vld [vmem:[%s10007_s4 + $0xf8] sm:$0xff]  ;;  %v6611_v56 = vld [vmem:[%s10007_s4 + $0x100] sm:$0xff]  ;;  %v6612_v57 = vld [vmem:[%s10007_s4 + $0x108] sm:$0xff]  ;;  %vm4005_vm11 = vcmask 31744   ;;  %s6580_s19 = sshll.u32 %s8217_s18, 4  ;;  %s6581_s19 = int_to_ptr.vmem [resolvable:$true] %s6580_s19 }
  0x17   :  { %7205 = vmatprep.mubr.msk.bf16.mxu0 %vm8211_vm1, %v8210_v2  ;;  %7213 = vmatprep.mubr.msk.bf16.mxu1 %vm8211_vm1, %v8210_v2  ;;  %v6589_v13 = vsel %vm48_vm3, 1.0, %v8210_v2  ;;  %v6591_v17 = vsel %vm53_vm4, 1.0, %v8210_v2  ;;  %v264_v51 = vpack.c.bf16 %v6610_v49, %v6609_v48  ;;  %v6615_v58 = vld [vmem:[%s10007_s4 + $0x120] sm:$0xff]  ;;  %v6616_v59 = vld [vmem:[%s10007_s4 + $0x128] sm:$0xff]  ;;  %v637_v60 = vpack.c.bf16 %v6612_v57, %v6611_v56  ;;  %v6613_v62 = vld [vmem:[%s10007_s4 + $0x110] sm:$0xff]  ;;  %s8183_s20 = scalar_lea.vmem %s6581_s19, 32  ;;  %p8188_p6 = scmp.lt.s32.totalorder %s6581_s19, %s6581_s19 }
  0x18   :  { %160 = vperm.xlu0 %8074, %v6589_v13   ;;  %7202 = vmatpush3.bf16.msra.mxu0 %v257_v16  ;;  %v639_v61 = vpack.c.bf16 %v6616_v59, %v6615_v58  ;;  %v6614_v63 = vld [vmem:[%s10007_s4 + $0x118] sm:$0xff]  ;;  %v6617_v0 = vld [vmem:[%s10007_s4 + $0x130] sm:$0xff]  ;;  %v6619_v5 = vld [vmem:[%s10007_s4 + $0x140] sm:$0xff]  ;;  %vm6569_vm12 = vcmask 1041409   ;;  %vm6572_vm13 = vcmask 123904   ;;  %p8184_p5 = scmp.ne.s32.totalorder %s6581_s19, %s8183_s20  ;;  %p8189_p7 = scmp.lt.s32.totalorder %s8183_s20, %s8183_s20 }
  0x19   :  { %7203 = vmatprep.subr.bf16.mxu0 %v8210_v2  ;;  %7210 = vmatpush3.bf16.msra.mxu1 %v259_v20  ;;  %v6618_v1 = vld [vmem:[%s10007_s4 + $0x138] sm:$0xff]  ;;  %v638_v3 = vpack.c.bf16 %v6614_v63, %v6613_v62  ;;  %v6620_v6 = vld [vmem:[%s10007_s4 + $0x148] sm:$0xff]  ;;  %v6623_v7 = vld [vmem:[%s10007_s4 + $0x160] sm:$0xff] }
  0x1a   :  { %7211 = vmatprep.subr.bf16.mxu1 %v8210_v2  ;;  %v640_v4 = vpack.c.bf16 %v6618_v1, %v6617_v0  ;;  %v6624_v8 = vld [vmem:[%s10007_s4 + $0x168] sm:$0xff]  ;;  %v641_v9 = vpack.c.bf16 %v6620_v6, %v6619_v5  ;;  %v6621_v12 = vld [vmem:[%s10007_s4 + $0x150] sm:$0xff]  ;;  %v6622_v13 = vld [vmem:[%s10007_s4 + $0x158] sm:$0xff]  ;;  %p8190_p8 = por %p8189_p7, %p8188_p6 }
  0x1b   :  { %v643_v11 = vpack.c.bf16 %v6624_v8, %v6623_v7  ;;  %v6625_v14 = vld [vmem:[%s10007_s4 + $0x170] sm:$0xff]  ;;  %v6626_v15 = vld [vmem:[%s10007_s4 + $0x178] sm:$0xff]  ;;  %v170_v18 = vld [vmem:[%s10007_s4] sm:$0xff] }
  0x1c   :  { %165 = vperm.xlu0 %8074, %v6591_v17   ;;  %7204 = vmatpush3.bf16.msra.mxu0 %v258_v24  ;;  %v644_v17 = vpack.c.bf16 %v6626_v15, %v6625_v14  ;;  %v171_v19 = vld [vmem:[%s10007_s4 + $0x8] sm:$0xff]  ;;  %v173_v25 = vld [vmem:[%s10007_s4 + $0x18] sm:$0xff]  ;;  %v178_v31 = vld [vmem:[%s10007_s4 + $0x40] sm:$0xff]  ;;  %p8191_p9 = pnand %p8190_p8, %p8184_p5 }
  0x1d   :  { %7212 = vmatpush3.bf16.msra.mxu1 %v260_v26  ;;  %7217 = vmatprep.subr.bf16.mxu0 %v8210_v2  ;;  %v175_v21 = vld [vmem:[%s10007_s4 + $0x28] sm:$0xff]  ;;  %v1012_v22 = vpack.c.bf16 %v171_v19, %v170_v18  ;;  %v6630_v47 = vld.sshfl [vmem:[%s10008_s5 + $0x4] sm:$0x33 pattern:$0x75316420] }
  0x1e   :  { %7225 = vmatprep.subr.bf16.mxu1 %v8210_v2  ;;  %v183_v34 = vld [vmem:[%s10007_s4 + $0x68] sm:$0xff]  ;;  %v273_v49 = vcombine.high %v6630_v47, %v6630_v47 }
  0x97   :  { %v161_v28 = vpop.permute.xlu0 %160 }
  0x9b   :  { %v166_v53 = vpop.permute.xlu0 %165 }
  0xe9   :  { %v109_v29 = vpop.f32.mrb[0].mxu0  ;;  %v152_v30 = vpop.f32.mrb[0].mxu1 }
  0xea   :  { %v110_v32 = vadd.f32 %v6592_v27, %v109_v29  ;;  %v7193_v33 = vpop.f32.mrb[1].mxu0  ;;  %v7199_v37 = vpop.f32.mrb[1].mxu1  ;;  %v153_v52 = vadd.f32 %v6592_v27, %v152_v30  ;;  %v177_v27 = vld [vmem:[%s10007_s4 + $0x38] sm:$0xff]  ;;  %v1010_v30 = vld [vmem:[%s10010_s7] sm:$0xf] }
  0xeb   :  { %v112_v38 = vpop.f32.mrb[2].mxu0  ;;  %v155_v39 = vpop.f32.mrb[2].mxu1  ;;  %v182_v33 = vld [vmem:[%s10007_s4 + $0x60] sm:$0xff]  ;;  %v1011_v35 = vpack.c.bf16 %v1010_v30, %v1010_v30 }
  0xec   :  { %v168_v40 = vmul.f32 %v161_v28, %v110_v32  ;;  %v7194_v41 = vpop.f32.mrb[3].mxu0  ;;  %v7200_v42 = vpop.f32.mrb[3].mxu1  ;;  %v169_v54 = vmul.f32 %v166_v53, %v153_v52  ;;  %v179_v32 = vld [vmem:[%s10007_s4 + $0x48] sm:$0xff]  ;;  %v1018_v37 = vpack.c.bf16 %v183_v34, %v182_v33  ;;  %v180_v38 = vld [vmem:[%s10007_s4 + $0x50] sm:$0xff]  ;;  %v181_v39 = vld [vmem:[%s10007_s4 + $0x58] sm:$0xff] }
  0xed   :  { %v1016_v36 = vpack.c.bf16 %v179_v32, %v178_v31  ;;  %v185_v41 = vld [vmem:[%s10007_s4 + $0x78] sm:$0xff]  ;;  %v1017_v42 = vpack.c.bf16 %v181_v39, %v180_v38 }
  0xee   :  { %v8342_v46 = vpack.c.bf16 %v168_v40, %v168_v40  ;;  %v8375_v55 = vpack.c.bf16 %v169_v54, %v169_v54  ;;  %v184_v40 = vld [vmem:[%s10007_s4 + $0x70] sm:$0xff] }
  0xf0   :  { %7206 = vmatmul.mubr.msk.bf16.vlgmr.msra.gmra.mrb[4].mxu0 %vm310_vm5, %v8342_v46  ;;  %7214 = vmatmul.mubr.msk.bf16.vlgmr.msra.gmra.mrb[4].mxu1 %vm310_vm5, %v8342_v46 }
  0xf1   :  { %7218 = vmatpush3.bf16.msra.mxu0 %v261_v43  ;;  %7226 = vmatpush3.bf16.msra.mxu1 %v263_v44 }
  0xf2   :  { %7219 = vmatprep.subr.bf16.mxu0 %v8210_v2  ;;  %7227 = vmatprep.subr.bf16.mxu1 %v8210_v2 }
  0xf3   :  { %7221 = vmatprep.mubr.msk.bf16.mxu0 %vm8211_vm1, %v8210_v2  ;;  %7229 = vmatprep.mubr.msk.bf16.mxu1 %vm8211_vm1, %v8210_v2 }
  0xf5   :  { %7220 = vmatpush3.bf16.msra.mxu0 %v262_v50  ;;  %7228 = vmatpush3.bf16.msra.mxu1 %v264_v51 }
  0xf6   :  { %7233 = vmatprep.subr.bf16.mxu0 %v8210_v2  ;;  %7241 = vmatprep.subr.bf16.mxu1 %v8210_v2 }
  0xf8   :  { %7222 = vmatmul.mubr.msk.bf16.vlgmr.msra.gmra.mrb[8].mxu0 %vm310_vm5, %v8342_v46  ;;  %7230 = vmatmul.mubr.msk.bf16.vlgmr.msra.gmra.mrb[8].mxu1 %vm310_vm5, %v8342_v46 }
  0xf9   :  { %7234 = vmatpush3.bf16.msra.mxu0 %v257_v16  ;;  %7242 = vmatpush3.bf16.msra.mxu1 %v259_v20  ;;  %v642_v16 = vpack.c.bf16 %v6622_v13, %v6621_v12  ;;  %v174_v20 = vld [vmem:[%s10007_s4 + $0x20] sm:$0xff] }
  0xfa   :  { %7235 = vmatprep.subr.bf16.mxu0 %v8210_v2  ;;  %7243 = vmatprep.subr.bf16.mxu1 %v8210_v2  ;;  %v1014_v23 = vpack.c.bf16 %v175_v21, %v174_v20 }
  0xfb   :  { %7237 = vmatprep.mubr.msk.bf16.mxu0 %vm8211_vm1, %v8210_v2  ;;  %7245 = vmatprep.mubr.msk.bf16.mxu1 %vm8211_vm1, %v8210_v2 }
  0xfd   :  { %7236 = vmatpush3.bf16.msra.mxu0 %v258_v24  ;;  %7244 = vmatpush3.bf16.msra.mxu1 %v260_v26  ;;  %v172_v24 = vld [vmem:[%s10007_s4 + $0x10] sm:$0xff] }
  0xfe   :  { %7249 = vmatprep.subr.bf16.mxu0 %v8210_v2  ;;  %7257 = vmatprep.subr.bf16.mxu1 %v8210_v2  ;;  %v176_v26 = vld [vmem:[%s10007_s4 + $0x30] sm:$0xff]  ;;  %v1013_v28 = vpack.c.bf16 %v173_v25, %v172_v24 }
  0xff   :  { %v1015_v29 = vpack.c.bf16 %v177_v27, %v176_v26  ;;  %v6639_v26 = vld.sshfl [vmem:[%s10008_s5 + $0x8] sm:$0x33 pattern:$0x75316420] }
 0x100   :  { %7238 = vmatmul.mubr.msk.bf16.vlgmr.msra.gmra.mrb[12].mxu0 %vm310_vm5, %v8375_v55  ;;  %7246 = vmatmul.mubr.msk.bf16.vlgmr.msra.gmra.mrb[12].mxu1 %vm310_vm5, %v8375_v55  ;;  %v653_v33 = vcombine.high %v6639_v26, %v6639_v26 }
 0x101   :  { %7250 = vmatpush3.bf16.msra.mxu0 %v261_v43  ;;  %7258 = vmatpush3.bf16.msra.mxu1 %v263_v44  ;;  %v1019_v43 = vpack.c.bf16 %v185_v41, %v184_v40  ;;  %v8213_v44 = vmov 1966171168  }
 0x102   :  { %7251 = vmatprep.subr.bf16.mxu0 %v8210_v2  ;;  %7259 = vmatprep.subr.bf16.mxu1 %v8210_v2  ;;  %v231_v45 = vunpack.c.l.s4 %v8213_v44 }
 0x103   :  { %7253 = vmatprep.mubr.msk.bf16.mxu0 %vm8211_vm1, %v8210_v2  ;;  %7261 = vmatprep.mubr.msk.bf16.mxu1 %vm8211_vm1, %v8210_v2 }
 0x105   :  { %7252 = vmatpush3.bf16.msra.mxu0 %v262_v50  ;;  %7260 = vmatpush3.bf16.msra.mxu1 %v264_v51  ;;  %v8573_v50 = vsub.s32 0, %v8282_v10 }
 0x106   :  { %7265 = vmatprep.subr.bf16.mxu0 %v8210_v2  ;;  %7273 = vmatprep.subr.bf16.mxu1 %v8210_v2 }
 0x108   :  { %7254 = vmatmul.mubr.msk.bf16.vlgmr.msra.gmra.mrb[16].mxu0 %vm310_vm5, %v8375_v55  ;;  %7262 = vmatmul.mubr.msk.bf16.vlgmr.msra.gmra.mrb[16].mxu1 %vm310_vm5, %v8375_v55 }
 0x109   :  { %7266 = vmatpush3.bf16.msra.mxu0 %v637_v60  ;;  %7274 = vmatpush3.bf16.msra.mxu1 %v639_v61 }
 0x10a   :  { %7267 = vmatprep.subr.bf16.mxu0 %v8210_v2  ;;  %7275 = vmatprep.subr.bf16.mxu1 %v8210_v2 }
 0x10b   :  { %7269 = vmatprep.mubr.msk.bf16.mxu0 %vm8211_vm1, %v8210_v2  ;;  %7277 = vmatprep.mubr.msk.bf16.mxu1 %vm8211_vm1, %v8210_v2 }
 0x10d   :  { %7268 = vmatpush3.bf16.msra.mxu0 %v638_v3  ;;  %7276 = vmatpush3.bf16.msra.mxu1 %v640_v4 }
 0x10e   :  { %7281 = vmatprep.subr.bf16.mxu0 %v8210_v2  ;;  %7289 = vmatprep.subr.bf16.mxu1 %v8210_v2 }
 0x110   :  { %7270 = vmatmul.mubr.msk.bf16.vlgmr.msra.gmra.mrb[20].mxu0 %vm310_vm5, %v8342_v46  ;;  %7278 = vmatmul.mubr.msk.bf16.vlgmr.msra.gmra.mrb[20].mxu1 %vm310_vm5, %v8342_v46 }
 0x111   :  { %7282 = vmatpush3.bf16.msra.mxu0 %v641_v9  ;;  %7290 = vmatpush3.bf16.msra.mxu1 %v643_v11 }
 0x112   :  { %7283 = vmatprep.subr.bf16.mxu0 %v8210_v2  ;;  %7291 = vmatprep.subr.bf16.mxu1 %v8210_v2 }
 0x113   :  { %7285 = vmatprep.mubr.msk.bf16.mxu0 %vm8211_vm1, %v8210_v2  ;;  %7293 = vmatprep.mubr.msk.bf16.mxu1 %vm8211_vm1, %v8210_v2 }
 0x115   :  { %7284 = vmatpush3.bf16.msra.mxu0 %v642_v16  ;;  %7292 = vmatpush3.bf16.msra.mxu1 %v644_v17 }
 0x116   :  { %7297 = vmatprep.subr.bf16.mxu0 %v8210_v2  ;;  %7305 = vmatprep.subr.bf16.mxu1 %v8210_v2 }
 0x118   :  { %7286 = vmatmul.mubr.msk.bf16.vlgmr.msra.gmra.mrb[24].mxu0 %vm310_vm5, %v8342_v46  ;;  %7294 = vmatmul.mubr.msk.bf16.vlgmr.msra.gmra.mrb[24].mxu1 %vm310_vm5, %v8342_v46  ;;  %v232_v46 = vunpack.c.0.s8 %v231_v45 }
 0x119   :  { %7298 = vmatpush3.bf16.msra.mxu0 %v637_v60  ;;  %7306 = vmatpush3.bf16.msra.mxu1 %v639_v61 }
 0x11a   :  { %7299 = vmatprep.subr.bf16.mxu0 %v8210_v2  ;;  %7307 = vmatprep.subr.bf16.mxu1 %v8210_v2  ;;  %v8570_v48 = vsub.s32 %v232_v46, %v8282_v10 }
 0x11b   :  { %7301 = vmatprep.mubr.msk.bf16.mxu0 %vm8211_vm1, %v8210_v2  ;;  %7309 = vmatprep.mubr.msk.bf16.mxu1 %vm8211_vm1, %v8210_v2 }
 0x11c   :  { %v8576_v51 = vrot.slane %v6630_v47, %v8570_v48  ;;  %v8579_v52 = vrot.slane %v273_v49, %v8570_v48  ;;  %v660_v34 = vrot.slane %v6639_v26, %v8570_v48 }
 0x11d   :  { %7300 = vmatpush3.bf16.msra.mxu0 %v638_v3  ;;  %7308 = vmatpush3.bf16.msra.mxu1 %v640_v4 }
 0x11e   :  { %7313 = vmatprep.subr.bf16.mxu0 %v8210_v2  ;;  %7321 = vmatprep.subr.bf16.mxu1 %v8210_v2  ;;  %v293_v53 = vrot.slane %v8576_v51, %v8573_v50  ;;  %v297_v54 = vrot.slane %v8579_v52, %v8573_v50  ;;  %v668_v40 = vcombine.high %v660_v34, %v660_v34 }
 0x120   :  { %7302 = vmatmul.mubr.msk.bf16.vlgmr.msra.gmra.mrb[28].mxu0 %vm310_vm5, %v8375_v55  ;;  %7310 = vmatmul.mubr.msk.bf16.vlgmr.msra.gmra.mrb[28].mxu1 %vm310_vm5, %v8375_v55  ;;  %v681_v46 = vrot.slane %v668_v40, %v8573_v50 }
 0x121   :  { %7314 = vmatpush3.bf16.msra.mxu0 %v641_v9  ;;  %7322 = vmatpush3.bf16.msra.mxu1 %v643_v11 }
 0x122   :  { %7315 = vmatprep.subr.bf16.mxu0 %v8210_v2  ;;  %7323 = vmatprep.subr.bf16.mxu1 %v8210_v2 }
 0x123   :  { %7317 = vmatprep.mubr.msk.bf16.mxu0 %vm8211_vm1, %v8210_v2  ;;  %7325 = vmatprep.mubr.msk.bf16.mxu1 %vm8211_vm1, %v8210_v2 }
 0x125   :  { %7316 = vmatpush3.bf16.msra.mxu0 %v642_v16  ;;  %7324 = vmatpush3.bf16.msra.mxu1 %v644_v17 }
 0x126   :  { %7329 = vmatprep.subr.bf16.mxu0 %v8210_v2  ;;  %7337 = vmatprep.subr.bf16.mxu1 %v8210_v2 }
 0x128   :  { %7318 = vmatmul.mubr.msk.bf16.vlgmr.msra.gmra.mrb[32].mxu0 %vm310_vm5, %v8375_v55  ;;  %7326 = vmatmul.mubr.msk.bf16.vlgmr.msra.gmra.mrb[32].mxu1 %vm310_vm5, %v8375_v55 }
 0x129   :  { %7330 = vmatpush3.bf16.msra.mxu0 %v1012_v22  ;;  %7338 = vmatpush3.bf16.msra.mxu1 %v1014_v23 }
 0x12a   :  { %7331 = vmatprep.subr.bf16.mxu0 %v8210_v2  ;;  %7339 = vmatprep.subr.bf16.mxu1 %v8210_v2 }
 0x12b   :  { %7333 = vmatprep.mubr.msk.bf16.mxu0 %vm8211_vm1, %v8210_v2  ;;  %7341 = vmatprep.mubr.msk.bf16.mxu1 %vm8211_vm1, %v8210_v2 }
 0x12d   :  { %7332 = vmatpush3.bf16.msra.mxu0 %v1013_v28  ;;  %7340 = vmatpush3.bf16.msra.mxu1 %v1015_v29 }
 0x12e   :  { %7345 = vmatprep.subr.bf16.mxu0 %v8210_v2  ;;  %7353 = vmatprep.subr.bf16.mxu1 %v8210_v2 }
 0x130   :  { %7334 = vmatmul.mubr.msk.bf16.vlgmr.msra.gmra.mrb[36].mxu0 %vm310_vm5, %v1011_v35  ;;  %7342 = vmatmul.mubr.msk.bf16.vlgmr.msra.gmra.mrb[36].mxu1 %vm310_vm5, %v1011_v35 }
 0x131   :  { %7346 = vmatpush3.bf16.msra.mxu0 %v1016_v36  ;;  %7354 = vmatpush3.bf16.msra.mxu1 %v1018_v37 }
 0x132   :  { %7347 = vmatprep.subr.bf16.mxu0 %v8210_v2  ;;  %7355 = vmatprep.subr.bf16.mxu1 %v8210_v2 }
 0x133   :  { %7349 = vmatprep.mubr.msk.bf16.mxu0 %vm8211_vm1, %v8210_v2  ;;  %7357 = vmatprep.mubr.msk.bf16.mxu1 %vm8211_vm1, %v8210_v2 }
 0x135   :  { %7348 = vmatpush3.bf16.msra.mxu0 %v1017_v42  ;;  %7356 = vmatpush3.bf16.msra.mxu1 %v1019_v43 }
 0x136   :  { %7361 = vmatprep.subr.bf16.mxu0 %v8210_v2  ;;  %7367 = vmatprep.subr.bf16.mxu1 %v8210_v2 }
 0x138   :  { %7350 = vmatmul.mubr.msk.bf16.vlgmr.msra.gmra.mrb[40].mxu0 %vm310_vm5, %v1011_v35  ;;  %7358 = vmatmul.mubr.msk.bf16.vlgmr.msra.gmra.mrb[40].mxu1 %vm310_vm5, %v1011_v35  ;;  %v667_v35 = vrot.slane %v653_v33, %v8570_v48 }
 0x139   :  { %7363 = vmatprep.mubr.msk.bf16.mxu0 %vm8211_vm1, %v8210_v2  ;;  %7369 = vmatprep.mubr.msk.bf16.mxu1 %vm8211_vm1, %v8210_v2 }
 0x13a   :  { %v669_v41 = vcombine.high %v667_v35, %v667_v35 }
 0x13c   :  { %v685_v47 = vrot.slane %v669_v41, %v8573_v50 }
 0x1c3   :  { %v348_v55 = vpop.f32.mrb[4].mxu0  ;;  %v388_v56 = vpop.f32.mrb[4].mxu1 }
 0x1c4   :  { %v349_v57 = vadd.f32 %v348_v55, %v293_v53  ;;  %v389_v58 = vadd.f32 %v388_v56, %v297_v54  ;;  %v7207_v59 = vpop.f32.mrb[5].mxu0  ;;  %v7215_v60 = vpop.f32.mrb[5].mxu1 }
 0x1c5   :  { %v351_v10 = vpop.f32.mrb[6].mxu0  ;;  %v391_v61 = vpop.f32.mrb[6].mxu1 }
 0x1c6   :  { %v1207_v62 = vpack.c.bf16 %v349_v57, %v349_v57  ;;  %v1208_v63 = vpack.c.bf16 %v389_v58, %v389_v58  ;;  %v7208_v0 = vpop.f32.mrb[7].mxu0  ;;  %v7216_v1 = vpop.f32.mrb[7].mxu1  ;;  %v8617_v61 = vrot.slane %v660_v34, %v8573_v50 }
 0x1c8   :  { %v1219_v3 = vsel %vm67_vm2, %v1207_v62, 0  ;;  %v1265_v4 = vsel %vm67_vm2, %v1208_v63, 0  ;;  %v8620_v62 = vrot.slane %v667_v35, %v8573_v50 }
 0x1c9   :  { %7362 = vmatpush3.bf16.xpose.msra.mxu0 %v1219_v3  ;;  %7368 = vmatpush3.bf16.xpose.msra.mxu1 %v1265_v4 }
 0x1ca   :  { %7373 = vmatprep.subr.bf16.mxu0 %v8210_v2  ;;  %7379 = vmatprep.subr.bf16.mxu1 %v8210_v2 }
 0x1cb   :  { %v8589_v5 = vpop.f32.mrb[8].mxu0  ;;  %v8591_v6 = vpop.f32.mrb[8].mxu1 }
 0x1cc   :  { %v7223_v7 = vpop.f32.mrb[9].mxu0  ;;  %v7231_v8 = vpop.f32.mrb[9].mxu1 }
 0x1cd   :  { %v431_v9 = vpop.f32.mrb[10].mxu0  ;;  %v471_v11 = vpop.f32.mrb[10].mxu1 }
 0x1ce   :  { %v7224_v12 = vpop.f32.mrb[11].mxu0  ;;  %v7232_v13 = vpop.f32.mrb[11].mxu1  ;;  %v6627_v11 = vld.sshfl [vmem:[%s10008_s5] sm:$0x33 pattern:$0x75316420] }
 0x1d3   :  { %v511_v14 = vpop.f32.mrb[12].mxu0  ;;  %v551_v15 = vpop.f32.mrb[12].mxu1 }
 0x1d4   :  { %v8593_v16 = vadd.f32 %v511_v14, %v293_v53  ;;  %v8595_v17 = vadd.f32 %v551_v15, %v297_v54  ;;  %v7239_v18 = vpop.f32.mrb[13].mxu0  ;;  %v7247_v19 = vpop.f32.mrb[13].mxu1  ;;  %v288_v14 = vcombine.high %v8576_v51, %v8576_v51  ;;  %v289_v15 = vcombine.high %v8579_v52, %v8579_v52 }
 0x1d5   :  { %v514_v20 = vpop.f32.mrb[14].mxu0  ;;  %v554_v21 = vpop.f32.mrb[14].mxu1  ;;  %v229_v18 = vcombine.high %v6627_v11, %v6627_v11 }
 0x1d6   :  { %v7240_v22 = vpop.f32.mrb[15].mxu0  ;;  %v7248_v23 = vpop.f32.mrb[15].mxu1  ;;  %v301_v19 = vrot.slane %v288_v14, %v8573_v50  ;;  %v305_v20 = vrot.slane %v289_v15, %v8573_v50 }
 0x1d7   :  { %v243_v51 = vrot.slane %v229_v18, %v8570_v48 }
 0x1d8   :  { %v429_v33 = vadd.f32 %v8589_v5, %v301_v19  ;;  %v469_v34 = vadd.f32 %v8591_v6, %v305_v20 }
 0x1db   :  { %v8597_v24 = vpop.f32.mrb[16].mxu0  ;;  %v8599_v25 = vpop.f32.mrb[16].mxu1 }
 0x1dc   :  { %v7255_v27 = vpop.f32.mrb[17].mxu0  ;;  %v7263_v28 = vpop.f32.mrb[17].mxu1 }
 0x1dd   :  { %v594_v29 = vpop.f32.mrb[18].mxu0  ;;  %v634_v30 = vpop.f32.mrb[18].mxu1 }
 0x1de   :  { %v7256_v31 = vpop.f32.mrb[19].mxu0  ;;  %v7264_v32 = vpop.f32.mrb[19].mxu1  ;;  %v236_v29 = vrot.slane %v6627_v11, %v8570_v48 }
 0x1e0   :  { %v1023_v35 = vrot.slane %v236_v29, %v8573_v50  ;;  %v244_v41 = vcombine.high %v236_v29, %v236_v29  ;;  %v632_v29 = vadd.f32 %v8599_v25, %v305_v20 }
 0x1e3   :  { %v8606_v36 = vpop.f32.mrb[20].mxu0  ;;  %v8608_v37 = vpop.f32.mrb[20].mxu1 }
 0x1e4   :  { %v7271_v38 = vpop.f32.mrb[21].mxu0  ;;  %v7279_v39 = vpop.f32.mrb[21].mxu1  ;;  %v725_v20 = vadd.f32 %v8606_v36, %v8617_v61 }
 0x1e5   :  { %v727_v42 = vpop.f32.mrb[22].mxu0  ;;  %v767_v43 = vpop.f32.mrb[22].mxu1  ;;  %v1027_v38 = vrot.slane %v243_v51, %v8573_v50 }
 0x1e6   :  { %v7272_v44 = vpop.f32.mrb[23].mxu0  ;;  %v7280_v45 = vpop.f32.mrb[23].mxu1  ;;  %v245_v42 = vcombine.high %v243_v51, %v243_v51  ;;  %v1209_v43 = vpack.c.bf16 %v429_v33, %v429_v33  ;;  %v1740_v36 = vpack.c.bf16 %v725_v20, %v725_v20 }
 0x1e7   :  { %v1210_v44 = vpack.c.bf16 %v469_v34, %v469_v34 }
 0x1eb   :  { %v804_v49 = vpop.f32.mrb[24].mxu0  ;;  %v844_v53 = vpop.f32.mrb[24].mxu1 }
 0x1ec   :  { %v8612_v54 = vadd.f32 %v804_v49, %v681_v46  ;;  %v8614_v55 = vadd.f32 %v844_v53, %v685_v47  ;;  %v7287_v56 = vpop.f32.mrb[25].mxu0  ;;  %v7295_v57 = vpop.f32.mrb[25].mxu1 }
 0x1ed   :  { %v807_v58 = vpop.f32.mrb[26].mxu0  ;;  %v847_v59 = vpop.f32.mrb[26].mxu1 }
 0x1ee   :  { %v7288_v60 = vpop.f32.mrb[27].mxu0  ;;  %v7296_v10 = vpop.f32.mrb[27].mxu1  ;;  %v1311_v59 = vsel %vm67_vm2, %v1209_v43, 0 }
 0x1ef   :  { %v1357_v60 = vsel %vm67_vm2, %v1210_v44, 0  ;;  %v1031_v10 = vrot.slane %v244_v41, %v8573_v50 }
 0x1f3   :  { %v884_v63 = vpop.f32.mrb[28].mxu0  ;;  %v924_v0 = vpop.f32.mrb[28].mxu1 }
 0x1f4   :  { %v8623_v1 = vadd.f32 %v884_v63, %v8617_v61  ;;  %v8626_v3 = vadd.f32 %v924_v0, %v8620_v62  ;;  %v7303_v4 = vpop.f32.mrb[29].mxu0  ;;  %v7311_v7 = vpop.f32.mrb[29].mxu1  ;;  %v1035_v63 = vrot.slane %v245_v42, %v8573_v50 }
 0x1f5   :  { %v887_v8 = vpop.f32.mrb[30].mxu0  ;;  %v927_v9 = vpop.f32.mrb[30].mxu1  ;;  %v1211_v7 = vpack.c.bf16 %v8593_v16, %v8593_v16 }
 0x1f6   :  { %v7304_v12 = vpop.f32.mrb[31].mxu0  ;;  %v7312_v13 = vpop.f32.mrb[31].mxu1  ;;  %v1212_v8 = vpack.c.bf16 %v8595_v17, %v8595_v17 }
 0x1f7   :  { %v1400_v16 = vsel %vm67_vm2, %v1211_v7, 0 }
 0x1f8   :  { %v1443_v17 = vsel %vm67_vm2, %v1212_v8, 0 }
 0x1fb   :  { %v964_v21 = vpop.f32.mrb[32].mxu0  ;;  %v1004_v22 = vpop.f32.mrb[32].mxu1 }
 0x1fc   :  { %v8637_v23 = vadd.f32 %v964_v21, %v681_v46  ;;  %v8639_v26 = vadd.f32 %v1004_v22, %v685_v47  ;;  %v7319_v27 = vpop.f32.mrb[33].mxu0  ;;  %v7327_v28 = vpop.f32.mrb[33].mxu1 }
 0x1fd   :  { %v967_v30 = vpop.f32.mrb[34].mxu0  ;;  %v1007_v31 = vpop.f32.mrb[34].mxu1  ;;  %v592_v28 = vadd.f32 %v8597_v24, %v301_v19  ;;  %v1214_v24 = vpack.c.bf16 %v632_v29, %v632_v29 }
 0x1fe   :  { %v7320_v52 = vpop.f32.mrb[35].mxu0  ;;  %v7328_v32 = vpop.f32.mrb[35].mxu1  ;;  %v765_v30 = vadd.f32 %v8608_v37, %v8620_v62  ;;  %v1752_v37 = vsel %vm71_vm0, %v1740_v36, 0 }
 0x1ff   :  { %v1213_v51 = vpack.c.bf16 %v592_v28, %v592_v28  ;;  %v1529_v19 = vsel %vm67_vm2, %v1214_v24, 0 }
 0x200   :  { %v1741_v61 = vpack.c.bf16 %v765_v30, %v765_v30 }
 0x201   :  { %v1486_v25 = vsel %vm67_vm2, %v1213_v51, 0 }
 0x202   :  { %v1798_v62 = vsel %vm71_vm0, %v1741_v61, 0 }
 0x203   :  { %v1077_v39 = vpop.f32.mrb[36].mxu0  ;;  %v1117_v40 = vpop.f32.mrb[36].mxu1 }
 0x204   :  { %v8647_v45 = vadd.f32 %v1077_v39, %v1023_v35  ;;  %v8649_v46 = vadd.f32 %v1117_v40, %v1027_v38  ;;  %v7335_v47 = vpop.f32.mrb[37].mxu0  ;;  %v7343_v49 = vpop.f32.mrb[37].mxu1 }
 0x205   :  { %v1080_v53 = vpop.f32.mrb[38].mxu0  ;;  %v1120_v5 = vpop.f32.mrb[38].mxu1 }
 0x206   :  { %v1203_v6 = vpack.c.bf16 %v8647_v45, %v8647_v45  ;;  %v1204_v56 = vpack.c.bf16 %v8649_v46, %v8649_v46  ;;  %v7336_v57 = vpop.f32.mrb[39].mxu0  ;;  %v7344_v58 = vpop.f32.mrb[39].mxu1 }
 0x208   :  { %7364 = vmatmul.mubr.msk.bf16.vlgmr.msra.gmra.mrb[44].mxu0 %vm67_vm2, %v1203_v6  ;;  %7370 = vmatmul.mubr.msk.bf16.vlgmr.msra.gmra.mrb[44].mxu1 %vm67_vm2, %v1204_v56 }
 0x209   :  { %7374 = vmatpush3.bf16.xpose.msra.mxu0 %v1311_v59  ;;  %7380 = vmatpush3.bf16.xpose.msra.mxu1 %v1357_v60 }
 0x20a   :  { %7375 = vmatprep.mubr.msk.bf16.mxu0 %vm8211_vm1, %v8210_v2  ;;  %7381 = vmatprep.mubr.msk.bf16.mxu1 %vm8211_vm1, %v8210_v2 }
 0x20b   :  { %v1157_v0 = vpop.f32.mrb[40].mxu0  ;;  %v1197_v4 = vpop.f32.mrb[40].mxu1  ;;  %7385 = vmatprep.subr.bf16.mxu0 %v8210_v2  ;;  %7391 = vmatprep.subr.bf16.mxu1 %v8210_v2 }
 0x20c   :  { %v8671_v9 = vadd.f32 %v1157_v0, %v1031_v10  ;;  %v8673_v11 = vadd.f32 %v1197_v4, %v1035_v63  ;;  %v7351_v12 = vpop.f32.mrb[41].mxu0  ;;  %v7359_v13 = vpop.f32.mrb[41].mxu1 }
 0x20d   :  { %v1160_v14 = vpop.f32.mrb[42].mxu0  ;;  %v1200_v15 = vpop.f32.mrb[42].mxu1 }
 0x20e   :  { %v1205_v18 = vpack.c.bf16 %v8671_v9, %v8671_v9  ;;  %v1206_v21 = vpack.c.bf16 %v8673_v11, %v8673_v11  ;;  %v7352_v22 = vpop.f32.mrb[43].mxu0  ;;  %v7360_v27 = vpop.f32.mrb[43].mxu1 }
 0x210   :  { %7376 = vmatmul.mubr.msk.bf16.vlgmr.msra.gmra.mrb[48].mxu0 %vm67_vm2, %v1205_v18  ;;  %7382 = vmatmul.mubr.msk.bf16.vlgmr.msra.gmra.mrb[48].mxu1 %vm67_vm2, %v1206_v21 }
 0x211   :  { %7386 = vmatpush3.bf16.xpose.msra.mxu0 %v1400_v16  ;;  %7392 = vmatpush3.bf16.xpose.msra.mxu1 %v1443_v17 }
 0x212   :  { %7387 = vmatprep.mubr.msk.bf16.mxu0 %vm8211_vm1, %v8210_v2  ;;  %7393 = vmatprep.mubr.msk.bf16.mxu1 %vm8211_vm1, %v8210_v2 }
 0x213   :  { %7397 = vmatprep.subr.bf16.mxu0 %v8210_v2  ;;  %7403 = vmatprep.subr.bf16.mxu1 %v8210_v2 }
 0x218   :  { %7388 = vmatmul.mubr.msk.bf16.vlgmr.msra.gmra.mrb[52].mxu0 %vm67_vm2, %v1203_v6  ;;  %7394 = vmatmul.mubr.msk.bf16.vlgmr.msra.gmra.mrb[52].mxu1 %vm67_vm2, %v1204_v56 }
 0x219   :  { %7398 = vmatpush3.bf16.xpose.msra.mxu0 %v1486_v25  ;;  %7404 = vmatpush3.bf16.xpose.msra.mxu1 %v1529_v19 }
 0x21a   :  { %7399 = vmatprep.mubr.msk.bf16.mxu0 %vm8211_vm1, %v8210_v2  ;;  %7405 = vmatprep.mubr.msk.bf16.mxu1 %vm8211_vm1, %v8210_v2 }
 0x21b   :  { %7409 = vmatprep.subr.bf16.mxu0 %v8210_v2  ;;  %7415 = vmatprep.subr.bf16.mxu1 %v8210_v2 }
 0x220   :  { %7400 = vmatmul.mubr.msk.bf16.vlgmr.msra.gmra.mrb[56].mxu0 %vm67_vm2, %v1205_v18  ;;  %7406 = vmatmul.mubr.msk.bf16.vlgmr.msra.gmra.mrb[56].mxu1 %vm67_vm2, %v1206_v21 }
 0x221   :  { %7410 = vmatpush3.bf16.msra.mxu0 %v1752_v37  ;;  %7416 = vmatpush3.bf16.msra.mxu1 %v1798_v62 }
 0x222   :  { %7411 = vmatprep.mubr.msk.bf16.mxu0 %vm8211_vm1, %v8210_v2  ;;  %7417 = vmatprep.mubr.msk.bf16.mxu1 %vm8211_vm1, %v8210_v2 }
 0x223   :  { %7421 = vmatprep.subr.bf16.mxu0 %v8210_v2  ;;  %7427 = vmatprep.subr.bf16.mxu1 %v8210_v2 }
 0x2db   :  { %v1255_v31 = vpop.f32.mrb[44].mxu0  ;;  %v1301_v52 = vpop.f32.mrb[44].mxu1 }
 0x2dc   :  { %v1571_v32 = vmul.f32 0.17677669, %v1255_v31  ;;  %v1572_v33 = vmul.f32 0.17677669, %v1301_v52  ;;  %v7365_v34 = vpop.f32.mrb[45].mxu0  ;;  %v7371_v35 = vpop.f32.mrb[45].mxu1 }
 0x2dd   :  { %v1258_v38 = vpop.f32.mrb[46].mxu0  ;;  %v1304_v39 = vpop.f32.mrb[46].mxu1 }
 0x2de   :  { %v1580_v40 = vsel %vm1579_vm6, %v1571_v32, -inf  ;;  %v1587_v41 = vsel %vm1579_vm6, %v1572_v33, -inf  ;;  %v7366_v42 = vpop.f32.mrb[47].mxu0  ;;  %v7372_v43 = vpop.f32.mrb[47].mxu1 }
 0x2df   :  { %v1581_v44 = vrot.slane %v1580_v40, 4  ;;  %v1588_v47 = vrot.slane %v1587_v41, 4 }
 0x2e1   :  { %v1582_v49 = vmax.f32 %v1580_v40, %v1581_v44  ;;  %v1589_v53 = vmax.f32 %v1587_v41, %v1588_v47 }
 0x2e3   :  { %v1583_v5 = vrot.slane %v1582_v49, 2  ;;  %v1590_v6 = vrot.slane %v1589_v53, 2  ;;  %v1347_v56 = vpop.f32.mrb[48].mxu0  ;;  %v1393_v57 = vpop.f32.mrb[48].mxu1 }
 0x2e4   :  { %v1573_v58 = vmul.f32 0.17677669, %v1347_v56  ;;  %v1574_v59 = vmul.f32 0.17677669, %v1393_v57  ;;  %v7377_v60 = vpop.f32.mrb[49].mxu0  ;;  %v7383_v10 = vpop.f32.mrb[49].mxu1 }
 0x2e5   :  { %v1584_v63 = vmax.f32 %v1582_v49, %v1583_v5  ;;  %v1591_v0 = vmax.f32 %v1589_v53, %v1590_v6  ;;  %v1350_v4 = vpop.f32.mrb[50].mxu0  ;;  %v1396_v7 = vpop.f32.mrb[50].mxu1 }
 0x2e6   :  { %v1594_v8 = vsel %vm1579_vm6, %v1573_v58, -inf  ;;  %v1601_v12 = vsel %vm1579_vm6, %v1574_v59, -inf  ;;  %v7378_v13 = vpop.f32.mrb[51].mxu0  ;;  %v7384_v14 = vpop.f32.mrb[51].mxu1 }
 0x2e7   :  { %v1585_v15 = vrot.slane %v1584_v63, 1  ;;  %v1592_v18 = vrot.slane %v1591_v0, 1  ;;  %v1595_v21 = vrot.slane %v1594_v8, 4  ;;  %v1602_v22 = vrot.slane %v1601_v12, 4 }
 0x2e9   :  { %v1586_v27 = vmax.f32 %v1584_v63, %v1585_v15  ;;  %v1593_v16 = vmax.f32 %v1591_v0, %v1592_v18  ;;  %v1596_v17 = vmax.f32 %v1594_v8, %v1595_v21  ;;  %v1603_v28 = vmax.f32 %v1601_v12, %v1602_v22 }
 0x2eb   :  { %v1636_v29 = vsub.f32 %v1571_v32, %v1586_v27  ;;  %v1637_v51 = vsub.f32 %v1572_v33, %v1593_v16  ;;  %v1597_v24 = vrot.slane %v1596_v17, 2  ;;  %v1604_v25 = vrot.slane %v1603_v28, 2  ;;  %v1436_v19 = vpop.f32.mrb[52].mxu0  ;;  %v1479_v20 = vpop.f32.mrb[52].mxu1 }
 0x2ec   :  { %v8719_v30 = vmul.f32 0.17677669, %v1436_v19  ;;  %v8721_v36 = vmul.f32 0.17677669, %v1479_v20  ;;  %v7389_v61 = vpop.f32.mrb[53].mxu0  ;;  %v7395_v37 = vpop.f32.mrb[53].mxu1 }
 0x2ed   :  { %v1644_v62 = vmul.f32 1.442695, %v1636_v29  ;;  %v1646_v31 = vmul.f32 1.442695, %v1637_v51  ;;  %v1598_v52 = vmax.f32 %v1596_v17, %v1597_v24  ;;  %v1605_v34 = vmax.f32 %v1603_v28, %v1604_v25  ;;  %v1439_v35 = vpop.f32.mrb[54].mxu0  ;;  %v1482_v38 = vpop.f32.mrb[54].mxu1 }
 0x2ee   :  { %v1608_v32 = vsel %vm1579_vm6, %v8719_v30, -inf  ;;  %v1615_v33 = vsel %vm1579_vm6, %v8721_v36, -inf  ;;  %v7390_v39 = vpop.f32.mrb[55].mxu0  ;;  %v7396_v40 = vpop.f32.mrb[55].mxu1 }
 0x2ef   :  { %8075 = vpow2.f32 %v1644_v62  ;;  %v1599_v41 = vrot.slane %v1598_v52, 1  ;;  %v1606_v42 = vrot.slane %v1605_v34, 1  ;;  %v1609_v43 = vrot.slane %v1608_v32, 4 }
 0x2f0   :  { %8077 = vpow2.f32 %v1646_v31  ;;  %v1616_v44 = vrot.slane %v1615_v33, 4 }
 0x2f1   :  { %v1600_v47 = vmax.f32 %v1598_v52, %v1599_v41  ;;  %v1607_v49 = vmax.f32 %v1605_v34, %v1606_v42  ;;  %v1610_v53 = vmax.f32 %v1608_v32, %v1609_v43 }
 0x2f2   :  { %v1617_v5 = vmax.f32 %v1615_v33, %v1616_v44 }
 0x2f3   :  { %v1638_v6 = vsub.f32 %v1573_v58, %v1600_v47  ;;  %v1639_v56 = vsub.f32 %v1574_v59, %v1607_v49  ;;  %v1611_v57 = vrot.slane %v1610_v53, 2  ;;  %v1522_v60 = vpop.f32.mrb[56].mxu0  ;;  %v1565_v10 = vpop.f32.mrb[56].mxu1 }
 0x2f4   :  { %v1618_v63 = vrot.slane %v1617_v5, 2  ;;  %v1577_v0 = vmul.f32 0.17677669, %v1522_v60  ;;  %v8727_v4 = vmul.f32 0.17677669, %v1565_v10  ;;  %v7401_v7 = vpop.f32.mrb[57].mxu0 }
 0x2f5   :  { %v1648_v8 = vmul.f32 1.442695, %v1638_v6  ;;  %v1650_v12 = vmul.f32 1.442695, %v1639_v56  ;;  %v1612_v13 = vmax.f32 %v1610_v53, %v1611_v57  ;;  %v7407_v14 = vpop.f32.mrb[57].mxu1  ;;  %v1525_v15 = vpop.f32.mrb[58].mxu0 }
 0x2f6   :  { %v1619_v18 = vmax.f32 %v1617_v5, %v1618_v63  ;;  %v1622_v21 = vsel %vm1579_vm6, %v1577_v0, -inf  ;;  %v1629_v58 = vsel %vm1579_vm6, %v8727_v4, -inf  ;;  %v1568_v59 = vpop.f32.mrb[58].mxu1  ;;  %v7402_v22 = vpop.f32.mrb[59].mxu0 }
 0x2f7   :  { %8079 = vpow2.f32 %v1648_v8  ;;  %v1613_v27 = vrot.slane %v1612_v13, 1  ;;  %v1623_v16 = vrot.slane %v1622_v21, 4  ;;  %v1630_v17 = vrot.slane %v1629_v58, 4  ;;  %v7408_v28 = vpop.f32.mrb[59].mxu1 }
 0x2f8   :  { %8081 = vpow2.f32 %v1650_v12  ;;  %v1620_v29 = vrot.slane %v1619_v18, 1 }
 0x2f9   :  { %v8732_v51 = vpop.eup %8075  ;;  %v1614_v24 = vmax.f32 %v1612_v13, %v1613_v27  ;;  %v1624_v25 = vmax.f32 %v1622_v21, %v1623_v16  ;;  %v1631_v19 = vmax.f32 %v1629_v58, %v1630_v17 }
 0x2fa   :  { %v8734_v20 = vpop.eup %8077  ;;  %v1660_v61 = vsel %vm1579_vm6, %v8732_v51, 0.0  ;;  %v1621_v37 = vmax.f32 %v1619_v18, %v1620_v29 }
 0x2fb   :  { %v1661_v62 = vrot.slane %v1660_v61, 4  ;;  %v1667_v31 = vsel %vm1579_vm6, %v8734_v20, 0.0  ;;  %v1640_v52 = vsub.f32 %v8719_v30, %v1614_v24  ;;  %v1625_v34 = vrot.slane %v1624_v25, 2 }
 0x2fc   :  { %v1668_v35 = vrot.slane %v1667_v31, 4  ;;  %v1641_v38 = vsub.f32 %v8721_v36, %v1621_v37  ;;  %v1632_v32 = vrot.slane %v1631_v19, 2 }
 0x2fd   :  { %v1662_v33 = vadd.f32 %v1661_v62, %v1660_v61  ;;  %v1652_v39 = vmul.f32 1.442695, %v1640_v52  ;;  %v1626_v40 = vmax.f32 %v1624_v25, %v1625_v34 }
 0x2fe   :  { %v1669_v41 = vadd.f32 %v1668_v35, %v1667_v31  ;;  %v1654_v42 = vmul.f32 1.442695, %v1641_v38  ;;  %v1633_v43 = vmax.f32 %v1631_v19, %v1632_v32 }
 0x2ff   :  { %v1663_v44 = vrot.slane %v1662_v33, 2  ;;  %8083 = vpow2.f32 %v1652_v39  ;;  %v1627_v47 = vrot.slane %v1626_v40, 1 }
 0x300   :  { %v1670_v49 = vrot.slane %v1669_v41, 2  ;;  %8085 = vpow2.f32 %v1654_v42  ;;  %v1634_v53 = vrot.slane %v1633_v43, 1 }
 0x301   :  { %v8742_v5 = vpop.eup %8079  ;;  %v1664_v30 = vadd.f32 %v1663_v44, %v1662_v33  ;;  %v1628_v6 = vmax.f32 %v1626_v40, %v1627_v47  ;;  %v1742_v40 = vpack.c.bf16 %v8612_v54, %v8612_v54  ;;  %v1743_v44 = vpack.c.bf16 %v8614_v55, %v8614_v55 }
 0x302   :  { %v8744_v56 = vpop.eup %8081  ;;  %v1671_v36 = vadd.f32 %v1670_v49, %v1669_v41  ;;  %v1674_v57 = vsel %vm1579_vm6, %v8742_v5, 0.0  ;;  %v1635_v60 = vmax.f32 %v1633_v43, %v1634_v53 }
 0x303   :  { %v1665_v10 = vrot.slane %v1664_v30, 1  ;;  %v1675_v63 = vrot.slane %v1674_v57, 4  ;;  %v1681_v7 = vsel %vm1579_vm6, %v8744_v56, 0.0  ;;  %v1642_v8 = vsub.f32 %v1577_v0, %v1628_v6 }
 0x304   :  { %v1672_v12 = vrot.slane %v1671_v36, 1  ;;  %v1682_v13 = vrot.slane %v1681_v7, 4  ;;  %v1643_v14 = vsub.f32 %v8727_v4, %v1635_v60 }
 0x305   :  { %v1666_v15 = vadd.f32 %v1665_v10, %v1664_v30  ;;  %v1676_v18 = vadd.f32 %v1675_v63, %v1674_v57  ;;  %v1656_v21 = vmul.f32 1.442695, %v1642_v8  ;;  %v1844_v10 = vsel %vm71_vm0, %v1742_v40, 0 }
 0x306   :  { %v1673_v58 = vadd.f32 %v1672_v12, %v1671_v36  ;;  %v1683_v59 = vadd.f32 %v1682_v13, %v1681_v7  ;;  %v1658_v22 = vmul.f32 1.442695, %v1643_v14 }
 0x307   :  { %8087 = vrcp.f32 %v1666_v15  ;;  %v1677_v27 = vrot.slane %v1676_v18, 2  ;;  %v1744_v15 = vpack.c.bf16 %v8623_v1, %v8623_v1 }
 0x308   :  { %8089 = vrcp.f32 %v1673_v58  ;;  %v1684_v16 = vrot.slane %v1683_v59, 2  ;;  %v1745_v58 = vpack.c.bf16 %v8626_v3, %v8626_v3 }
 0x309   :  { %v8751_v17 = vpop.eup %8083  ;;  %v1678_v28 = vadd.f32 %v1677_v27, %v1676_v18  ;;  %8091 = vpow2.f32 %v1656_v21 }
 0x30a   :  { %v8753_v29 = vpop.eup %8085  ;;  %v1685_v0 = vadd.f32 %v1684_v16, %v1683_v59  ;;  %v1688_v4 = vsel %vm1579_vm6, %v8751_v17, 0.0  ;;  %8093 = vpow2.f32 %v1658_v22  ;;  %v1982_v1 = vsel %vm71_vm0, %v1745_v58, 0 }
 0x30b   :  { %v1679_v24 = vrot.slane %v1678_v28, 1  ;;  %v1689_v25 = vrot.slane %v1688_v4, 4  ;;  %v1695_v19 = vsel %vm1579_vm6, %v8753_v29, 0.0 }
 0x30c   :  { %v1686_v61 = vrot.slane %v1685_v0, 1  ;;  %v1696_v37 = vrot.slane %v1695_v19, 4 }
 0x30d   :  { %v1680_v62 = vadd.f32 %v1679_v24, %v1678_v28  ;;  %v1690_v31 = vadd.f32 %v1689_v25, %v1688_v4  ;;  %v1936_v4 = vsel %vm71_vm0, %v1744_v15, 0 }
 0x30e   :  { %v1687_v52 = vadd.f32 %v1686_v61, %v1685_v0  ;;  %v1697_v34 = vadd.f32 %v1696_v37, %v1695_v19  ;;  %v1746_v19 = vpack.c.bf16 %v8637_v23, %v8637_v23  ;;  %v1747_v37 = vpack.c.bf16 %v8639_v26, %v8639_v26 }
 0x30f   :  { %8095 = vrcp.f32 %v1680_v62  ;;  %v1691_v35 = vrot.slane %v1690_v31, 2 }
 0x310   :  { %8097 = vrcp.f32 %v1687_v52  ;;  %v1698_v38 = vrot.slane %v1697_v34, 2 }
 0x311   :  { %v8088_v32 = vpop.eup %8087  ;;  %v1692_v33 = vadd.f32 %v1691_v35, %v1690_v31  ;;  %v2074_v35 = vsel %vm71_vm0, %v1747_v37, 0 }
 0x312   :  { %v8090_v39 = vpop.eup %8089  ;;  %v1699_v41 = vadd.f32 %v1698_v38, %v1697_v34  ;;  %v1724_v42 = vmul.f32 %v8088_v32, %v8732_v51  ;;  %v2028_v34 = vsel %vm71_vm0, %v1746_v19, 0 }
 0x313   :  { %v8762_v43 = vpop.eup %8091  ;;  %v1693_v47 = vrot.slane %v1692_v33, 1  ;;  %v1725_v49 = vmul.f32 %v8090_v39, %v8734_v20  ;;  %v1890_v20 = vsel %vm71_vm0, %v1743_v44, 0  ;;  %v251_v39 = vld [vmem:[%s10009_s6 + $0x8] sm:$0xff] }
 0x314   :  { %v8767_v53 = vpop.eup %8093  ;;  %v1700_v30 = vrot.slane %v1699_v41, 1  ;;  %v1702_v6 = vsel %vm1579_vm6, %v8762_v43, 0.0  ;;  %v1732_v36 = vpack.c.bf16 %v1724_v42, %v1724_v42  ;;  %v253_v42 = vld [vmem:[%s10009_s6 + $0x18] sm:$0xff] }
 0x315   :  { %v1694_v57 = vadd.f32 %v1693_v47, %v1692_v33  ;;  %v1703_v54 = vrot.slane %v1702_v6, 4  ;;  %v1709_v51 = vsel %vm1579_vm6, %v8767_v53, 0.0  ;;  %v1733_v60 = vpack.c.bf16 %v1725_v49, %v1725_v49  ;;  %v250_v33 = vld [vmem:[%s10009_s6] sm:$0xff] }
 0x316   :  { %v1701_v63 = vadd.f32 %v1700_v30, %v1699_v41  ;;  %v1710_v55 = vrot.slane %v1709_v51, 4  ;;  %7412 = vmatmul.mubr.msk.bf16.vlgmr.msra.gmra.mrb[60].mxu0 %vm67_vm2, %v1732_v36  ;;  %v2158_v40 = vpack.c.bf16 %v251_v39, %v250_v33  ;;  %v252_v41 = vld [vmem:[%s10009_s6 + $0x10] sm:$0xff]  ;;  %v6688_v33 = vld [vmem:[%s10007_s4 + $0x208] sm:$0xff]  ;;  %v6691_v39 = vld [vmem:[%s10007_s4 + $0x220] sm:$0xff] }
 0x317   :  { %8099 = vrcp.f32 %v1694_v57  ;;  %v1704_v7 = vadd.f32 %v1703_v54, %v1702_v6  ;;  %7418 = vmatmul.mubr.msk.bf16.vlgmr.msra.gmra.mrb[60].mxu1 %vm67_vm2, %v1733_v60  ;;  %7422 = vmatpush3.bf16.msra.mxu0 %v1844_v10  ;;  %v2159_v44 = vpack.c.bf16 %v253_v42, %v252_v41  ;;  %v6692_v41 = vld [vmem:[%s10007_s4 + $0x228] sm:$0xff] }
 0x318   :  { %8101 = vrcp.f32 %v1701_v63  ;;  %v1711_v8 = vadd.f32 %v1710_v55, %v1709_v51  ;;  %7428 = vmatpush3.bf16.msra.mxu1 %v1890_v20  ;;  %7423 = vmatprep.mubr.msk.bf16.mxu0 %vm8211_vm1, %v8210_v2  ;;  %v2321_v42 = vpack.c.bf16 %v6692_v41, %v6691_v39  ;;  %v6671_v41 = vld [vmem:[%s10007_s4 + $0x180] sm:$0xff] }
 0x319   :  { %v8096_v12 = vpop.eup %8095  ;;  %v1705_v13 = vrot.slane %v1704_v7, 2  ;;  %7429 = vmatprep.mubr.msk.bf16.mxu1 %vm8211_vm1, %v8210_v2  ;;  %7433 = vmatprep.subr.bf16.mxu0 %v8210_v2 }
 0x31a   :  { %v8098_v14 = vpop.eup %8097  ;;  %v1712_v18 = vrot.slane %v1711_v8, 2  ;;  %7439 = vmatprep.subr.bf16.mxu1 %v8210_v2  ;;  %v1726_v21 = vmul.f32 %v8096_v12, %v8742_v5 }
 0x31b   :  { %v1706_v59 = vadd.f32 %v1705_v13, %v1704_v7  ;;  %v1727_v22 = vmul.f32 %v8098_v14, %v8744_v56 }
 0x31c   :  { %v1713_v27 = vadd.f32 %v1712_v18, %v1711_v8  ;;  %v1734_v16 = vpack.c.bf16 %v1726_v21, %v1726_v21 }
 0x31d   :  { %v1707_v28 = vrot.slane %v1706_v59, 1  ;;  %v1735_v0 = vpack.c.bf16 %v1727_v22, %v1727_v22 }
 0x31e   :  { %v1714_v24 = vrot.slane %v1713_v27, 1  ;;  %7424 = vmatmul.mubr.msk.bf16.vlgmr.msra.gmra.mrb[64].mxu0 %vm67_vm2, %v1734_v16 }
 0x31f   :  { %v1708_v25 = vadd.f32 %v1707_v28, %v1706_v59  ;;  %7430 = vmatmul.mubr.msk.bf16.vlgmr.msra.gmra.mrb[64].mxu1 %vm67_vm2, %v1735_v0  ;;  %7434 = vmatpush3.bf16.msra.mxu0 %v1936_v4 }
 0x320   :  { %v1715_v5 = vadd.f32 %v1714_v24, %v1713_v27  ;;  %7440 = vmatpush3.bf16.msra.mxu1 %v1982_v1  ;;  %7435 = vmatprep.mubr.msk.bf16.mxu0 %vm8211_vm1, %v8210_v2 }
 0x321   :  { %v8100_v3 = vpop.eup %8099  ;;  %8103 = vrcp.f32 %v1708_v25  ;;  %7441 = vmatprep.mubr.msk.bf16.mxu1 %vm8211_vm1, %v8210_v2  ;;  %7445 = vmatprep.subr.bf16.mxu0 %v8210_v2 }
 0x322   :  { %v8102_v56 = vpop.eup %8101  ;;  %8105 = vrcp.f32 %v1715_v5  ;;  %7451 = vmatprep.subr.bf16.mxu1 %v8210_v2  ;;  %v1728_v61 = vmul.f32 %v8100_v3, %v8751_v17 }
 0x323   :  { %v1729_v62 = vmul.f32 %v8102_v56, %v8753_v29 }
 0x324   :  { %v1736_v31 = vpack.c.bf16 %v1728_v61, %v1728_v61 }
 0x325   :  { %v1737_v52 = vpack.c.bf16 %v1729_v62, %v1729_v62 }
 0x326   :  { %7436 = vmatmul.mubr.msk.bf16.vlgmr.msra.gmra.mrb[68].mxu0 %vm67_vm2, %v1736_v31 }
 0x327   :  { %7442 = vmatmul.mubr.msk.bf16.vlgmr.msra.gmra.mrb[68].mxu1 %vm67_vm2, %v1737_v52  ;;  %7446 = vmatpush3.bf16.msra.mxu0 %v2028_v34 }
 0x328   :  { %7452 = vmatpush3.bf16.msra.mxu1 %v2074_v35  ;;  %7447 = vmatprep.mubr.msk.bf16.mxu0 %vm8211_vm1, %v8210_v2 }
 0x329   :  { %7453 = vmatprep.mubr.msk.bf16.mxu1 %vm8211_vm1, %v8210_v2  ;;  %7457 = vmatprep.subr.bf16.mxu0 %v8210_v2 }
 0x32a   :  { %7465 = vmatprep.subr.bf16.mxu1 %v8210_v2 }
 0x32b   :  { %v8104_v23 = vpop.eup %8103 }
 0x32c   :  { %v8106_v26 = vpop.eup %8105  ;;  %v1730_v17 = vmul.f32 %v8104_v23, %v8762_v43 }
 0x32d   :  { %v1731_v29 = vmul.f32 %v8106_v26, %v8767_v53 }
 0x32e   :  { %v1738_v38 = vpack.c.bf16 %v1730_v17, %v1730_v17 }
 0x32f   :  { %v1739_v32 = vpack.c.bf16 %v1731_v29, %v1731_v29 }
 0x330   :  { %7448 = vmatmul.mubr.msk.bf16.vlgmr.msra.gmra.mrb[72].mxu0 %vm67_vm2, %v1738_v38 }
 0x331   :  { %7454 = vmatmul.mubr.msk.bf16.vlgmr.msra.gmra.mrb[72].mxu1 %vm67_vm2, %v1739_v32  ;;  %7461 = vmatprep.mubr.msk.bf16.mxu0 %vm8211_vm1, %v8210_v2 }
 0x332   :  { %7469 = vmatprep.mubr.msk.bf16.mxu1 %vm8211_vm1, %v8210_v2  ;;  %7458 = vmatpush3.bf16.msra.mxu0 %v2158_v40 }
 0x333   :  { %7466 = vmatpush3.bf16.msra.mxu1 %v2158_v40  ;;  %7459 = vmatprep.subr.bf16.mxu0 %v8210_v2 }
 0x334   :  { %7467 = vmatprep.subr.bf16.mxu1 %v8210_v2 }
 0x336   :  { %7460 = vmatpush3.bf16.msra.mxu0 %v2159_v44 }
 0x337   :  { %7468 = vmatpush3.bf16.msra.mxu1 %v2159_v44  ;;  %7473 = vmatprep.subr.bf16.mxu0 %v8210_v2  ;;  %v6690_v44 = vld [vmem:[%s10007_s4 + $0x218] sm:$0xff] }
 0x338   :  { %7481 = vmatprep.subr.bf16.mxu1 %v8210_v2 }
 0x3e9   :  { %v1788_v43 = vpop.f32.mrb[60].mxu0 }
 0x3ea   :  { %v1834_v47 = vpop.f32.mrb[60].mxu1  ;;  %v7413_v49 = vpop.f32.mrb[61].mxu0  ;;  %v2116_v61 = vadd.f32 %v1788_v43, %v8647_v45  ;;  %v6689_v43 = vld [vmem:[%s10007_s4 + $0x210] sm:$0xff] }
 0x3eb   :  { %v2117_v53 = vadd.f32 %v1834_v47, %v8649_v46  ;;  %v7419_v30 = vpop.f32.mrb[61].mxu1  ;;  %v1791_v6 = vpop.f32.mrb[62].mxu0  ;;  %v6693_v47 = vld [vmem:[%s10007_s4 + $0x230] sm:$0xff]  ;;  %v2320_v49 = vpack.c.bf16 %v6690_v44, %v6689_v43  ;;  %v6675_v43 = vld [vmem:[%s10007_s4 + $0x1a0] sm:$0xff]  ;;  %v6676_v44 = vld [vmem:[%s10007_s4 + $0x1a8] sm:$0xff] }
 0x3ec   :  { %v1837_v36 = vpop.f32.mrb[62].mxu1  ;;  %v7414_v57 = vpop.f32.mrb[63].mxu0  ;;  %v6668_v6 = vld [vmem:[%s10009_s6 + $0x20] ss:$0 sm:$0xff] }
 0x3ed   :  { %2126 = vrot.lane.b32.xlu1 %v2117_v53, %s8214_s30  ;;  %v7420_v54 = vpop.f32.mrb[63].mxu1  ;;  %v6694_v53 = vld [vmem:[%s10007_s4 + $0x238] sm:$0xff] }
 0x3ee   :  { %v2322_v30 = vpack.c.bf16 %v6694_v53, %v6693_v47  ;;  %v6673_v53 = vld [vmem:[%s10007_s4 + $0x190] sm:$0xff] }
 0x3f1   :  { %v1880_v51 = vpop.f32.mrb[64].mxu0 }
 0x3f2   :  { %v2118_v60 = vadd.f32 %v1880_v51, %v8671_v9  ;;  %v1926_v10 = vpop.f32.mrb[64].mxu1  ;;  %v7425_v63 = vpop.f32.mrb[65].mxu0 }
 0x3f3   :  { %v2119_v55 = vadd.f32 %v1926_v10, %v8673_v11  ;;  %v7431_v20 = vpop.f32.mrb[65].mxu1  ;;  %v1883_v7 = vpop.f32.mrb[66].mxu0 }
 0x3f4   :  { %v1929_v8 = vpop.f32.mrb[66].mxu1  ;;  %2134 = vrot.lane.b32.xlu1 %v2118_v60, %s8215_s9  ;;  %v7426_v12 = vpop.f32.mrb[67].mxu0  ;;  %v6695_v60 = vld [vmem:[%s10007_s4 + $0x240] sm:$0xff]  ;;  %v6700_v7 = vld [vmem:[%s10007_s4 + $0x268] sm:$0xff] }
 0x3f5   :  { %2142 = vrot.lane.b32.xlu0 %v2119_v55, %s8216_s10  ;;  %v7432_v13 = vpop.f32.mrb[67].mxu1  ;;  %v6696_v55 = vld [vmem:[%s10007_s4 + $0x248] sm:$0xff]  ;;  %v6699_v20 = vld [vmem:[%s10007_s4 + $0x260] sm:$0xff] }
 0x3f6   :  { %v2323_v12 = vpack.c.bf16 %v6696_v55, %v6695_v60  ;;  %v2325_v13 = vpack.c.bf16 %v6700_v7, %v6699_v20  ;;  %v6680_v60 = vld [vmem:[%s10007_s4 + $0x1c8] sm:$0xff]  ;;  %v6681_v7 = vld [vmem:[%s10007_s4 + $0x1d0] sm:$0xff] }
 0x3f9   :  { %v1972_v14 = vpop.f32.mrb[68].mxu0 }
 0x3fa   :  { %v2018_v15 = vpop.f32.mrb[68].mxu1  ;;  %v7437_v18 = vpop.f32.mrb[69].mxu0  ;;  %v2120_v35 = vadd.f32 %v1972_v14, %v8647_v45  ;;  %v6687_v45 = vld [vmem:[%s10007_s4 + $0x200] sm:$0xff]  ;;  %v6697_v14 = vld [vmem:[%s10007_s4 + $0x250] sm:$0xff] }
 0x3fb   :  { %v2121_v21 = vadd.f32 %v2018_v15, %v8649_v46  ;;  %v7443_v58 = vpop.f32.mrb[69].mxu1  ;;  %v1975_v59 = vpop.f32.mrb[70].mxu0  ;;  %v2319_v40 = vpack.c.bf16 %v6688_v33, %v6687_v45  ;;  %v6698_v18 = vld [vmem:[%s10007_s4 + $0x258] sm:$0xff]  ;;  %v6717_v45 = vld [vmem:[%s10007_s4 + $0x2f0] sm:$0xff] }
 0x3fc   :  { %v2021_v22 = vpop.f32.mrb[70].mxu1  ;;  %v7438_v27 = vpop.f32.mrb[71].mxu0  ;;  %v6702_v58 = vld [vmem:[%s10007_s4 + $0x278] sm:$0xff]  ;;  %v2324_v59 = vpack.c.bf16 %v6698_v18, %v6697_v14 }
 0x3fd   :  { %v7444_v16 = vpop.f32.mrb[71].mxu1  ;;  %2128 = vrot.lane.b32.xlu1 %v2121_v21, %s8214_s30  ;;  %v6701_v21 = vld [vmem:[%s10007_s4 + $0x270] sm:$0xff]  ;;  %v6718_v33 = vld [vmem:[%s10007_s4 + $0x2f8] sm:$0xff] }
 0x3fe   :  { %v2326_v22 = vpack.c.bf16 %v6702_v58, %v6701_v21 }
 0x403   :  { %v2064_v28 = vpop.f32.mrb[72].mxu0 }
 0x404   :  { %v2122_v0 = vadd.f32 %v2064_v28, %v8671_v9  ;;  %v2110_v4 = vpop.f32.mrb[72].mxu1  ;;  %v7449_v24 = vpop.f32.mrb[73].mxu0 }
 0x405   :  { %v2123_v1 = vadd.f32 %v2110_v4, %v8673_v11  ;;  %v7455_v25 = vpop.f32.mrb[73].mxu1  ;;  %v2067_v5 = vpop.f32.mrb[74].mxu0 }
 0x406   :  { %v2113_v3 = vpop.f32.mrb[74].mxu1  ;;  %2136 = vrot.lane.b32.xlu0 %v2122_v0, %s8215_s9  ;;  %v7450_v46 = vpop.f32.mrb[75].mxu0  ;;  %v6703_v5 = vld [vmem:[%s10007_s4 + $0x280] sm:$0xff] }
 0x407   :  { %v7456_v56 = vpop.f32.mrb[75].mxu1  ;;  %2144 = vrot.lane.b32.xlu1 %v2123_v1, %s8216_s10  ;;  %v6704_v3 = vld [vmem:[%s10007_s4 + $0x288] sm:$0xff]  ;;  %v6707_v46 = vld [vmem:[%s10007_s4 + $0x2a0] sm:$0xff] }
 0x408   :  { %v6708_v56 = vld [vmem:[%s10007_s4 + $0x2a8] sm:$0xff] }
 0x45f   :  { %v2127_v19 = vpop.permute.xlu1 %2126 }
 0x460   :  { %v2148_v9 = vsel %vm67_vm2, %v2116_v61, %v2127_v19  ;;  %v2698_v19 = vpack.c.bf16 %v6704_v3, %v6703_v5  ;;  %v2700_v61 = vpack.c.bf16 %v6708_v56, %v6707_v46 }
 0x466   :  { %v2135_v37 = vpop.permute.xlu1 %2134 }
 0x467   :  { %v2143_v62 = vpop.permute.xlu0 %2142  ;;  %v2151_v11 = vsel %vm2150_vm7, %v2148_v9, %v2135_v37  ;;  %v6705_v9 = vld [vmem:[%s10007_s4 + $0x290] sm:$0xff]  ;;  %v6706_v37 = vld [vmem:[%s10007_s4 + $0x298] sm:$0xff] }
 0x468   :  { %v2154_v31 = vsel %vm2153_vm8, %v2151_v11, %v2143_v62  ;;  %v6709_v62 = vld [vmem:[%s10007_s4 + $0x2b0] sm:$0xff]  ;;  %v6710_v11 = vld [vmem:[%s10007_s4 + $0x2b8] sm:$0xff] }
 0x469   :  { %v2156_v52 = vpack.c.bf16 %v2154_v31, %v2154_v31 }
 0x46b   :  { %7462 = vmatmul.mubr.msk.bf16.vlgmr.msra.gmra.mrb[76].mxu0 %vm310_vm5, %v2156_v52  ;;  %v2701_v52 = vpack.c.bf16 %v6710_v11, %v6709_v62 }
 0x46c   :  { %7477 = vmatprep.mubr.msk.bf16.mxu0 %vm8211_vm1, %v8210_v2  ;;  %7474 = vmatpush3.bf16.msra.mxu0 %v2319_v40 }
 0x46d   :  { %7475 = vmatprep.subr.bf16.mxu0 %v8210_v2 }
 0x46f   :  { %v2129_v34 = vpop.permute.xlu1 %2128 }
 0x470   :  { %v2149_v23 = vsel %vm67_vm2, %v2120_v35, %v2129_v34  ;;  %7476 = vmatpush3.bf16.msra.mxu0 %v2320_v49  ;;  %v6711_v34 = vld [vmem:[%s10007_s4 + $0x2c0] sm:$0xff]  ;;  %v6712_v35 = vld [vmem:[%s10007_s4 + $0x2c8] sm:$0xff] }
 0x471   :  { %7489 = vmatprep.subr.bf16.mxu0 %v8210_v2 }
 0x478   :  { %v2137_v26 = vpop.permute.xlu0 %2136 }
 0x479   :  { %v2145_v17 = vpop.permute.xlu1 %2144  ;;  %v2152_v29 = vsel %vm2150_vm7, %v2149_v23, %v2137_v26  ;;  %v6715_v23 = vld [vmem:[%s10007_s4 + $0x2e0] sm:$0xff]  ;;  %v6716_v26 = vld [vmem:[%s10007_s4 + $0x2e8] sm:$0xff] }
 0x47a   :  { %v8862_v38 = vsel %vm2153_vm8, %v2152_v29, %v2145_v17  ;;  %v2702_v17 = vpack.c.bf16 %v6712_v35, %v6711_v34  ;;  %v2704_v29 = vpack.c.bf16 %v6716_v26, %v6715_v23 }
 0x47b   :  { %v2157_v32 = vpack.c.bf16 %v8862_v38, %v8862_v38 }
 0x47d   :  { %7470 = vmatmul.mubr.msk.bf16.vlgmr.msra.gmra.mrb[76].mxu1 %vm310_vm5, %v2157_v32  ;;  %v6714_v32 = vld [vmem:[%s10007_s4 + $0x2d8] sm:$0xff] }
 0x47e   :  { %7485 = vmatprep.mubr.msk.bf16.mxu1 %vm8211_vm1, %v8210_v2  ;;  %7482 = vmatpush3.bf16.msra.mxu1 %v2321_v42 }
 0x47f   :  { %7483 = vmatprep.subr.bf16.mxu1 %v8210_v2 }
 0x482   :  { %7484 = vmatpush3.bf16.msra.mxu1 %v2322_v30 }
 0x483   :  { %7497 = vmatprep.subr.bf16.mxu1 %v8210_v2 }
 0x53e   :  { %v2201_v36 = vpop.f32.mrb[76].mxu0 }
 0x53f   :  { %v2202_v57 = vadd.f32 %v6668_v6, %v2201_v36  ;;  %v7463_v54 = vpop.f32.mrb[77].mxu0  ;;  %v6678_v36 = vld [vmem:[%s10007_s4 + $0x1b8] sm:$0xff] }
 0x540   :  { %v2204_v51 = vpop.f32.mrb[78].mxu0 }
 0x541   :  { %v2250_v10 = vmax.f32 %v2202_v57, 0.0  ;;  %v7464_v63 = vpop.f32.mrb[79].mxu0  ;;  %v6679_v51 = vld [vmem:[%s10007_s4 + $0x1c0] sm:$0xff] }
 0x542   :  { %v6684_v63 = vld [vmem:[%s10007_s4 + $0x1e8] sm:$0xff]  ;;  %v3075_v55 = vpack.c.bf16 %v6680_v60, %v6679_v51 }
 0x543   :  { %v2252_v8 = vadd.f32 %v2250_v10, %v2154_v31  ;;  %v2699_v31 = vpack.c.bf16 %v6706_v37, %v6705_v9  ;;  %v6683_v10 = vld [vmem:[%s10007_s4 + $0x1e0] sm:$0xff] }
 0x544   :  { %v3077_v20 = vpack.c.bf16 %v6684_v63, %v6683_v10 }
 0x545   :  { %v8915_v15 = vpack.c.bf16 %v2252_v8, %v2252_v8  ;;  %v6682_v8 = vld [vmem:[%s10007_s4 + $0x1d8] sm:$0xff] }
 0x546   :  { %v3076_v14 = vpack.c.bf16 %v6682_v8, %v6681_v7 }
 0x547   :  { %7478 = vmatmul.mubr.msk.bf16.vlgmr.msra.gmra.mrb[80].mxu0 %vm310_vm5, %v8915_v15  ;;  %7486 = vmatmul.mubr.msk.bf16.vlgmr.msra.gmra.mrb[80].mxu1 %vm310_vm5, %v8915_v15 }
 0x548   :  { %7490 = vmatpush3.bf16.msra.mxu0 %v2323_v12  ;;  %7498 = vmatpush3.bf16.msra.mxu1 %v2325_v13 }
 0x549   :  { %7491 = vmatprep.subr.bf16.mxu0 %v8210_v2  ;;  %7499 = vmatprep.subr.bf16.mxu1 %v8210_v2 }
 0x54a   :  { %7493 = vmatprep.mubr.msk.bf16.mxu0 %vm8211_vm1, %v8210_v2  ;;  %7501 = vmatprep.mubr.msk.bf16.mxu1 %vm8211_vm1, %v8210_v2 }
 0x54c   :  { %7492 = vmatpush3.bf16.msra.mxu0 %v2324_v59  ;;  %7500 = vmatpush3.bf16.msra.mxu1 %v2326_v22 }
 0x54d   :  { %7505 = vmatprep.subr.bf16.mxu0 %v8210_v2  ;;  %7513 = vmatprep.subr.bf16.mxu1 %v8210_v2 }
 0x54f   :  { %7494 = vmatmul.mubr.msk.bf16.vlgmr.msra.gmra.mrb[84].mxu0 %vm310_vm5, %v8915_v15  ;;  %7502 = vmatmul.mubr.msk.bf16.vlgmr.msra.gmra.mrb[84].mxu1 %vm310_vm5, %v8915_v15 }
 0x550   :  { %v2244_v27 = vpop.f32.mrb[76].mxu1  ;;  %7506 = vmatpush3.bf16.msra.mxu0 %v2319_v40  ;;  %7514 = vmatpush3.bf16.msra.mxu1 %v2321_v42  ;;  %v2705_v40 = vpack.c.bf16 %v6718_v33, %v6717_v45  ;;  %v6672_v42 = vld [vmem:[%s10007_s4 + $0x188] sm:$0xff] }
 0x551   :  { %v2245_v16 = vadd.f32 %v6668_v6, %v2244_v27  ;;  %v7471_v28 = vpop.f32.mrb[77].mxu1  ;;  %7507 = vmatprep.subr.bf16.mxu0 %v8210_v2  ;;  %7515 = vmatprep.subr.bf16.mxu1 %v8210_v2  ;;  %v3071_v47 = vpack.c.bf16 %v6672_v42, %v6671_v41  ;;  %v6677_v6 = vld [vmem:[%s10007_s4 + $0x1b0] sm:$0xff] }
 0x552   :  { %v2247_v0 = vpop.f32.mrb[78].mxu1  ;;  %7509 = vmatprep.mubr.msk.bf16.mxu0 %vm8211_vm1, %v8210_v2  ;;  %7517 = vmatprep.mubr.msk.bf16.mxu1 %vm8211_vm1, %v8210_v2  ;;  %v3074_v54 = vpack.c.bf16 %v6678_v36, %v6677_v6  ;;  %v6736_v36 = vld.sshfl [vmem:[%s10008_s5 + $0x14] sm:$0x33 pattern:$0x75316420] }
 0x553   :  { %v2251_v4 = vmax.f32 %v2245_v16, 0.0  ;;  %v7472_v24 = vpop.f32.mrb[79].mxu1  ;;  %v2714_v7 = vcombine.high %v6736_v36, %v6736_v36  ;;  %v2721_v8 = vrot.slane %v6736_v36, %v8570_v48 }
 0x554   :  { %7508 = vmatpush3.bf16.msra.mxu0 %v2320_v49  ;;  %7516 = vmatpush3.bf16.msra.mxu1 %v2322_v30  ;;  %v3073_v49 = vpack.c.bf16 %v6676_v44, %v6675_v43  ;;  %v6674_v30 = vld [vmem:[%s10007_s4 + $0x198] sm:$0xff] }
 0x555   :  { %v2253_v1 = vadd.f32 %v2251_v4, %v8862_v38  ;;  %7521 = vmatprep.subr.bf16.mxu0 %v8210_v2  ;;  %7529 = vmatprep.subr.bf16.mxu1 %v8210_v2  ;;  %v6713_v38 = vld [vmem:[%s10007_s4 + $0x2d0] sm:$0xff]  ;;  %v3072_v57 = vpack.c.bf16 %v6674_v30, %v6673_v53 }
 0x556   :  { %v2703_v39 = vpack.c.bf16 %v6714_v32, %v6713_v38 }
 0x557   :  { %v8951_v25 = vpack.c.bf16 %v2253_v1, %v2253_v1 }
 0x559   :  { %7510 = vmatmul.mubr.msk.bf16.vlgmr.msra.gmra.mrb[88].mxu0 %vm310_vm5, %v8951_v25  ;;  %7518 = vmatmul.mubr.msk.bf16.vlgmr.msra.gmra.mrb[88].mxu1 %vm310_vm5, %v8951_v25 }
 0x55a   :  { %7522 = vmatpush3.bf16.msra.mxu0 %v2323_v12  ;;  %7530 = vmatpush3.bf16.msra.mxu1 %v2325_v13  ;;  %v6685_v12 = vld [vmem:[%s10007_s4 + $0x1f0] sm:$0xff]  ;;  %v6686_v13 = vld [vmem:[%s10007_s4 + $0x1f8] sm:$0xff] }
 0x55b   :  { %7523 = vmatprep.subr.bf16.mxu0 %v8210_v2  ;;  %7531 = vmatprep.subr.bf16.mxu1 %v8210_v2  ;;  %v3078_v18 = vpack.c.bf16 %v6686_v13, %v6685_v12  ;;  %v2728_v12 = vrot.slane %v2714_v7, %v8570_v48 }
 0x55c   :  { %7525 = vmatprep.mubr.msk.bf16.mxu0 %vm8211_vm1, %v8210_v2  ;;  %7533 = vmatprep.mubr.msk.bf16.mxu1 %vm8211_vm1, %v8210_v2 }
 0x55e   :  { %7524 = vmatpush3.bf16.msra.mxu0 %v2324_v59  ;;  %7532 = vmatpush3.bf16.msra.mxu1 %v2326_v22 }
 0x55f   :  { %7537 = vmatprep.subr.bf16.mxu0 %v8210_v2  ;;  %7545 = vmatprep.subr.bf16.mxu1 %v8210_v2 }
 0x561   :  { %7526 = vmatmul.mubr.msk.bf16.vlgmr.msra.gmra.mrb[92].mxu0 %vm310_vm5, %v8951_v25  ;;  %7534 = vmatmul.mubr.msk.bf16.vlgmr.msra.gmra.mrb[92].mxu1 %vm310_vm5, %v8951_v25 }
 0x562   :  { %7538 = vmatpush3.bf16.msra.mxu0 %v2698_v19  ;;  %7546 = vmatpush3.bf16.msra.mxu1 %v2700_v61 }
 0x563   :  { %7539 = vmatprep.subr.bf16.mxu0 %v8210_v2  ;;  %7547 = vmatprep.subr.bf16.mxu1 %v8210_v2 }
 0x564   :  { %7541 = vmatprep.mubr.msk.bf16.mxu0 %vm8211_vm1, %v8210_v2  ;;  %7549 = vmatprep.mubr.msk.bf16.mxu1 %vm8211_vm1, %v8210_v2 }
 0x566   :  { %7540 = vmatpush3.bf16.msra.mxu0 %v2699_v31  ;;  %7548 = vmatpush3.bf16.msra.mxu1 %v2701_v52 }
 0x567   :  { %7553 = vmatprep.subr.bf16.mxu0 %v8210_v2  ;;  %7561 = vmatprep.subr.bf16.mxu1 %v8210_v2 }
 0x569   :  { %7542 = vmatmul.mubr.msk.bf16.vlgmr.msra.gmra.mrb[96].mxu0 %vm310_vm5, %v8915_v15  ;;  %7550 = vmatmul.mubr.msk.bf16.vlgmr.msra.gmra.mrb[96].mxu1 %vm310_vm5, %v8915_v15 }
 0x56a   :  { %7554 = vmatpush3.bf16.msra.mxu0 %v2702_v17  ;;  %7562 = vmatpush3.bf16.msra.mxu1 %v2704_v29 }
 0x56b   :  { %7555 = vmatprep.subr.bf16.mxu0 %v8210_v2  ;;  %7563 = vmatprep.subr.bf16.mxu1 %v8210_v2 }
 0x56c   :  { %7557 = vmatprep.mubr.msk.bf16.mxu0 %vm8211_vm1, %v8210_v2  ;;  %7565 = vmatprep.mubr.msk.bf16.mxu1 %vm8211_vm1, %v8210_v2 }
 0x56e   :  { %7556 = vmatpush3.bf16.msra.mxu0 %v2703_v39  ;;  %7564 = vmatpush3.bf16.msra.mxu1 %v2705_v40 }
 0x56f   :  { %7569 = vmatprep.subr.bf16.mxu0 %v8210_v2  ;;  %7577 = vmatprep.subr.bf16.mxu1 %v8210_v2 }
 0x571   :  { %7558 = vmatmul.mubr.msk.bf16.vlgmr.msra.gmra.mrb[100].mxu0 %vm310_vm5, %v8915_v15  ;;  %7566 = vmatmul.mubr.msk.bf16.vlgmr.msra.gmra.mrb[100].mxu1 %vm310_vm5, %v8915_v15 }
 0x572   :  { %7570 = vmatpush3.bf16.msra.mxu0 %v2698_v19  ;;  %7578 = vmatpush3.bf16.msra.mxu1 %v2700_v61 }
 0x573   :  { %7571 = vmatprep.subr.bf16.mxu0 %v8210_v2  ;;  %7579 = vmatprep.subr.bf16.mxu1 %v8210_v2 }
 0x574   :  { %7573 = vmatprep.mubr.msk.bf16.mxu0 %vm8211_vm1, %v8210_v2  ;;  %7581 = vmatprep.mubr.msk.bf16.mxu1 %vm8211_vm1, %v8210_v2 }
 0x576   :  { %7572 = vmatpush3.bf16.msra.mxu0 %v2699_v31  ;;  %7580 = vmatpush3.bf16.msra.mxu1 %v2701_v52 }
 0x577   :  { %7585 = vmatprep.subr.bf16.mxu0 %v8210_v2  ;;  %7593 = vmatprep.subr.bf16.mxu1 %v8210_v2 }
 0x579   :  { %7574 = vmatmul.mubr.msk.bf16.vlgmr.msra.gmra.mrb[104].mxu0 %vm310_vm5, %v8951_v25  ;;  %7582 = vmatmul.mubr.msk.bf16.vlgmr.msra.gmra.mrb[104].mxu1 %vm310_vm5, %v8951_v25 }
 0x57a   :  { %7586 = vmatpush3.bf16.msra.mxu0 %v2702_v17  ;;  %7594 = vmatpush3.bf16.msra.mxu1 %v2704_v29 }
 0x57b   :  { %7587 = vmatprep.subr.bf16.mxu0 %v8210_v2  ;;  %7595 = vmatprep.subr.bf16.mxu1 %v8210_v2 }
 0x57c   :  { %7589 = vmatprep.mubr.msk.bf16.mxu0 %vm8211_vm1, %v8210_v2  ;;  %7597 = vmatprep.mubr.msk.bf16.mxu1 %vm8211_vm1, %v8210_v2 }
 0x57e   :  { %7588 = vmatpush3.bf16.msra.mxu0 %v2703_v39  ;;  %7596 = vmatpush3.bf16.msra.mxu1 %v2705_v40 }
 0x57f   :  { %7601 = vmatprep.subr.bf16.mxu0 %v8210_v2  ;;  %7609 = vmatprep.subr.bf16.mxu1 %v8210_v2 }
 0x581   :  { %7590 = vmatmul.mubr.msk.bf16.vlgmr.msra.gmra.mrb[108].mxu0 %vm310_vm5, %v8951_v25  ;;  %7598 = vmatmul.mubr.msk.bf16.vlgmr.msra.gmra.mrb[108].mxu1 %vm310_vm5, %v8951_v25 }
 0x582   :  { %7602 = vmatpush3.bf16.msra.mxu0 %v3071_v47  ;;  %7610 = vmatpush3.bf16.msra.mxu1 %v3073_v49 }
 0x583   :  { %7603 = vmatprep.subr.bf16.mxu0 %v8210_v2  ;;  %7611 = vmatprep.subr.bf16.mxu1 %v8210_v2 }
 0x584   :  { %7605 = vmatprep.mubr.msk.bf16.mxu0 %vm8211_vm1, %v8210_v2  ;;  %7613 = vmatprep.mubr.msk.bf16.mxu1 %vm8211_vm1, %v8210_v2 }
 0x586   :  { %7604 = vmatpush3.bf16.msra.mxu0 %v3072_v57  ;;  %7612 = vmatpush3.bf16.msra.mxu1 %v3074_v54 }
 0x587   :  { %7617 = vmatprep.subr.bf16.mxu0 %v8210_v2  ;;  %7625 = vmatprep.subr.bf16.mxu1 %v8210_v2 }
 0x589   :  { %7606 = vmatmul.mubr.msk.bf16.vlgmr.msra.gmra.mrb[112].mxu0 %vm310_vm5, %v8915_v15  ;;  %7614 = vmatmul.mubr.msk.bf16.vlgmr.msra.gmra.mrb[112].mxu1 %vm310_vm5, %v8915_v15 }
 0x58a   :  { %7618 = vmatpush3.bf16.msra.mxu0 %v3075_v55  ;;  %7626 = vmatpush3.bf16.msra.mxu1 %v3077_v20 }
 0x58b   :  { %7619 = vmatprep.subr.bf16.mxu0 %v8210_v2  ;;  %7627 = vmatprep.subr.bf16.mxu1 %v8210_v2 }
 0x58c   :  { %7621 = vmatprep.mubr.msk.bf16.mxu0 %vm8211_vm1, %v8210_v2  ;;  %7629 = vmatprep.mubr.msk.bf16.mxu1 %vm8211_vm1, %v8210_v2 }
 0x58e   :  { %7620 = vmatpush3.bf16.msra.mxu0 %v3076_v14  ;;  %7628 = vmatpush3.bf16.msra.mxu1 %v3078_v18 }
 0x58f   :  { %7633 = vmatprep.subr.bf16.mxu0 %v8210_v2  ;;  %7641 = vmatprep.subr.bf16.mxu1 %v8210_v2 }
 0x591   :  { %7622 = vmatmul.mubr.msk.bf16.vlgmr.msra.gmra.mrb[116].mxu0 %vm310_vm5, %v8915_v15  ;;  %7630 = vmatmul.mubr.msk.bf16.vlgmr.msra.gmra.mrb[116].mxu1 %vm310_vm5, %v8915_v15  ;;  %v6727_v15 = vld.sshfl [vmem:[%s10008_s5 + $0x10] sm:$0x33 pattern:$0x75316420] }
 0x592   :  { %7634 = vmatpush3.bf16.msra.mxu0 %v3071_v47  ;;  %7642 = vmatpush3.bf16.msra.mxu1 %v3073_v49  ;;  %v2335_v21 = vcombine.high %v6727_v15, %v6727_v15  ;;  %v2342_v58 = vrot.slane %v6727_v15, %v8570_v48 }
 0x593   :  { %7635 = vmatprep.subr.bf16.mxu0 %v8210_v2  ;;  %7643 = vmatprep.subr.bf16.mxu1 %v8210_v2 }
 0x594   :  { %7637 = vmatprep.mubr.msk.bf16.mxu0 %vm8211_vm1, %v8210_v2  ;;  %7645 = vmatprep.mubr.msk.bf16.mxu1 %vm8211_vm1, %v8210_v2  ;;  %v2349_v59 = vrot.slane %v2335_v21, %v8570_v48  ;;  %v2355_v22 = vrot.slane %v2342_v58, %v8573_v50  ;;  %v2729_v21 = vcombine.high %v2721_v8, %v2721_v8 }
 0x596   :  { %7636 = vmatpush3.bf16.msra.mxu0 %v3072_v57  ;;  %7644 = vmatpush3.bf16.msra.mxu1 %v3074_v54  ;;  %v2359_v27 = vrot.slane %v2349_v59, %v8573_v50  ;;  %v2351_v5 = vcombine.high %v2349_v59, %v2349_v59 }
 0x597   :  { %7649 = vmatprep.subr.bf16.mxu0 %v8210_v2  ;;  %7657 = vmatprep.subr.bf16.mxu1 %v8210_v2 }
 0x598   :  { %v2367_v31 = vrot.slane %v2351_v5, %v8573_v50 }
 0x599   :  { %7638 = vmatmul.mubr.msk.bf16.vlgmr.msra.gmra.mrb[120].mxu0 %vm310_vm5, %v8951_v25  ;;  %7646 = vmatmul.mubr.msk.bf16.vlgmr.msra.gmra.mrb[120].mxu1 %vm310_vm5, %v8951_v25 }
 0x59a   :  { %7650 = vmatpush3.bf16.msra.mxu0 %v3075_v55  ;;  %7658 = vmatpush3.bf16.msra.mxu1 %v3077_v20 }
 0x59b   :  { %7651 = vmatprep.subr.bf16.mxu0 %v8210_v2  ;;  %7659 = vmatprep.subr.bf16.mxu1 %v8210_v2 }
 0x59c   :  { %7653 = vmatprep.mubr.msk.bf16.mxu0 %vm8211_vm1, %v8210_v2  ;;  %7661 = vmatprep.mubr.msk.bf16.mxu1 %vm8211_vm1, %v8210_v2 }
 0x59e   :  { %7652 = vmatpush3.bf16.msra.mxu0 %v3076_v14  ;;  %7660 = vmatpush3.bf16.msra.mxu1 %v3078_v18 }
 0x59f   :  { %7665 = vmatprep.subr.bf16.mxu0 %v8210_v2  ;;  %7671 = vmatprep.subr.bf16.mxu1 %v8210_v2 }
 0x5a1   :  { %7654 = vmatmul.mubr.msk.bf16.vlgmr.msra.gmra.mrb[124].mxu0 %vm310_vm5, %v8951_v25  ;;  %7662 = vmatmul.mubr.msk.bf16.vlgmr.msra.gmra.mrb[124].mxu1 %vm310_vm5, %v8951_v25  ;;  %v2350_v25 = vcombine.high %v2342_v58, %v2342_v58  ;;  %v2730_v58 = vcombine.high %v2728_v12, %v2728_v12 }
 0x5a2   :  { %7667 = vmatprep.mubr.msk.bf16.mxu0 %vm8211_vm1, %v8210_v2  ;;  %7673 = vmatprep.mubr.msk.bf16.mxu1 %vm8211_vm1, %v8210_v2 }
 0x5a3   :  { %v2363_v11 = vrot.slane %v2350_v25, %v8573_v50 }
 0x61a   :  { %v2409_v16 = vpop.f32.mrb[80].mxu0  ;;  %v2449_v28 = vpop.f32.mrb[80].mxu1 }
 0x61b   :  { %v2410_v0 = vadd.f32 %v2409_v16, %v2355_v22  ;;  %v2450_v4 = vadd.f32 %v2449_v28, %v2359_v27  ;;  %v7479_v24 = vpop.f32.mrb[81].mxu0  ;;  %v7487_v1 = vpop.f32.mrb[81].mxu1  ;;  %v2742_v28 = vrot.slane %v2729_v21, %v8573_v50 }
 0x61c   :  { %v2412_v3 = vpop.f32.mrb[82].mxu0  ;;  %v2452_v46 = vpop.f32.mrb[82].mxu1 }
 0x61d   :  { %v3452_v56 = vpack.c.bf16 %v2410_v0, %v2410_v0  ;;  %v3453_v19 = vpack.c.bf16 %v2450_v4, %v2450_v4  ;;  %v7480_v61 = vpop.f32.mrb[83].mxu0  ;;  %v7488_v9 = vpop.f32.mrb[83].mxu1  ;;  %v2746_v0 = vrot.slane %v2730_v58, %v8573_v50 }
 0x61e   :  { %v9206_v9 = vrot.slane %v2721_v8, %v8573_v50 }
 0x61f   :  { %v3464_v37 = vsel %vm67_vm2, %v3452_v56, 0  ;;  %v3510_v62 = vsel %vm67_vm2, %v3453_v19, 0 }
 0x620   :  { %7666 = vmatpush3.bf16.xpose.msra.mxu0 %v3464_v37  ;;  %7672 = vmatpush3.bf16.xpose.msra.mxu1 %v3510_v62  ;;  %v9209_v37 = vrot.slane %v2728_v12, %v8573_v50 }
 0x621   :  { %7677 = vmatprep.subr.bf16.mxu0 %v8210_v2  ;;  %7683 = vmatprep.subr.bf16.mxu1 %v8210_v2 }
 0x622   :  { %v2489_v52 = vpop.f32.mrb[84].mxu0  ;;  %v2529_v34 = vpop.f32.mrb[84].mxu1 }
 0x623   :  { %v9178_v35 = vadd.f32 %v2489_v52, %v2363_v11  ;;  %v9180_v23 = vadd.f32 %v2529_v34, %v2367_v31  ;;  %v7495_v26 = vpop.f32.mrb[85].mxu0  ;;  %v7503_v17 = vpop.f32.mrb[85].mxu1 }
 0x624   :  { %v2492_v29 = vpop.f32.mrb[86].mxu0  ;;  %v2532_v38 = vpop.f32.mrb[86].mxu1 }
 0x625   :  { %v7496_v32 = vpop.f32.mrb[87].mxu0  ;;  %v7504_v45 = vpop.f32.mrb[87].mxu1  ;;  %v6745_v38 = vld.sshfl [vmem:[%s10008_s5 + $0xc] sm:$0x33 pattern:$0x75316420]  ;;  %v3454_v12 = vpack.c.bf16 %v9178_v35, %v9178_v35 }
 0x627   :  { %v3556_v35 = vsel %vm67_vm2, %v3454_v12, 0 }
 0x62c   :  { %v2572_v33 = vpop.f32.mrb[88].mxu0  ;;  %v2612_v39 = vpop.f32.mrb[88].mxu1 }
 0x62d   :  { %v9182_v40 = vadd.f32 %v2572_v33, %v2355_v22  ;;  %v9184_v41 = vadd.f32 %v2612_v39, %v2359_v27  ;;  %v7511_v42 = vpop.f32.mrb[89].mxu0  ;;  %v7519_v43 = vpop.f32.mrb[89].mxu1  ;;  %v3087_v33 = vcombine.high %v6745_v38, %v6745_v38 }
 0x62e   :  { %v2575_v44 = vpop.f32.mrb[90].mxu0  ;;  %v2615_v47 = vpop.f32.mrb[90].mxu1 }
 0x62f   :  { %v7512_v49 = vpop.f32.mrb[91].mxu0  ;;  %v7520_v53 = vpop.f32.mrb[91].mxu1 }
 0x630   :  { %v3094_v53 = vrot.slane %v6745_v38, %v8570_v48 }
 0x632   :  { %v3102_v7 = vcombine.high %v3094_v53, %v3094_v53 }
 0x634   :  { %v2652_v30 = vpop.f32.mrb[92].mxu0  ;;  %v2692_v6 = vpop.f32.mrb[92].mxu1 }
 0x635   :  { %v9189_v57 = vadd.f32 %v2652_v30, %v2363_v11  ;;  %v9191_v54 = vadd.f32 %v2692_v6, %v2367_v31  ;;  %v7527_v51 = vpop.f32.mrb[93].mxu0  ;;  %v7535_v60 = vpop.f32.mrb[93].mxu1  ;;  %v3101_v30 = vrot.slane %v3087_v33, %v8570_v48 }
 0x636   :  { %v2655_v10 = vpop.f32.mrb[94].mxu0  ;;  %v2695_v63 = vpop.f32.mrb[94].mxu1 }
 0x637   :  { %v7528_v55 = vpop.f32.mrb[95].mxu0  ;;  %v7536_v20 = vpop.f32.mrb[95].mxu1  ;;  %v3107_v10 = vrot.slane %v3094_v53, %v8573_v50  ;;  %v3111_v63 = vrot.slane %v3101_v30, %v8573_v50  ;;  %v3103_v8 = vcombine.high %v3101_v30, %v3101_v30 }
 0x63c   :  { %v9195_v13 = vpop.f32.mrb[96].mxu0  ;;  %v9197_v14 = vpop.f32.mrb[96].mxu1 }
 0x63d   :  { %v7543_v18 = vpop.f32.mrb[97].mxu0  ;;  %v7551_v15 = vpop.f32.mrb[97].mxu1 }
 0x63e   :  { %v2788_v59 = vpop.f32.mrb[98].mxu0  ;;  %v2828_v22 = vpop.f32.mrb[98].mxu1  ;;  %v3455_v18 = vpack.c.bf16 %v9180_v23, %v9180_v23 }
 0x63f   :  { %v7544_v27 = vpop.f32.mrb[99].mxu0  ;;  %v7552_v16 = vpop.f32.mrb[99].mxu1 }
 0x640   :  { %v3602_v23 = vsel %vm67_vm2, %v3455_v18, 0 }
 0x644   :  { %v2865_v4 = vpop.f32.mrb[100].mxu0  ;;  %v2905_v24 = vpop.f32.mrb[100].mxu1 }
 0x645   :  { %v9201_v1 = vadd.f32 %v2865_v4, %v2742_v28  ;;  %v9203_v25 = vadd.f32 %v2905_v24, %v2746_v0  ;;  %v7559_v5 = vpop.f32.mrb[101].mxu0  ;;  %v7567_v3 = vpop.f32.mrb[101].mxu1  ;;  %v3115_v24 = vrot.slane %v3102_v7, %v8573_v50 }
 0x646   :  { %v2868_v46 = vpop.f32.mrb[102].mxu0  ;;  %v2908_v56 = vpop.f32.mrb[102].mxu1  ;;  %v3119_v5 = vrot.slane %v3103_v8, %v8573_v50 }
 0x647   :  { %v7560_v19 = vpop.f32.mrb[103].mxu0  ;;  %v7568_v61 = vpop.f32.mrb[103].mxu1  ;;  %v3456_v56 = vpack.c.bf16 %v9182_v40, %v9182_v40 }
 0x648   :  { %v3457_v19 = vpack.c.bf16 %v9184_v41, %v9184_v41 }
 0x649   :  { %v3648_v40 = vsel %vm67_vm2, %v3456_v56, 0 }
 0x64a   :  { %v3694_v41 = vsel %vm67_vm2, %v3457_v19, 0 }
 0x64c   :  { %v2945_v62 = vpop.f32.mrb[104].mxu0  ;;  %v2985_v11 = vpop.f32.mrb[104].mxu1 }
 0x64d   :  { %v9212_v31 = vadd.f32 %v2945_v62, %v9206_v9  ;;  %v9215_v52 = vadd.f32 %v2985_v11, %v9209_v37  ;;  %v7575_v34 = vpop.f32.mrb[105].mxu0  ;;  %v7583_v26 = vpop.f32.mrb[105].mxu1 }
 0x64e   :  { %v2948_v17 = vpop.f32.mrb[106].mxu0  ;;  %v2988_v29 = vpop.f32.mrb[106].mxu1 }
 0x64f   :  { %v7576_v32 = vpop.f32.mrb[107].mxu0  ;;  %v7584_v45 = vpop.f32.mrb[107].mxu1 }
 0x654   :  { %v3025_v39 = vpop.f32.mrb[108].mxu0  ;;  %v3065_v42 = vpop.f32.mrb[108].mxu1 }
 0x655   :  { %v9220_v43 = vadd.f32 %v3025_v39, %v2742_v28  ;;  %v9222_v44 = vadd.f32 %v3065_v42, %v2746_v0  ;;  %v7591_v47 = vpop.f32.mrb[109].mxu0  ;;  %v7599_v49 = vpop.f32.mrb[109].mxu1  ;;  %v3458_v42 = vpack.c.bf16 %v9189_v57, %v9189_v57 }
 0x656   :  { %v3028_v6 = vpop.f32.mrb[110].mxu0  ;;  %v3068_v36 = vpop.f32.mrb[110].mxu1  ;;  %v3459_v47 = vpack.c.bf16 %v9191_v54, %v9191_v54 }
 0x657   :  { %v7592_v51 = vpop.f32.mrb[111].mxu0  ;;  %v7600_v60 = vpop.f32.mrb[111].mxu1  ;;  %v3740_v57 = vsel %vm67_vm2, %v3458_v42, 0 }
 0x658   :  { %v3786_v54 = vsel %vm67_vm2, %v3459_v47, 0 }
 0x65c   :  { %v3158_v55 = vpop.f32.mrb[112].mxu0  ;;  %v3198_v20 = vpop.f32.mrb[112].mxu1 }
 0x65d   :  { %v9232_v15 = vadd.f32 %v3158_v55, %v3107_v10  ;;  %v9234_v21 = vadd.f32 %v3198_v20, %v3111_v63  ;;  %v7607_v58 = vpop.f32.mrb[113].mxu0  ;;  %v7615_v59 = vpop.f32.mrb[113].mxu1 }
 0x65e   :  { %v3161_v22 = vpop.f32.mrb[114].mxu0  ;;  %v3201_v27 = vpop.f32.mrb[114].mxu1 }
 0x65f   :  { %v3444_v16 = vpack.c.bf16 %v9232_v15, %v9232_v15  ;;  %v3445_v28 = vpack.c.bf16 %v9234_v21, %v9234_v21  ;;  %v7608_v0 = vpop.f32.mrb[115].mxu0  ;;  %v7616_v4 = vpop.f32.mrb[115].mxu1 }
 0x661   :  { %7668 = vmatmul.mubr.msk.bf16.vlgmr.msra.gmra.mrb[128].mxu0 %vm67_vm2, %v3444_v16  ;;  %7674 = vmatmul.mubr.msk.bf16.vlgmr.msra.gmra.mrb[128].mxu1 %vm67_vm2, %v3445_v28 }
 0x662   :  { %7678 = vmatpush3.bf16.xpose.msra.mxu0 %v3556_v35  ;;  %7684 = vmatpush3.bf16.xpose.msra.mxu1 %v3602_v23 }
 0x663   :  { %7679 = vmatprep.mubr.msk.bf16.mxu0 %vm8211_vm1, %v8210_v2  ;;  %7685 = vmatprep.mubr.msk.bf16.mxu1 %vm8211_vm1, %v8210_v2 }
 0x664   :  { %v3238_v3 = vpop.f32.mrb[116].mxu0  ;;  %v3278_v46 = vpop.f32.mrb[116].mxu1  ;;  %7689 = vmatprep.subr.bf16.mxu0 %v8210_v2  ;;  %7695 = vmatprep.subr.bf16.mxu1 %v8210_v2 }
 0x665   :  { %v9256_v61 = vadd.f32 %v3238_v3, %v3115_v24  ;;  %v9258_v62 = vadd.f32 %v3278_v46, %v3119_v5  ;;  %v7623_v11 = vpop.f32.mrb[117].mxu0  ;;  %v7631_v34 = vpop.f32.mrb[117].mxu1 }
 0x666   :  { %v3241_v26 = vpop.f32.mrb[118].mxu0  ;;  %v3281_v17 = vpop.f32.mrb[118].mxu1 }
 0x667   :  { %v3446_v29 = vpack.c.bf16 %v9256_v61, %v9256_v61  ;;  %v3447_v38 = vpack.c.bf16 %v9258_v62, %v9258_v62  ;;  %v7624_v32 = vpop.f32.mrb[119].mxu0  ;;  %v7632_v45 = vpop.f32.mrb[119].mxu1 }
 0x669   :  { %7680 = vmatmul.mubr.msk.bf16.vlgmr.msra.gmra.mrb[132].mxu0 %vm67_vm2, %v3446_v29  ;;  %7686 = vmatmul.mubr.msk.bf16.vlgmr.msra.gmra.mrb[132].mxu1 %vm67_vm2, %v3447_v38 }
 0x66a   :  { %7690 = vmatpush3.bf16.xpose.msra.mxu0 %v3648_v40  ;;  %7696 = vmatpush3.bf16.xpose.msra.mxu1 %v3694_v41 }
 0x66b   :  { %7691 = vmatprep.mubr.msk.bf16.mxu0 %vm8211_vm1, %v8210_v2  ;;  %7697 = vmatprep.mubr.msk.bf16.mxu1 %vm8211_vm1, %v8210_v2 }
 0x66c   :  { %v3318_v33 = vpop.f32.mrb[120].mxu0  ;;  %v3358_v39 = vpop.f32.mrb[120].mxu1  ;;  %7701 = vmatprep.subr.bf16.mxu0 %v8210_v2  ;;  %7707 = vmatprep.subr.bf16.mxu1 %v8210_v2 }
 0x66d   :  { %v9278_v49 = vadd.f32 %v3318_v33, %v3107_v10  ;;  %v9280_v53 = vadd.f32 %v3358_v39, %v3111_v63  ;;  %v7639_v30 = vpop.f32.mrb[121].mxu0  ;;  %v7647_v6 = vpop.f32.mrb[121].mxu1  ;;  %v2786_v10 = vadd.f32 %v9195_v13, %v9206_v9  ;;  %v2826_v63 = vadd.f32 %v9197_v14, %v9209_v37 }
 0x66e   :  { %v3321_v36 = vpop.f32.mrb[122].mxu0  ;;  %v3361_v51 = vpop.f32.mrb[122].mxu1 }
 0x66f   :  { %v3448_v60 = vpack.c.bf16 %v9278_v49, %v9278_v49  ;;  %v3449_v55 = vpack.c.bf16 %v9280_v53, %v9280_v53  ;;  %v7640_v20 = vpop.f32.mrb[123].mxu0  ;;  %v7648_v7 = vpop.f32.mrb[123].mxu1  ;;  %v3997_v13 = vpack.c.bf16 %v2786_v10, %v2786_v10  ;;  %v3998_v14 = vpack.c.bf16 %v2826_v63, %v2826_v63 }
 0x671   :  { %7692 = vmatmul.mubr.msk.bf16.vlgmr.msra.gmra.mrb[136].mxu0 %vm67_vm2, %v3448_v60  ;;  %7698 = vmatmul.mubr.msk.bf16.vlgmr.msra.gmra.mrb[136].mxu1 %vm67_vm2, %v3449_v55  ;;  %v4011_v4 = vsel %vm4009_vm9, %v3997_v13, 0  ;;  %v4057_v35 = vsel %vm4009_vm9, %v3998_v14, 0 }
 0x672   :  { %7702 = vmatpush3.bf16.xpose.msra.mxu0 %v3740_v57  ;;  %7708 = vmatpush3.bf16.xpose.msra.mxu1 %v3786_v54 }
 0x673   :  { %7703 = vmatprep.mubr.msk.bf16.mxu0 %vm8211_vm1, %v8210_v2  ;;  %7709 = vmatprep.mubr.msk.bf16.mxu1 %vm8211_vm1, %v8210_v2 }
 0x674   :  { %v3398_v8 = vpop.f32.mrb[124].mxu0  ;;  %v3438_v12 = vpop.f32.mrb[124].mxu1  ;;  %7713 = vmatprep.subr.bf16.mxu0 %v8210_v2  ;;  %7719 = vmatprep.subr.bf16.mxu1 %v8210_v2 }
 0x675   :  { %v9300_v9 = vadd.f32 %v3398_v8, %v3115_v24  ;;  %v9302_v37 = vadd.f32 %v3438_v12, %v3119_v5  ;;  %v7655_v18 = vpop.f32.mrb[125].mxu0  ;;  %v7663_v58 = vpop.f32.mrb[125].mxu1 }
 0x676   :  { %v3401_v59 = vpop.f32.mrb[126].mxu0  ;;  %v3441_v22 = vpop.f32.mrb[126].mxu1 }
 0x677   :  { %v3450_v27 = vpack.c.bf16 %v9300_v9, %v9300_v9  ;;  %v3451_v16 = vpack.c.bf16 %v9302_v37, %v9302_v37  ;;  %v7656_v28 = vpop.f32.mrb[127].mxu0  ;;  %v7664_v0 = vpop.f32.mrb[127].mxu1 }
 0x679   :  { %7704 = vmatmul.mubr.msk.bf16.vlgmr.msra.gmra.mrb[140].mxu0 %vm67_vm2, %v3450_v27  ;;  %7710 = vmatmul.mubr.msk.bf16.vlgmr.msra.gmra.mrb[140].mxu1 %vm67_vm2, %v3451_v16 }
 0x67a   :  { %7714 = vmatpush3.bf16.msra.mxu0 %v4011_v4  ;;  %7720 = vmatpush3.bf16.msra.mxu1 %v4057_v35 }
 0x67b   :  { %7715 = vmatprep.mubr.msk.bf16.mxu0 %vm8211_vm1, %v8210_v2  ;;  %7721 = vmatprep.mubr.msk.bf16.mxu1 %vm8211_vm1, %v8210_v2 }
 0x67c   :  { %7725 = vmatprep.subr.bf16.mxu0 %v8210_v2  ;;  %7731 = vmatprep.subr.bf16.mxu1 %v8210_v2 }
 0x734   :  { %v3500_v23 = vpop.f32.mrb[128].mxu0  ;;  %v3546_v24 = vpop.f32.mrb[128].mxu1 }
 0x735   :  { %v3828_v5 = vmul.f32 0.17677669, %v3500_v23  ;;  %v3829_v3 = vmul.f32 0.17677669, %v3546_v24  ;;  %v7669_v46 = vpop.f32.mrb[129].mxu0  ;;  %v7675_v56 = vpop.f32.mrb[129].mxu1 }
 0x736   :  { %v3503_v19 = vpop.f32.mrb[130].mxu0  ;;  %v3549_v11 = vpop.f32.mrb[130].mxu1 }
 0x737   :  { %v3837_v34 = vsel %vm3836_vm10, %v3828_v5, -inf  ;;  %v3844_v26 = vsel %vm3836_vm10, %v3829_v3, -inf  ;;  %v7670_v17 = vpop.f32.mrb[131].mxu0  ;;  %v7676_v29 = vpop.f32.mrb[131].mxu1 }
 0x738   :  { %v3838_v38 = vrot.slane %v3837_v34, 4  ;;  %v3845_v32 = vrot.slane %v3844_v26, 4 }
 0x73a   :  { %v3839_v45 = vmax.f32 %v3837_v34, %v3838_v38  ;;  %v3846_v40 = vmax.f32 %v3844_v26, %v3845_v32 }
 0x73c   :  { %v3840_v41 = vrot.slane %v3839_v45, 2  ;;  %v3847_v33 = vrot.slane %v3846_v40, 2  ;;  %v3592_v39 = vpop.f32.mrb[132].mxu0  ;;  %v3638_v42 = vpop.f32.mrb[132].mxu1 }
 0x73d   :  { %v3830_v47 = vmul.f32 0.17677669, %v3592_v39  ;;  %v3831_v30 = vmul.f32 0.17677669, %v3638_v42  ;;  %v7681_v6 = vpop.f32.mrb[133].mxu0  ;;  %v7687_v36 = vpop.f32.mrb[133].mxu1 }
 0x73e   :  { %v3841_v51 = vmax.f32 %v3839_v45, %v3840_v41  ;;  %v3848_v60 = vmax.f32 %v3846_v40, %v3847_v33  ;;  %v3595_v55 = vpop.f32.mrb[134].mxu0  ;;  %v3641_v20 = vpop.f32.mrb[134].mxu1 }
 0x73f   :  { %v3851_v7 = vsel %vm3836_vm10, %v3830_v47, -inf  ;;  %v3858_v57 = vsel %vm3836_vm10, %v3831_v30, -inf  ;;  %v7682_v54 = vpop.f32.mrb[135].mxu0  ;;  %v7688_v10 = vpop.f32.mrb[135].mxu1 }
 0x740   :  { %v3842_v63 = vrot.slane %v3841_v51, 1  ;;  %v3849_v8 = vrot.slane %v3848_v60, 1  ;;  %v3852_v12 = vrot.slane %v3851_v7, 4  ;;  %v3859_v13 = vrot.slane %v3858_v57, 4 }
 0x742   :  { %v3843_v14 = vmax.f32 %v3841_v51, %v3842_v63  ;;  %v3850_v18 = vmax.f32 %v3848_v60, %v3849_v8  ;;  %v3853_v58 = vmax.f32 %v3851_v7, %v3852_v12  ;;  %v3860_v59 = vmax.f32 %v3858_v57, %v3859_v13 }
 0x744   :  { %v3893_v22 = vsub.f32 %v3828_v5, %v3843_v14  ;;  %v3894_v27 = vsub.f32 %v3829_v3, %v3850_v18  ;;  %v3854_v16 = vrot.slane %v3853_v58, 2  ;;  %v3861_v28 = vrot.slane %v3860_v59, 2  ;;  %v3684_v0 = vpop.f32.mrb[136].mxu0  ;;  %v3730_v4 = vpop.f32.mrb[136].mxu1 }
 0x745   :  { %v9322_v35 = vmul.f32 0.17677669, %v3684_v0  ;;  %v9324_v23 = vmul.f32 0.17677669, %v3730_v4  ;;  %v7693_v24 = vpop.f32.mrb[137].mxu0  ;;  %v7699_v46 = vpop.f32.mrb[137].mxu1 }
 0x746   :  { %v3901_v56 = vmul.f32 1.442695, %v3893_v22  ;;  %v3903_v19 = vmul.f32 1.442695, %v3894_v27  ;;  %v3855_v11 = vmax.f32 %v3853_v58, %v3854_v16  ;;  %v3862_v34 = vmax.f32 %v3860_v59, %v3861_v28  ;;  %v3687_v26 = vpop.f32.mrb[138].mxu0  ;;  %v3733_v17 = vpop.f32.mrb[138].mxu1 }
 0x747   :  { %v3865_v5 = vsel %vm3836_vm10, %v9322_v35, -inf  ;;  %v3872_v3 = vsel %vm3836_vm10, %v9324_v23, -inf  ;;  %v7694_v29 = vpop.f32.mrb[139].mxu0  ;;  %v7700_v38 = vpop.f32.mrb[139].mxu1 }
 0x748   :  { %8107 = vpow2.f32 %v3901_v56  ;;  %v3856_v32 = vrot.slane %v3855_v11, 1  ;;  %v3863_v45 = vrot.slane %v3862_v34, 1  ;;  %v3866_v40 = vrot.slane %v3865_v5, 4 }
 0x749   :  { %8109 = vpow2.f32 %v3903_v19  ;;  %v3873_v41 = vrot.slane %v3872_v3, 4 }
 0x74a   :  { %v3857_v33 = vmax.f32 %v3855_v11, %v3856_v32  ;;  %v3864_v39 = vmax.f32 %v3862_v34, %v3863_v45  ;;  %v3867_v42 = vmax.f32 %v3865_v5, %v3866_v40 }
 0x74b   :  { %v3874_v6 = vmax.f32 %v3872_v3, %v3873_v41 }
 0x74c   :  { %v3895_v36 = vsub.f32 %v3830_v47, %v3857_v33  ;;  %v3896_v51 = vsub.f32 %v3831_v30, %v3864_v39  ;;  %v3868_v60 = vrot.slane %v3867_v42, 2  ;;  %v3776_v55 = vpop.f32.mrb[140].mxu0  ;;  %v3822_v20 = vpop.f32.mrb[140].mxu1 }
 0x74d   :  { %v3875_v7 = vrot.slane %v3874_v6, 2  ;;  %v3834_v57 = vmul.f32 0.17677669, %v3776_v55  ;;  %v9330_v54 = vmul.f32 0.17677669, %v3822_v20  ;;  %v7705_v10 = vpop.f32.mrb[141].mxu0 }
 0x74e   :  { %v3905_v63 = vmul.f32 1.442695, %v3895_v36  ;;  %v3907_v8 = vmul.f32 1.442695, %v3896_v51  ;;  %v3869_v12 = vmax.f32 %v3867_v42, %v3868_v60  ;;  %v7711_v13 = vpop.f32.mrb[141].mxu1  ;;  %v3779_v14 = vpop.f32.mrb[142].mxu0 }
 0x74f   :  { %v3876_v18 = vmax.f32 %v3874_v6, %v3875_v7  ;;  %v3879_v58 = vsel %vm3836_vm10, %v3834_v57, -inf  ;;  %v3886_v47 = vsel %vm3836_vm10, %v9330_v54, -inf  ;;  %v3825_v30 = vpop.f32.mrb[142].mxu1  ;;  %v7706_v59 = vpop.f32.mrb[143].mxu0 }
 0x750   :  { %8111 = vpow2.f32 %v3905_v63  ;;  %v3870_v22 = vrot.slane %v3869_v12, 1  ;;  %v3880_v27 = vrot.slane %v3879_v58, 4  ;;  %v3887_v16 = vrot.slane %v3886_v47, 4  ;;  %v7712_v28 = vpop.f32.mrb[143].mxu1 }
 0x751   :  { %8113 = vpow2.f32 %v3907_v8  ;;  %v3877_v0 = vrot.slane %v3876_v18, 1 }
 0x752   :  { %v9335_v4 = vpop.eup %8107  ;;  %v3871_v24 = vmax.f32 %v3869_v12, %v3870_v22  ;;  %v3881_v46 = vmax.f32 %v3879_v58, %v3880_v27  ;;  %v3888_v56 = vmax.f32 %v3886_v47, %v3887_v16 }
 0x753   :  { %v9337_v19 = vpop.eup %8109  ;;  %v3917_v11 = vsel %vm3836_vm10, %v9335_v4, 0.0  ;;  %v3878_v34 = vmax.f32 %v3876_v18, %v3877_v0 }
 0x754   :  { %v3918_v26 = vrot.slane %v3917_v11, 4  ;;  %v3924_v17 = vsel %vm3836_vm10, %v9337_v19, 0.0  ;;  %v3897_v5 = vsub.f32 %v9322_v35, %v3871_v24  ;;  %v3882_v3 = vrot.slane %v3881_v46, 2 }
 0x755   :  { %v3925_v29 = vrot.slane %v3924_v17, 4  ;;  %v3898_v38 = vsub.f32 %v9324_v23, %v3878_v34  ;;  %v3889_v32 = vrot.slane %v3888_v56, 2 }
 0x756   :  { %v3919_v45 = vadd.f32 %v3918_v26, %v3917_v11  ;;  %v3909_v40 = vmul.f32 1.442695, %v3897_v5  ;;  %v3883_v41 = vmax.f32 %v3881_v46, %v3882_v3 }
 0x757   :  { %v3926_v33 = vadd.f32 %v3925_v29, %v3924_v17  ;;  %v3911_v39 = vmul.f32 1.442695, %v3898_v38  ;;  %v3890_v42 = vmax.f32 %v3888_v56, %v3889_v32 }
 0x758   :  { %v3920_v6 = vrot.slane %v3919_v45, 2  ;;  %8115 = vpow2.f32 %v3909_v40  ;;  %v3884_v36 = vrot.slane %v3883_v41, 1 }
 0x759   :  { %v3927_v51 = vrot.slane %v3926_v33, 2  ;;  %8117 = vpow2.f32 %v3911_v39  ;;  %v3891_v60 = vrot.slane %v3890_v42, 1 }
 0x75a   :  { %v9345_v55 = vpop.eup %8111  ;;  %v3921_v35 = vadd.f32 %v3920_v6, %v3919_v45  ;;  %v3885_v20 = vmax.f32 %v3883_v41, %v3884_v36  ;;  %v3999_v6 = vpack.c.bf16 %v9201_v1, %v9201_v1 }
 0x75b   :  { %v9347_v7 = vpop.eup %8113  ;;  %v3928_v23 = vadd.f32 %v3927_v51, %v3926_v33  ;;  %v3931_v10 = vsel %vm3836_vm10, %v9345_v55, 0.0  ;;  %v3892_v63 = vmax.f32 %v3890_v42, %v3891_v60 }
 0x75c   :  { %v3922_v8 = vrot.slane %v3921_v35, 1  ;;  %v3932_v12 = vrot.slane %v3931_v10, 4  ;;  %v3938_v13 = vsel %vm3836_vm10, %v9347_v7, 0.0  ;;  %v3899_v14 = vsub.f32 %v3834_v57, %v3885_v20 }
 0x75d   :  { %v3929_v18 = vrot.slane %v3928_v23, 1  ;;  %v3939_v58 = vrot.slane %v3938_v13, 4  ;;  %v3900_v47 = vsub.f32 %v9330_v54, %v3892_v63 }
 0x75e   :  { %v3923_v30 = vadd.f32 %v3922_v8, %v3921_v35  ;;  %v3933_v59 = vadd.f32 %v3932_v12, %v3931_v10  ;;  %v3913_v22 = vmul.f32 1.442695, %v3899_v14  ;;  %v4000_v35 = vpack.c.bf16 %v9203_v25, %v9203_v25 }
 0x75f   :  { %v3930_v27 = vadd.f32 %v3929_v18, %v3928_v23  ;;  %v3940_v16 = vadd.f32 %v3939_v58, %v3938_v13  ;;  %v3915_v28 = vmul.f32 1.442695, %v3900_v47  ;;  %v4103_v18 = vsel %vm4009_vm9, %v3999_v6, 0 }
 0x760   :  { %8119 = vrcp.f32 %v3923_v30  ;;  %v3934_v0 = vrot.slane %v3933_v59, 2 }
 0x761   :  { %8121 = vrcp.f32 %v3930_v27  ;;  %v3941_v24 = vrot.slane %v3940_v16, 2 }
 0x762   :  { %v9354_v46 = vpop.eup %8115  ;;  %v3935_v56 = vadd.f32 %v3934_v0, %v3933_v59  ;;  %8123 = vpow2.f32 %v3913_v22 }
 0x763   :  { %v9356_v11 = vpop.eup %8117  ;;  %v3942_v57 = vadd.f32 %v3941_v24, %v3940_v16  ;;  %v3945_v54 = vsel %vm3836_vm10, %v9354_v46, 0.0  ;;  %8125 = vpow2.f32 %v3915_v28  ;;  %v4001_v16 = vpack.c.bf16 %v9212_v31, %v9212_v31 }
 0x764   :  { %v3936_v34 = vrot.slane %v3935_v56, 1  ;;  %v3946_v26 = vrot.slane %v3945_v54, 4  ;;  %v3952_v17 = vsel %vm3836_vm10, %v9356_v11, 0.0  ;;  %v4002_v24 = vpack.c.bf16 %v9215_v52, %v9215_v52 }
 0x765   :  { %v3943_v5 = vrot.slane %v3942_v57, 1  ;;  %v3953_v3 = vrot.slane %v3952_v17, 4 }
 0x766   :  { %v3937_v29 = vadd.f32 %v3936_v34, %v3935_v56  ;;  %v3947_v38 = vadd.f32 %v3946_v26, %v3945_v54  ;;  %v4241_v31 = vsel %vm4009_vm9, %v4002_v24, 0 }
 0x767   :  { %v3944_v32 = vadd.f32 %v3943_v5, %v3942_v57  ;;  %v3954_v45 = vadd.f32 %v3953_v3, %v3952_v17  ;;  %v4195_v5 = vsel %vm4009_vm9, %v4001_v16, 0 }
 0x768   :  { %8127 = vrcp.f32 %v3937_v29  ;;  %v3948_v40 = vrot.slane %v3947_v38, 2 }
 0x769   :  { %8129 = vrcp.f32 %v3944_v32  ;;  %v3955_v41 = vrot.slane %v3954_v45, 2 }
 0x76a   :  { %v8120_v33 = vpop.eup %8119  ;;  %v3949_v39 = vadd.f32 %v3948_v40, %v3947_v38  ;;  %v4003_v38 = vpack.c.bf16 %v9220_v43, %v9220_v43 }
 0x76b   :  { %v8122_v42 = vpop.eup %8121  ;;  %v3956_v36 = vadd.f32 %v3955_v41, %v3954_v45  ;;  %v3981_v51 = vmul.f32 %v8120_v33, %v9335_v4  ;;  %v4004_v45 = vpack.c.bf16 %v9222_v44, %v9222_v44 }
 0x76c   :  { %v9365_v60 = vpop.eup %8123  ;;  %v3950_v20 = vrot.slane %v3949_v39, 1  ;;  %v3982_v23 = vmul.f32 %v8122_v42, %v9337_v19  ;;  %v4149_v19 = vsel %vm4009_vm9, %v4000_v35, 0 }
 0x76d   :  { %v9370_v10 = vpop.eup %8125  ;;  %v3957_v63 = vrot.slane %v3956_v36, 1  ;;  %v3959_v8 = vsel %vm3836_vm10, %v9365_v60, 0.0  ;;  %v3989_v12 = vpack.c.bf16 %v3981_v51, %v3981_v51  ;;  %v4333_v42 = vsel %vm4009_vm9, %v4004_v45, 0  ;;  %v6722_v51 = vld [vmem:[%s10009_s6 + $0x28] sm:$0xff] }
 0x76e   :  { %v3951_v1 = vadd.f32 %v3950_v20, %v3949_v39  ;;  %v3960_v13 = vrot.slane %v3959_v8, 4  ;;  %v3966_v4 = vsel %vm3836_vm10, %v9370_v10, 0.0  ;;  %v3990_v14 = vpack.c.bf16 %v3982_v23, %v3982_v23  ;;  %v6724_v20 = vld [vmem:[%s10009_s6 + $0x38] sm:$0xff]  ;;  %v6725_v23 = vld [vmem:[%s10009_s6 + $0x40] sm:$0xff] }
 0x76f   :  { %v3958_v25 = vadd.f32 %v3957_v63, %v3956_v36  ;;  %v3967_v58 = vrot.slane %v3966_v4, 4  ;;  %7716 = vmatmul.mubr.msk.bf16.vlgmr.msra.gmra.mrb[144].mxu0 %vm4005_vm11, %v3989_v12  ;;  %v4287_v39 = vsel %vm4009_vm9, %v4003_v38, 0  ;;  %v4416_v63 = vpack.c.bf16 %v6725_v23, %v6724_v20  ;;  %v6794_v20 = vld [vmem:[%s10007_s4 + $0x3a8] sm:$0xff] }
 0x770   :  { %8131 = vrcp.f32 %v3951_v1  ;;  %v3961_v47 = vadd.f32 %v3960_v13, %v3959_v8  ;;  %7722 = vmatmul.mubr.msk.bf16.vlgmr.msra.gmra.mrb[144].mxu1 %vm4005_vm11, %v3990_v14  ;;  %7726 = vmatpush3.bf16.msra.mxu0 %v4103_v18 }
 0x771   :  { %8133 = vrcp.f32 %v3958_v25  ;;  %v3968_v30 = vadd.f32 %v3967_v58, %v3966_v4  ;;  %7732 = vmatpush3.bf16.msra.mxu1 %v4149_v19  ;;  %7727 = vmatprep.mubr.msk.bf16.mxu0 %vm8211_vm1, %v8210_v2 }
 0x772   :  { %v8128_v59 = vpop.eup %8127  ;;  %v3962_v22 = vrot.slane %v3961_v47, 2  ;;  %7733 = vmatprep.mubr.msk.bf16.mxu1 %vm8211_vm1, %v8210_v2  ;;  %7737 = vmatprep.subr.bf16.mxu0 %v8210_v2 }
 0x773   :  { %v8130_v27 = vpop.eup %8129  ;;  %v3969_v28 = vrot.slane %v3968_v30, 2  ;;  %7743 = vmatprep.subr.bf16.mxu1 %v8210_v2  ;;  %v3983_v0 = vmul.f32 %v8128_v59, %v9345_v55 }
 0x774   :  { %v3963_v56 = vadd.f32 %v3962_v22, %v3961_v47  ;;  %v3984_v57 = vmul.f32 %v8130_v27, %v9347_v7 }
 0x775   :  { %v3970_v54 = vadd.f32 %v3969_v28, %v3968_v30  ;;  %v3991_v34 = vpack.c.bf16 %v3983_v0, %v3983_v0 }
 0x776   :  { %v3964_v26 = vrot.slane %v3963_v56, 1  ;;  %v3992_v17 = vpack.c.bf16 %v3984_v57, %v3984_v57 }
 0x777   :  { %v3971_v3 = vrot.slane %v3970_v54, 1  ;;  %7728 = vmatmul.mubr.msk.bf16.vlgmr.msra.gmra.mrb[148].mxu0 %vm4005_vm11, %v3991_v34 }
 0x778   :  { %v3965_v29 = vadd.f32 %v3964_v26, %v3963_v56  ;;  %7734 = vmatmul.mubr.msk.bf16.vlgmr.msra.gmra.mrb[148].mxu1 %vm4005_vm11, %v3992_v17  ;;  %7738 = vmatpush3.bf16.msra.mxu0 %v4195_v5 }
 0x779   :  { %v3972_v55 = vadd.f32 %v3971_v3, %v3970_v54  ;;  %7744 = vmatpush3.bf16.msra.mxu1 %v4241_v31  ;;  %7739 = vmatprep.mubr.msk.bf16.mxu0 %vm8211_vm1, %v8210_v2 }
 0x77a   :  { %v8132_v52 = vpop.eup %8131  ;;  %8135 = vrcp.f32 %v3965_v29  ;;  %7745 = vmatprep.mubr.msk.bf16.mxu1 %vm8211_vm1, %v8210_v2  ;;  %7749 = vmatprep.subr.bf16.mxu0 %v8210_v2 }
 0x77b   :  { %v8134_v7 = vpop.eup %8133  ;;  %8137 = vrcp.f32 %v3972_v55  ;;  %7755 = vmatprep.subr.bf16.mxu1 %v8210_v2  ;;  %v3985_v32 = vmul.f32 %v8132_v52, %v9354_v46 }
 0x77c   :  { %v3986_v40 = vmul.f32 %v8134_v7, %v9356_v11 }
 0x77d   :  { %v3993_v41 = vpack.c.bf16 %v3985_v32, %v3985_v32 }
 0x77e   :  { %v3994_v33 = vpack.c.bf16 %v3986_v40, %v3986_v40 }
 0x77f   :  { %7740 = vmatmul.mubr.msk.bf16.vlgmr.msra.gmra.mrb[152].mxu0 %vm4005_vm11, %v3993_v41 }
 0x780   :  { %7746 = vmatmul.mubr.msk.bf16.vlgmr.msra.gmra.mrb[152].mxu1 %vm4005_vm11, %v3994_v33  ;;  %7750 = vmatpush3.bf16.msra.mxu0 %v4287_v39 }
 0x781   :  { %7756 = vmatpush3.bf16.msra.mxu1 %v4333_v42  ;;  %7751 = vmatprep.mubr.msk.bf16.mxu0 %vm8211_vm1, %v8210_v2 }
 0x782   :  { %7757 = vmatprep.mubr.msk.bf16.mxu1 %vm8211_vm1, %v8210_v2  ;;  %7761 = vmatprep.subr.bf16.mxu0 %v8210_v2 }
 0x783   :  { %7769 = vmatprep.subr.bf16.mxu1 %v8210_v2 }
 0x784   :  { %v8136_v43 = vpop.eup %8135 }
 0x785   :  { %v8138_v44 = vpop.eup %8137  ;;  %v3987_v46 = vmul.f32 %v8136_v43, %v9365_v60  ;;  %v6723_v60 = vld [vmem:[%s10009_s6 + $0x30] sm:$0xff] }
 0x786   :  { %v3988_v11 = vmul.f32 %v8138_v44, %v9370_v10  ;;  %v4415_v35 = vpack.c.bf16 %v6723_v60, %v6722_v51  ;;  %v6790_v51 = vld [vmem:[%s10007_s4 + $0x388] sm:$0xff]  ;;  %v6793_v60 = vld [vmem:[%s10007_s4 + $0x3a0] sm:$0xff] }
 0x787   :  { %v3995_v6 = vpack.c.bf16 %v3987_v46, %v3987_v46  ;;  %v4607_v23 = vpack.c.bf16 %v6794_v20, %v6793_v60  ;;  %v6773_v20 = vld [vmem:[%s10007_s4 + $0x300] sm:$0xff] }
 0x788   :  { %v3996_v36 = vpack.c.bf16 %v3988_v11, %v3988_v11 }
 0x789   :  { %7752 = vmatmul.mubr.msk.bf16.vlgmr.msra.gmra.mrb[156].mxu0 %vm4005_vm11, %v3995_v6 }
 0x78a   :  { %7758 = vmatmul.mubr.msk.bf16.vlgmr.msra.gmra.mrb[156].mxu1 %vm4005_vm11, %v3996_v36  ;;  %7765 = vmatprep.mubr.msk.bf16.mxu0 %vm8211_vm1, %v8210_v2 }
 0x78b   :  { %7773 = vmatprep.mubr.msk.bf16.mxu1 %vm8211_vm1, %v8210_v2  ;;  %7762 = vmatpush3.bf16.msra.mxu0 %v4415_v35 }
 0x78c   :  { %7770 = vmatpush3.bf16.msra.mxu1 %v4415_v35  ;;  %7763 = vmatprep.subr.bf16.mxu0 %v8210_v2 }
 0x78d   :  { %7771 = vmatprep.subr.bf16.mxu1 %v8210_v2 }
 0x78f   :  { %7764 = vmatpush3.bf16.msra.mxu0 %v4416_v63 }
 0x790   :  { %7772 = vmatpush3.bf16.msra.mxu1 %v4416_v63  ;;  %7777 = vmatprep.subr.bf16.mxu0 %v8210_v2  ;;  %v6792_v63 = vld [vmem:[%s10007_s4 + $0x398] sm:$0xff] }
 0x791   :  { %7785 = vmatprep.subr.bf16.mxu1 %v8210_v2 }
 0x842   :  { %v4047_v10 = vpop.f32.mrb[144].mxu0 }
 0x843   :  { %v4093_v8 = vpop.f32.mrb[144].mxu1  ;;  %v7717_v12 = vpop.f32.mrb[145].mxu0  ;;  %v4375_v45 = vadd.f32 %v4047_v10, %v9232_v15  ;;  %v6791_v10 = vld [vmem:[%s10007_s4 + $0x390] sm:$0xff] }
 0x844   :  { %v4376_v1 = vadd.f32 %v4093_v8, %v9234_v21  ;;  %v7723_v13 = vpop.f32.mrb[145].mxu1  ;;  %v4050_v4 = vpop.f32.mrb[146].mxu0  ;;  %v6795_v8 = vld [vmem:[%s10007_s4 + $0x3b0] sm:$0xff]  ;;  %v4606_v12 = vpack.c.bf16 %v6792_v63, %v6791_v10  ;;  %v6777_v10 = vld [vmem:[%s10007_s4 + $0x320] sm:$0xff]  ;;  %v6778_v63 = vld [vmem:[%s10007_s4 + $0x328] sm:$0xff] }
 0x845   :  { %v4096_v14 = vpop.f32.mrb[146].mxu1  ;;  %v7718_v18 = vpop.f32.mrb[147].mxu0  ;;  %v6770_v4 = vld [vmem:[%s10009_s6 + $0x48] ss:$0 sm:$0xff] }
 0x846   :  { %4385 = vrot.lane.b32.xlu0 %v4376_v1, %s8214_s30  ;;  %v7724_v25 = vpop.f32.mrb[147].mxu1  ;;  %v6796_v1 = vld [vmem:[%s10007_s4 + $0x3b8] sm:$0xff] }
 0x847   :  { %v4608_v13 = vpack.c.bf16 %v6796_v1, %v6795_v8  ;;  %v6775_v1 = vld [vmem:[%s10007_s4 + $0x310] sm:$0xff] }
 0x84a   :  { %v4139_v58 = vpop.f32.mrb[148].mxu0 }
 0x84b   :  { %v4377_v19 = vadd.f32 %v4139_v58, %v9256_v61  ;;  %v4185_v47 = vpop.f32.mrb[148].mxu1  ;;  %v7729_v30 = vpop.f32.mrb[149].mxu0 }
 0x84c   :  { %v4378_v21 = vadd.f32 %v4185_v47, %v9258_v62  ;;  %v7735_v59 = vpop.f32.mrb[149].mxu1  ;;  %v4142_v22 = vpop.f32.mrb[150].mxu0 }
 0x84d   :  { %v4188_v27 = vpop.f32.mrb[150].mxu1  ;;  %4393 = vrot.lane.b32.xlu1 %v4377_v19, %s8215_s9  ;;  %v7730_v16 = vpop.f32.mrb[151].mxu0  ;;  %v6797_v19 = vld [vmem:[%s10007_s4 + $0x3c0] sm:$0xff]  ;;  %v6802_v22 = vld [vmem:[%s10007_s4 + $0x3e8] sm:$0xff] }
 0x84e   :  { %4401 = vrot.lane.b32.xlu0 %v4378_v21, %s8216_s10  ;;  %v7736_v28 = vpop.f32.mrb[151].mxu1  ;;  %v6798_v21 = vld [vmem:[%s10007_s4 + $0x3c8] sm:$0xff]  ;;  %v6801_v59 = vld [vmem:[%s10007_s4 + $0x3e0] sm:$0xff] }
 0x84f   :  { %v4609_v16 = vpack.c.bf16 %v6798_v21, %v6797_v19  ;;  %v4611_v28 = vpack.c.bf16 %v6802_v22, %v6801_v59  ;;  %v6781_v19 = vld [vmem:[%s10007_s4 + $0x340] sm:$0xff]  ;;  %v6786_v21 = vld [vmem:[%s10007_s4 + $0x368] sm:$0xff] }
 0x852   :  { %v4231_v0 = vpop.f32.mrb[152].mxu0 }
 0x853   :  { %v4277_v24 = vpop.f32.mrb[152].mxu1  ;;  %v7741_v56 = vpop.f32.mrb[153].mxu0  ;;  %v4379_v43 = vadd.f32 %v4231_v0, %v9278_v49  ;;  %v6789_v49 = vld [vmem:[%s10007_s4 + $0x380] sm:$0xff]  ;;  %v6799_v0 = vld [vmem:[%s10007_s4 + $0x3d0] sm:$0xff] }
 0x854   :  { %v4380_v57 = vadd.f32 %v4277_v24, %v9280_v53  ;;  %v7747_v54 = vpop.f32.mrb[153].mxu1  ;;  %v4234_v61 = vpop.f32.mrb[154].mxu0  ;;  %v4605_v35 = vpack.c.bf16 %v6790_v51, %v6789_v49  ;;  %v6800_v56 = vld [vmem:[%s10007_s4 + $0x3d8] sm:$0xff]  ;;  %v6819_v49 = vld [vmem:[%s10007_s4 + $0x470] sm:$0xff] }
 0x855   :  { %v4280_v34 = vpop.f32.mrb[154].mxu1  ;;  %v7742_v26 = vpop.f32.mrb[155].mxu0  ;;  %v6804_v54 = vld [vmem:[%s10007_s4 + $0x3f8] sm:$0xff]  ;;  %v4610_v61 = vpack.c.bf16 %v6800_v56, %v6799_v0  ;;  %v6787_v0 = vld [vmem:[%s10007_s4 + $0x370] sm:$0xff] }
 0x856   :  { %v7748_v17 = vpop.f32.mrb[155].mxu1  ;;  %4387 = vrot.lane.b32.xlu1 %v4380_v57, %s8214_s30  ;;  %v6803_v57 = vld [vmem:[%s10007_s4 + $0x3f0] sm:$0xff]  ;;  %v6820_v51 = vld [vmem:[%s10007_s4 + $0x478] sm:$0xff] }
 0x857   :  { %v4612_v34 = vpack.c.bf16 %v6804_v54, %v6803_v57  ;;  %v6830_v54 = vld.sshfl [vmem:[%s10008_s5 + $0x1c] sm:$0x33 pattern:$0x75316420] }
 0x85c   :  { %v4323_v62 = vpop.f32.mrb[156].mxu0 }
 0x85d   :  { %v4381_v5 = vadd.f32 %v4323_v62, %v9300_v9  ;;  %v4369_v3 = vpop.f32.mrb[156].mxu1  ;;  %v7753_v31 = vpop.f32.mrb[157].mxu0 }
 0x85e   :  { %v4382_v29 = vadd.f32 %v4369_v3, %v9302_v37  ;;  %v7759_v55 = vpop.f32.mrb[157].mxu1  ;;  %v4326_v52 = vpop.f32.mrb[158].mxu0 }
 0x85f   :  { %v4372_v7 = vpop.f32.mrb[158].mxu1  ;;  %4395 = vrot.lane.b32.xlu0 %v4381_v5, %s8215_s9  ;;  %v7754_v53 = vpop.f32.mrb[159].mxu0  ;;  %v6805_v52 = vld [vmem:[%s10007_s4 + $0x400] sm:$0xff] }
 0x860   :  { %v7760_v38 = vpop.f32.mrb[159].mxu1  ;;  %4403 = vrot.lane.b32.xlu1 %v4382_v29, %s8216_s10  ;;  %v6806_v7 = vld [vmem:[%s10007_s4 + $0x408] sm:$0xff]  ;;  %v6809_v53 = vld [vmem:[%s10007_s4 + $0x420] sm:$0xff] }
 0x861   :  { %v6810_v38 = vld [vmem:[%s10007_s4 + $0x428] sm:$0xff] }
 0x8b8   :  { %v4386_v32 = vpop.permute.xlu0 %4385 }
 0x8b9   :  { %v4407_v40 = vsel %vm67_vm2, %v4375_v45, %v4386_v32  ;;  %v4984_v32 = vpack.c.bf16 %v6806_v7, %v6805_v52  ;;  %v4986_v45 = vpack.c.bf16 %v6810_v38, %v6809_v53 }
 0x8bf   :  { %v4394_v41 = vpop.permute.xlu1 %4393 }
 0x8c0   :  { %v4402_v9 = vpop.permute.xlu0 %4401  ;;  %v4409_v33 = vsel %vm2150_vm7, %v4407_v40, %v4394_v41  ;;  %v6807_v40 = vld [vmem:[%s10007_s4 + $0x410] sm:$0xff]  ;;  %v6808_v41 = vld [vmem:[%s10007_s4 + $0x418] sm:$0xff] }
 0x8c1   :  { %v4411_v37 = vsel %vm2153_vm8, %v4409_v33, %v4402_v9  ;;  %v6811_v9 = vld [vmem:[%s10007_s4 + $0x430] sm:$0xff]  ;;  %v6812_v33 = vld [vmem:[%s10007_s4 + $0x438] sm:$0xff] }
 0x8c2   :  { %v4413_v39 = vpack.c.bf16 %v4411_v37, %v4411_v37 }
 0x8c4   :  { %7766 = vmatmul.mubr.msk.bf16.vlgmr.msra.gmra.mrb[160].mxu0 %vm310_vm5, %v4413_v39  ;;  %v4987_v39 = vpack.c.bf16 %v6812_v33, %v6811_v9 }
 0x8c5   :  { %7781 = vmatprep.mubr.msk.bf16.mxu0 %vm8211_vm1, %v8210_v2  ;;  %7778 = vmatpush3.bf16.msra.mxu0 %v4605_v35 }
 0x8c6   :  { %7779 = vmatprep.subr.bf16.mxu0 %v8210_v2 }
 0x8c8   :  { %v4388_v42 = vpop.permute.xlu1 %4387 }
 0x8c9   :  { %v4408_v44 = vsel %vm67_vm2, %v4379_v43, %v4388_v42  ;;  %7780 = vmatpush3.bf16.msra.mxu0 %v4606_v12  ;;  %v6813_v42 = vld [vmem:[%s10007_s4 + $0x440] sm:$0xff]  ;;  %v6814_v43 = vld [vmem:[%s10007_s4 + $0x448] sm:$0xff] }
 0x8ca   :  { %7793 = vmatprep.subr.bf16.mxu0 %v8210_v2 }
 0x8d1   :  { %v4396_v15 = vpop.permute.xlu0 %4395 }
 0x8d2   :  { %v4404_v46 = vpop.permute.xlu1 %4403  ;;  %v4410_v11 = vsel %vm2150_vm7, %v4408_v44, %v4396_v15  ;;  %v6817_v44 = vld [vmem:[%s10007_s4 + $0x460] sm:$0xff]  ;;  %v6818_v15 = vld [vmem:[%s10007_s4 + $0x468] sm:$0xff] }
 0x8d3   :  { %v9465_v6 = vsel %vm2153_vm8, %v4410_v11, %v4404_v46  ;;  %v4988_v46 = vpack.c.bf16 %v6814_v43, %v6813_v42  ;;  %v4990_v11 = vpack.c.bf16 %v6818_v15, %v6817_v44 }
 0x8d4   :  { %v4414_v36 = vpack.c.bf16 %v9465_v6, %v9465_v6 }
 0x8d6   :  { %7774 = vmatmul.mubr.msk.bf16.vlgmr.msra.gmra.mrb[160].mxu1 %vm310_vm5, %v4414_v36  ;;  %v6816_v36 = vld [vmem:[%s10007_s4 + $0x458] sm:$0xff] }
 0x8d7   :  { %7789 = vmatprep.mubr.msk.bf16.mxu1 %vm8211_vm1, %v8210_v2  ;;  %7786 = vmatpush3.bf16.msra.mxu1 %v4607_v23 }
 0x8d8   :  { %7787 = vmatprep.subr.bf16.mxu1 %v8210_v2 }
 0x8db   :  { %7788 = vmatpush3.bf16.msra.mxu1 %v4608_v13 }
 0x8dc   :  { %7801 = vmatprep.subr.bf16.mxu1 %v8210_v2 }
 0x997   :  { %v4458_v14 = vpop.f32.mrb[160].mxu0 }
 0x998   :  { %v4459_v18 = vadd.f32 %v6770_v4, %v4458_v14  ;;  %v7767_v25 = vpop.f32.mrb[161].mxu0  ;;  %v6780_v14 = vld [vmem:[%s10007_s4 + $0x338] sm:$0xff] }
 0x999   :  { %v4461_v58 = vpop.f32.mrb[162].mxu0 }
 0x99a   :  { %v4507_v47 = vmax.f32 %v4459_v18, 0.0  ;;  %v7768_v30 = vpop.f32.mrb[163].mxu0  ;;  %v6848_v58 = vld [vmem:[%s10010_s7 + $0x8] sm:$0x1] }
 0x99b   :  { %v6785_v30 = vld [vmem:[%s10007_s4 + $0x360] sm:$0xff]  ;;  %v5359_v59 = vpack.c.bf16 %v6848_v58, %v6848_v58 }
 0x99c   :  { %v4509_v27 = vadd.f32 %v4507_v47, %v4411_v37  ;;  %v4985_v37 = vpack.c.bf16 %v6808_v41, %v6807_v40  ;;  %v6782_v47 = vld [vmem:[%s10007_s4 + $0x348] sm:$0xff] }
 0x99d   :  { %v5364_v22 = vpack.c.bf16 %v6782_v47, %v6781_v19 }
 0x99e   :  { %v9518_v24 = vpack.c.bf16 %v4509_v27, %v4509_v27  ;;  %v5366_v27 = vpack.c.bf16 %v6786_v21, %v6785_v30 }
 0x9a0   :  { %7782 = vmatmul.mubr.msk.bf16.vlgmr.msra.gmra.mrb[164].mxu0 %vm310_vm5, %v9518_v24  ;;  %7790 = vmatmul.mubr.msk.bf16.vlgmr.msra.gmra.mrb[164].mxu1 %vm310_vm5, %v9518_v24 }
 0x9a1   :  { %7794 = vmatpush3.bf16.msra.mxu0 %v4609_v16  ;;  %7802 = vmatpush3.bf16.msra.mxu1 %v4611_v28 }
 0x9a2   :  { %7795 = vmatprep.subr.bf16.mxu0 %v8210_v2  ;;  %7803 = vmatprep.subr.bf16.mxu1 %v8210_v2 }
 0x9a3   :  { %7797 = vmatprep.mubr.msk.bf16.mxu0 %vm8211_vm1, %v8210_v2  ;;  %7805 = vmatprep.mubr.msk.bf16.mxu1 %vm8211_vm1, %v8210_v2 }
 0x9a5   :  { %7796 = vmatpush3.bf16.msra.mxu0 %v4610_v61  ;;  %7804 = vmatpush3.bf16.msra.mxu1 %v4612_v34 }
 0x9a6   :  { %7809 = vmatprep.subr.bf16.mxu0 %v8210_v2  ;;  %7817 = vmatprep.subr.bf16.mxu1 %v8210_v2 }
 0x9a8   :  { %7798 = vmatmul.mubr.msk.bf16.vlgmr.msra.gmra.mrb[168].mxu0 %vm310_vm5, %v9518_v24  ;;  %7806 = vmatmul.mubr.msk.bf16.vlgmr.msra.gmra.mrb[168].mxu1 %vm310_vm5, %v9518_v24 }
 0x9a9   :  { %v4501_v26 = vpop.f32.mrb[160].mxu1  ;;  %7810 = vmatpush3.bf16.msra.mxu0 %v4605_v35  ;;  %7818 = vmatpush3.bf16.msra.mxu1 %v4607_v23  ;;  %v4991_v35 = vpack.c.bf16 %v6820_v51, %v6819_v49  ;;  %v6774_v23 = vld [vmem:[%s10007_s4 + $0x308] sm:$0xff] }
 0x9aa   :  { %v4502_v17 = vadd.f32 %v6770_v4, %v4501_v26  ;;  %v7775_v62 = vpop.f32.mrb[161].mxu1  ;;  %7811 = vmatprep.subr.bf16.mxu0 %v8210_v2  ;;  %7819 = vmatprep.subr.bf16.mxu1 %v8210_v2  ;;  %v5360_v8 = vpack.c.bf16 %v6774_v23, %v6773_v20  ;;  %v6779_v4 = vld [vmem:[%s10007_s4 + $0x330] sm:$0xff] }
 0x9ab   :  { %v4504_v5 = vpop.f32.mrb[162].mxu1  ;;  %7813 = vmatprep.mubr.msk.bf16.mxu0 %vm8211_vm1, %v8210_v2  ;;  %7821 = vmatprep.mubr.msk.bf16.mxu1 %vm8211_vm1, %v8210_v2  ;;  %v5363_v25 = vpack.c.bf16 %v6780_v14, %v6779_v4 }
 0x9ac   :  { %v4508_v3 = vmax.f32 %v4502_v17, 0.0  ;;  %v7776_v31 = vpop.f32.mrb[163].mxu1 }
 0x9ad   :  { %7812 = vmatpush3.bf16.msra.mxu0 %v4606_v12  ;;  %7820 = vmatpush3.bf16.msra.mxu1 %v4608_v13  ;;  %v5362_v12 = vpack.c.bf16 %v6778_v63, %v6777_v10  ;;  %v6776_v13 = vld [vmem:[%s10007_s4 + $0x318] sm:$0xff] }
 0x9ae   :  { %v4510_v29 = vadd.f32 %v4508_v3, %v9465_v6  ;;  %7825 = vmatprep.subr.bf16.mxu0 %v8210_v2  ;;  %7833 = vmatprep.subr.bf16.mxu1 %v8210_v2  ;;  %v6815_v6 = vld [vmem:[%s10007_s4 + $0x450] sm:$0xff]  ;;  %v5361_v18 = vpack.c.bf16 %v6776_v13, %v6775_v1 }
 0x9af   :  { %v4989_v60 = vpack.c.bf16 %v6816_v36, %v6815_v6 }
 0x9b0   :  { %v9554_v55 = vpack.c.bf16 %v4510_v29, %v4510_v29 }
 0x9b2   :  { %7814 = vmatmul.mubr.msk.bf16.vlgmr.msra.gmra.mrb[172].mxu0 %vm310_vm5, %v9554_v55  ;;  %7822 = vmatmul.mubr.msk.bf16.vlgmr.msra.gmra.mrb[172].mxu1 %vm310_vm5, %v9554_v55 }
 0x9b3   :  { %7826 = vmatpush3.bf16.msra.mxu0 %v4609_v16  ;;  %7834 = vmatpush3.bf16.msra.mxu1 %v4611_v28  ;;  %v6783_v16 = vld [vmem:[%s10007_s4 + $0x350] sm:$0xff]  ;;  %v6784_v28 = vld [vmem:[%s10007_s4 + $0x358] sm:$0xff] }
 0x9b4   :  { %7827 = vmatprep.subr.bf16.mxu0 %v8210_v2  ;;  %7835 = vmatprep.subr.bf16.mxu1 %v8210_v2  ;;  %v5365_v56 = vpack.c.bf16 %v6784_v28, %v6783_v16 }
 0x9b5   :  { %7829 = vmatprep.mubr.msk.bf16.mxu0 %vm8211_vm1, %v8210_v2  ;;  %7837 = vmatprep.mubr.msk.bf16.mxu1 %vm8211_vm1, %v8210_v2 }
 0x9b7   :  { %7828 = vmatpush3.bf16.msra.mxu0 %v4610_v61  ;;  %7836 = vmatpush3.bf16.msra.mxu1 %v4612_v34  ;;  %v4621_v61 = vcombine.high %v6830_v54, %v6830_v54  ;;  %v4628_v34 = vrot.slane %v6830_v54, %v8570_v48 }
 0x9b8   :  { %7841 = vmatprep.subr.bf16.mxu0 %v8210_v2  ;;  %7849 = vmatprep.subr.bf16.mxu1 %v8210_v2 }
 0x9b9   :  { %v4635_v26 = vrot.slane %v4621_v61, %v8570_v48  ;;  %v4641_v17 = vrot.slane %v4628_v34, %v8573_v50  ;;  %v4636_v7 = vcombine.high %v4628_v34, %v4628_v34 }
 0x9ba   :  { %7830 = vmatmul.mubr.msk.bf16.vlgmr.msra.gmra.mrb[176].mxu0 %vm310_vm5, %v9554_v55  ;;  %7838 = vmatmul.mubr.msk.bf16.vlgmr.msra.gmra.mrb[176].mxu1 %vm310_vm5, %v9554_v55 }
 0x9bb   :  { %7842 = vmatpush3.bf16.msra.mxu0 %v4984_v32  ;;  %7850 = vmatpush3.bf16.msra.mxu1 %v4986_v45  ;;  %v4645_v62 = vrot.slane %v4635_v26, %v8573_v50  ;;  %v4637_v53 = vcombine.high %v4635_v26, %v4635_v26 }
 0x9bc   :  { %7843 = vmatprep.subr.bf16.mxu0 %v8210_v2  ;;  %7851 = vmatprep.subr.bf16.mxu1 %v8210_v2 }
 0x9bd   :  { %7845 = vmatprep.mubr.msk.bf16.mxu0 %vm8211_vm1, %v8210_v2  ;;  %7853 = vmatprep.mubr.msk.bf16.mxu1 %vm8211_vm1, %v8210_v2  ;;  %v4653_v42 = vrot.slane %v4637_v53, %v8573_v50 }
 0x9bf   :  { %7844 = vmatpush3.bf16.msra.mxu0 %v4985_v37  ;;  %7852 = vmatpush3.bf16.msra.mxu1 %v4987_v39 }
 0x9c0   :  { %7857 = vmatprep.subr.bf16.mxu0 %v8210_v2  ;;  %7865 = vmatprep.subr.bf16.mxu1 %v8210_v2 }
 0x9c2   :  { %7846 = vmatmul.mubr.msk.bf16.vlgmr.msra.gmra.mrb[180].mxu0 %vm310_vm5, %v9518_v24  ;;  %7854 = vmatmul.mubr.msk.bf16.vlgmr.msra.gmra.mrb[180].mxu1 %vm310_vm5, %v9518_v24 }
 0x9c3   :  { %7858 = vmatpush3.bf16.msra.mxu0 %v4988_v46  ;;  %7866 = vmatpush3.bf16.msra.mxu1 %v4990_v11 }
 0x9c4   :  { %7859 = vmatprep.subr.bf16.mxu0 %v8210_v2  ;;  %7867 = vmatprep.subr.bf16.mxu1 %v8210_v2 }
 0x9c5   :  { %7861 = vmatprep.mubr.msk.bf16.mxu0 %vm8211_vm1, %v8210_v2  ;;  %7869 = vmatprep.mubr.msk.bf16.mxu1 %vm8211_vm1, %v8210_v2 }
 0x9c7   :  { %7860 = vmatpush3.bf16.msra.mxu0 %v4989_v60  ;;  %7868 = vmatpush3.bf16.msra.mxu1 %v4991_v35 }
 0x9c8   :  { %7873 = vmatprep.subr.bf16.mxu0 %v8210_v2  ;;  %7881 = vmatprep.subr.bf16.mxu1 %v8210_v2 }
 0x9ca   :  { %7862 = vmatmul.mubr.msk.bf16.vlgmr.msra.gmra.mrb[184].mxu0 %vm310_vm5, %v9518_v24  ;;  %7870 = vmatmul.mubr.msk.bf16.vlgmr.msra.gmra.mrb[184].mxu1 %vm310_vm5, %v9518_v24  ;;  %v6788_v24 = vld [vmem:[%s10007_s4 + $0x378] sm:$0xff] }
 0x9cb   :  { %7874 = vmatpush3.bf16.msra.mxu0 %v4984_v32  ;;  %7882 = vmatpush3.bf16.msra.mxu1 %v4986_v45  ;;  %v5367_v57 = vpack.c.bf16 %v6788_v24, %v6787_v0 }
 0x9cc   :  { %7875 = vmatprep.subr.bf16.mxu0 %v8210_v2  ;;  %7883 = vmatprep.subr.bf16.mxu1 %v8210_v2 }
 0x9cd   :  { %7877 = vmatprep.mubr.msk.bf16.mxu0 %vm8211_vm1, %v8210_v2  ;;  %7885 = vmatprep.mubr.msk.bf16.mxu1 %vm8211_vm1, %v8210_v2 }
 0x9cf   :  { %7876 = vmatpush3.bf16.msra.mxu0 %v4985_v37  ;;  %7884 = vmatpush3.bf16.msra.mxu1 %v4987_v39  ;;  %v4649_v39 = vrot.slane %v4636_v7, %v8573_v50 }
 0x9d0   :  { %7889 = vmatprep.subr.bf16.mxu0 %v8210_v2  ;;  %7897 = vmatprep.subr.bf16.mxu1 %v8210_v2 }
 0x9d2   :  { %7878 = vmatmul.mubr.msk.bf16.vlgmr.msra.gmra.mrb[188].mxu0 %vm310_vm5, %v9554_v55  ;;  %7886 = vmatmul.mubr.msk.bf16.vlgmr.msra.gmra.mrb[188].mxu1 %vm310_vm5, %v9554_v55 }
 0x9d3   :  { %7890 = vmatpush3.bf16.msra.mxu0 %v4988_v46  ;;  %7898 = vmatpush3.bf16.msra.mxu1 %v4990_v11 }
 0x9d4   :  { %7891 = vmatprep.subr.bf16.mxu0 %v8210_v2  ;;  %7899 = vmatprep.subr.bf16.mxu1 %v8210_v2 }
 0x9d5   :  { %7893 = vmatprep.mubr.msk.bf16.mxu0 %vm8211_vm1, %v8210_v2  ;;  %7901 = vmatprep.mubr.msk.bf16.mxu1 %vm8211_vm1, %v8210_v2 }
 0x9d7   :  { %7892 = vmatpush3.bf16.msra.mxu0 %v4989_v60  ;;  %7900 = vmatpush3.bf16.msra.mxu1 %v4991_v35 }
 0x9d8   :  { %7905 = vmatprep.subr.bf16.mxu0 %v8210_v2  ;;  %7913 = vmatprep.subr.bf16.mxu1 %v8210_v2 }
 0x9da   :  { %7894 = vmatmul.mubr.msk.bf16.vlgmr.msra.gmra.mrb[192].mxu0 %vm310_vm5, %v9554_v55  ;;  %7902 = vmatmul.mubr.msk.bf16.vlgmr.msra.gmra.mrb[192].mxu1 %vm310_vm5, %v9554_v55 }
 0x9db   :  { %7906 = vmatpush3.bf16.msra.mxu0 %v5360_v8  ;;  %7914 = vmatpush3.bf16.msra.mxu1 %v5362_v12 }
 0x9dc   :  { %7907 = vmatprep.subr.bf16.mxu0 %v8210_v2  ;;  %7915 = vmatprep.subr.bf16.mxu1 %v8210_v2 }
 0x9dd   :  { %7909 = vmatprep.mubr.msk.bf16.mxu0 %vm8211_vm1, %v8210_v2  ;;  %7917 = vmatprep.mubr.msk.bf16.mxu1 %vm8211_vm1, %v8210_v2 }
 0x9df   :  { %7908 = vmatpush3.bf16.msra.mxu0 %v5361_v18  ;;  %7916 = vmatpush3.bf16.msra.mxu1 %v5363_v25  ;;  %v6839_v25 = vld.sshfl [vmem:[%s10008_s5 + $0x20] sm:$0x33 pattern:$0x75316420] }
 0x9e0   :  { %7921 = vmatprep.subr.bf16.mxu0 %v8210_v2  ;;  %7929 = vmatprep.subr.bf16.mxu1 %v8210_v2  ;;  %v5000_v16 = vcombine.high %v6839_v25, %v6839_v25  ;;  %v5007_v28 = vrot.slane %v6839_v25, %v8570_v48 }
 0x9e2   :  { %7910 = vmatmul.mubr.msk.bf16.vlgmr.msra.gmra.mrb[196].mxu0 %vm310_vm5, %v5359_v59  ;;  %7918 = vmatmul.mubr.msk.bf16.vlgmr.msra.gmra.mrb[196].mxu1 %vm310_vm5, %v5359_v59  ;;  %v5014_v0 = vrot.slane %v5000_v16, %v8570_v48  ;;  %v5015_v61 = vcombine.high %v5007_v28, %v5007_v28 }
 0x9e3   :  { %7922 = vmatpush3.bf16.msra.mxu0 %v5364_v22  ;;  %7930 = vmatpush3.bf16.msra.mxu1 %v5366_v27 }
 0x9e4   :  { %7923 = vmatprep.subr.bf16.mxu0 %v8210_v2  ;;  %7931 = vmatprep.subr.bf16.mxu1 %v8210_v2  ;;  %v5016_v34 = vcombine.high %v5014_v0, %v5014_v0 }
 0x9e5   :  { %7925 = vmatprep.mubr.msk.bf16.mxu0 %vm8211_vm1, %v8210_v2  ;;  %7933 = vmatprep.mubr.msk.bf16.mxu1 %vm8211_vm1, %v8210_v2 }
 0x9e7   :  { %7924 = vmatpush3.bf16.msra.mxu0 %v5365_v56  ;;  %7932 = vmatpush3.bf16.msra.mxu1 %v5367_v57 }
 0x9e8   :  { %7937 = vmatprep.subr.bf16.mxu0 %v8210_v2  ;;  %7943 = vmatprep.subr.bf16.mxu1 %v8210_v2 }
 0x9ea   :  { %7926 = vmatmul.mubr.msk.bf16.vlgmr.msra.gmra.mrb[200].mxu0 %vm310_vm5, %v5359_v59  ;;  %7934 = vmatmul.mubr.msk.bf16.vlgmr.msra.gmra.mrb[200].mxu1 %vm310_vm5, %v5359_v59 }
 0x9eb   :  { %7939 = vmatprep.mubr.msk.bf16.mxu0 %vm8211_vm1, %v8210_v2  ;;  %7945 = vmatprep.mubr.msk.bf16.mxu1 %vm8211_vm1, %v8210_v2 }
 0xa73   :  { %v4695_v5 = vpop.f32.mrb[164].mxu0  ;;  %v4735_v3 = vpop.f32.mrb[164].mxu1 }
 0xa74   :  { %v4696_v31 = vadd.f32 %v4695_v5, %v4641_v17  ;;  %v4736_v29 = vadd.f32 %v4735_v3, %v4645_v62  ;;  %v7783_v55 = vpop.f32.mrb[165].mxu0  ;;  %v7791_v52 = vpop.f32.mrb[165].mxu1  ;;  %v5028_v3 = vrot.slane %v5015_v61, %v8573_v50 }
 0xa75   :  { %v4698_v38 = vpop.f32.mrb[166].mxu0  ;;  %v4738_v32 = vpop.f32.mrb[166].mxu1 }
 0xa76   :  { %v5535_v45 = vpack.c.bf16 %v4696_v31, %v4696_v31  ;;  %v5536_v40 = vpack.c.bf16 %v4736_v29, %v4736_v29  ;;  %v7784_v41 = vpop.f32.mrb[167].mxu0  ;;  %v7792_v9 = vpop.f32.mrb[167].mxu1  ;;  %v5032_v31 = vrot.slane %v5016_v34, %v8573_v50 }
 0xa77   :  { %v9784_v9 = vrot.slane %v5007_v28, %v8573_v50 }
 0xa78   :  { %v5547_v33 = vsel %vm67_vm2, %v5535_v45, 0  ;;  %v5593_v37 = vsel %vm67_vm2, %v5536_v40, 0 }
 0xa79   :  { %7938 = vmatpush3.bf16.xpose.msra.mxu0 %v5547_v33  ;;  %7944 = vmatpush3.bf16.xpose.msra.mxu1 %v5593_v37  ;;  %v9787_v33 = vrot.slane %v5014_v0, %v8573_v50 }
 0xa7a   :  { %7949 = vmatprep.subr.bf16.mxu0 %v8210_v2  ;;  %7955 = vmatprep.subr.bf16.mxu1 %v8210_v2 }
 0xa7b   :  { %v4775_v43 = vpop.f32.mrb[168].mxu0  ;;  %v4815_v44 = vpop.f32.mrb[168].mxu1 }
 0xa7c   :  { %v9756_v15 = vadd.f32 %v4775_v43, %v4649_v39  ;;  %v9758_v46 = vadd.f32 %v4815_v44, %v4653_v42  ;;  %v7799_v11 = vpop.f32.mrb[169].mxu0  ;;  %v7807_v6 = vpop.f32.mrb[169].mxu1 }
 0xa7d   :  { %v4778_v36 = vpop.f32.mrb[170].mxu0  ;;  %v4818_v49 = vpop.f32.mrb[170].mxu1 }
 0xa7e   :  { %v7800_v51 = vpop.f32.mrb[171].mxu0  ;;  %v7808_v60 = vpop.f32.mrb[171].mxu1 }
 0xa7f   :  { %v6822_v60 = vld.sshfl [vmem:[%s10008_s5 + $0x18] sm:$0x33 pattern:$0x75316420] }
 0xa80   :  { %v4579_v25 = vrot.slane %v6822_v60, %v8570_v48 }
 0xa85   :  { %v4858_v35 = vpop.f32.mrb[172].mxu0  ;;  %v4898_v20 = vpop.f32.mrb[172].mxu1 }
 0xa86   :  { %v9760_v23 = vadd.f32 %v4858_v35, %v4641_v17  ;;  %v9762_v10 = vadd.f32 %v4898_v20, %v4645_v62  ;;  %v7815_v63 = vpop.f32.mrb[173].mxu0  ;;  %v7823_v8 = vpop.f32.mrb[173].mxu1 }
 0xa87   :  { %v4861_v12 = vpop.f32.mrb[174].mxu0  ;;  %v4901_v1 = vpop.f32.mrb[174].mxu1 }
 0xa88   :  { %v7816_v13 = vpop.f32.mrb[175].mxu0  ;;  %v7824_v4 = vpop.f32.mrb[175].mxu1  ;;  %v4572_v1 = vcombine.high %v6822_v60, %v6822_v60 }
 0xa8d   :  { %v4938_v14 = vpop.f32.mrb[176].mxu0  ;;  %v4978_v18 = vpop.f32.mrb[176].mxu1 }
 0xa8e   :  { %v9767_v58 = vadd.f32 %v4938_v14, %v4649_v39  ;;  %v9769_v19 = vadd.f32 %v4978_v18, %v4653_v42  ;;  %v7831_v47 = vpop.f32.mrb[177].mxu0  ;;  %v7839_v30 = vpop.f32.mrb[177].mxu1 }
 0xa8f   :  { %v4941_v21 = vpop.f32.mrb[178].mxu0  ;;  %v4981_v59 = vpop.f32.mrb[178].mxu1  ;;  %v4586_v47 = vrot.slane %v4572_v1, %v8570_v48 }
 0xa90   :  { %v7832_v22 = vpop.f32.mrb[179].mxu0  ;;  %v7840_v27 = vpop.f32.mrb[179].mxu1  ;;  %v5537_v59 = vpack.c.bf16 %v9756_v15, %v9756_v15 }
 0xa91   :  { %v5538_v22 = vpack.c.bf16 %v9758_v46, %v9758_v46 }
 0xa92   :  { %v5639_v15 = vsel %vm67_vm2, %v5537_v59, 0 }
 0xa93   :  { %v5685_v46 = vsel %vm67_vm2, %v5538_v22, 0 }
 0xa95   :  { %v9773_v24 = vpop.f32.mrb[180].mxu0  ;;  %v9775_v56 = vpop.f32.mrb[180].mxu1 }
 0xa96   :  { %v7847_v57 = vpop.f32.mrb[181].mxu0  ;;  %v7855_v54 = vpop.f32.mrb[181].mxu1  ;;  %v5112_v60 = vadd.f32 %v9775_v56, %v9787_v33 }
 0xa97   :  { %v5074_v26 = vpop.f32.mrb[182].mxu0  ;;  %v5114_v17 = vpop.f32.mrb[182].mxu1 }
 0xa98   :  { %v7848_v62 = vpop.f32.mrb[183].mxu0  ;;  %v7856_v5 = vpop.f32.mrb[183].mxu1  ;;  %v4587_v17 = vcombine.high %v4579_v25, %v4579_v25 }
 0xa99   :  { %v4588_v62 = vcombine.high %v4586_v47, %v4586_v47 }
 0xa9d   :  { %v5151_v29 = vpop.f32.mrb[184].mxu0  ;;  %v5191_v55 = vpop.f32.mrb[184].mxu1 }
 0xa9e   :  { %v9779_v52 = vadd.f32 %v5151_v29, %v5028_v3  ;;  %v9781_v7 = vadd.f32 %v5191_v55, %v5032_v31  ;;  %v7863_v53 = vpop.f32.mrb[185].mxu0  ;;  %v7871_v38 = vpop.f32.mrb[185].mxu1  ;;  %v5540_v29 = vpack.c.bf16 %v9762_v10, %v9762_v10 }
 0xa9f   :  { %v5154_v32 = vpop.f32.mrb[186].mxu0  ;;  %v5194_v45 = vpop.f32.mrb[186].mxu1 }
 0xaa0   :  { %v7864_v40 = vpop.f32.mrb[187].mxu0  ;;  %v7872_v41 = vpop.f32.mrb[187].mxu1  ;;  %v5771_v10 = vsel %vm67_vm2, %v5540_v29, 0 }
 0xaa5   :  { %v5231_v37 = vpop.f32.mrb[188].mxu0  ;;  %v5271_v39 = vpop.f32.mrb[188].mxu1 }
 0xaa6   :  { %v9790_v42 = vadd.f32 %v5231_v37, %v9784_v9  ;;  %v9793_v43 = vadd.f32 %v5271_v39, %v9787_v33  ;;  %v7879_v44 = vpop.f32.mrb[189].mxu0  ;;  %v7887_v11 = vpop.f32.mrb[189].mxu1 }
 0xaa7   :  { %v5234_v6 = vpop.f32.mrb[190].mxu0  ;;  %v5274_v36 = vpop.f32.mrb[190].mxu1  ;;  %v5541_v11 = vpack.c.bf16 %v9767_v58, %v9767_v58 }
 0xaa8   :  { %v7880_v49 = vpop.f32.mrb[191].mxu0  ;;  %v7888_v51 = vpop.f32.mrb[191].mxu1  ;;  %v5542_v6 = vpack.c.bf16 %v9769_v19, %v9769_v19  ;;  %v5964_v19 = vpack.c.bf16 %v5112_v60, %v5112_v60 }
 0xaa9   :  { %v5814_v36 = vsel %vm67_vm2, %v5541_v11, 0  ;;  %v5072_v51 = vadd.f32 %v9773_v24, %v9784_v9 }
 0xaaa   :  { %v5857_v49 = vsel %vm67_vm2, %v5542_v6, 0  ;;  %v6021_v56 = vsel %vm4009_vm9, %v5964_v19, 0 }
 0xaab   :  { %v5963_v58 = vpack.c.bf16 %v5072_v51, %v5072_v51 }
 0xaad   :  { %v5311_v50 = vpop.f32.mrb[192].mxu0  ;;  %v5351_v35 = vpop.f32.mrb[192].mxu1  ;;  %v5975_v24 = vsel %vm4009_vm9, %v5963_v58, 0 }
 0xaae   :  { %v9798_v20 = vadd.f32 %v5311_v50, %v5028_v3  ;;  %v9800_v63 = vadd.f32 %v5351_v35, %v5032_v31  ;;  %v7895_v8 = vpop.f32.mrb[193].mxu0  ;;  %v7903_v12 = vpop.f32.mrb[193].mxu1  ;;  %v5539_v31 = vpack.c.bf16 %v9760_v23, %v9760_v23 }
 0xaaf   :  { %v5314_v13 = vpop.f32.mrb[194].mxu0  ;;  %v5354_v4 = vpop.f32.mrb[194].mxu1 }
 0xab0   :  { %v7896_v14 = vpop.f32.mrb[195].mxu0  ;;  %v7904_v18 = vpop.f32.mrb[195].mxu1  ;;  %v5728_v23 = vsel %vm67_vm2, %v5539_v31, 0 }
 0xab5   :  { %v5405_v30 = vpop.f32.mrb[196].mxu0  ;;  %v5445_v21 = vpop.f32.mrb[196].mxu1 }
 0xab6   :  { %v9808_v27 = vadd.f32 %v5405_v30, %v4579_v25  ;;  %v9810_v16 = vadd.f32 %v5445_v21, %v4586_v47  ;;  %v7911_v28 = vpop.f32.mrb[197].mxu0  ;;  %v7919_v0 = vpop.f32.mrb[197].mxu1 }
 0xab7   :  { %v5408_v57 = vpop.f32.mrb[198].mxu0  ;;  %v5448_v54 = vpop.f32.mrb[198].mxu1 }
 0xab8   :  { %v5531_v61 = vpack.c.bf16 %v9808_v27, %v9808_v27  ;;  %v5532_v48 = vpack.c.bf16 %v9810_v16, %v9810_v16  ;;  %v7912_v34 = vpop.f32.mrb[199].mxu0  ;;  %v7920_v26 = vpop.f32.mrb[199].mxu1 }
 0xaba   :  { %7940 = vmatmul.mubr.msk.bf16.vlgmr.msra.gmra.mrb[204].mxu0 %vm67_vm2, %v5531_v61  ;;  %7946 = vmatmul.mubr.msk.bf16.vlgmr.msra.gmra.mrb[204].mxu1 %vm67_vm2, %v5532_v48 }
 0xabb   :  { %7950 = vmatpush3.bf16.xpose.msra.mxu0 %v5639_v15  ;;  %7956 = vmatpush3.bf16.xpose.msra.mxu1 %v5685_v46 }
 0xabc   :  { %7951 = vmatprep.mubr.msk.bf16.mxu0 %vm8211_vm1, %v8210_v2  ;;  %7957 = vmatprep.mubr.msk.bf16.mxu1 %vm8211_vm1, %v8210_v2 }
 0xabd   :  { %v5485_v5 = vpop.f32.mrb[200].mxu0  ;;  %v5525_v3 = vpop.f32.mrb[200].mxu1  ;;  %7961 = vmatprep.subr.bf16.mxu0 %v8210_v2  ;;  %7967 = vmatprep.subr.bf16.mxu1 %v8210_v2 }
 0xabe   :  { %v9830_v55 = vadd.f32 %v5485_v5, %v4587_v17  ;;  %v9832_v53 = vadd.f32 %v5525_v3, %v4588_v62  ;;  %v7927_v38 = vpop.f32.mrb[201].mxu0  ;;  %v7935_v32 = vpop.f32.mrb[201].mxu1 }
 0xabf   :  { %v5488_v45 = vpop.f32.mrb[202].mxu0  ;;  %v5528_v40 = vpop.f32.mrb[202].mxu1 }
 0xac0   :  { %v5533_v41 = vpack.c.bf16 %v9830_v55, %v9830_v55  ;;  %v5534_v37 = vpack.c.bf16 %v9832_v53, %v9832_v53  ;;  %v7928_v39 = vpop.f32.mrb[203].mxu0  ;;  %v7936_v44 = vpop.f32.mrb[203].mxu1 }
 0xac2   :  { %7952 = vmatmul.mubr.msk.bf16.vlgmr.msra.gmra.mrb[208].mxu0 %vm67_vm2, %v5533_v41  ;;  %7958 = vmatmul.mubr.msk.bf16.vlgmr.msra.gmra.mrb[208].mxu1 %vm67_vm2, %v5534_v37 }
 0xac3   :  { %7962 = vmatpush3.bf16.xpose.msra.mxu0 %v5728_v23  ;;  %7968 = vmatpush3.bf16.xpose.msra.mxu1 %v5771_v10 }
 0xac4   :  { %7963 = vmatprep.mubr.msk.bf16.mxu0 %vm8211_vm1, %v8210_v2  ;;  %7969 = vmatprep.mubr.msk.bf16.mxu1 %vm8211_vm1, %v8210_v2 }
 0xac5   :  { %7973 = vmatprep.subr.bf16.mxu0 %v8210_v2  ;;  %7979 = vmatprep.subr.bf16.mxu1 %v8210_v2 }
 0xaca   :  { %7964 = vmatmul.mubr.msk.bf16.vlgmr.msra.gmra.mrb[212].mxu0 %vm67_vm2, %v5531_v61  ;;  %7970 = vmatmul.mubr.msk.bf16.vlgmr.msra.gmra.mrb[212].mxu1 %vm67_vm2, %v5532_v48 }
 0xacb   :  { %7974 = vmatpush3.bf16.xpose.msra.mxu0 %v5814_v36  ;;  %7980 = vmatpush3.bf16.xpose.msra.mxu1 %v5857_v49 }
 0xacc   :  { %7975 = vmatprep.mubr.msk.bf16.mxu0 %vm8211_vm1, %v8210_v2  ;;  %7981 = vmatprep.mubr.msk.bf16.mxu1 %vm8211_vm1, %v8210_v2 }
 0xacd   :  { %7985 = vmatprep.subr.bf16.mxu0 %v8210_v2  ;;  %7991 = vmatprep.subr.bf16.mxu1 %v8210_v2 }
 0xad2   :  { %7976 = vmatmul.mubr.msk.bf16.vlgmr.msra.gmra.mrb[216].mxu0 %vm67_vm2, %v5533_v41  ;;  %7982 = vmatmul.mubr.msk.bf16.vlgmr.msra.gmra.mrb[216].mxu1 %vm67_vm2, %v5534_v37 }
 0xad3   :  { %7986 = vmatpush3.bf16.msra.mxu0 %v5975_v24  ;;  %7992 = vmatpush3.bf16.msra.mxu1 %v6021_v56 }
 0xad4   :  { %7987 = vmatprep.mubr.msk.bf16.mxu0 %vm8211_vm1, %v8210_v2  ;;  %7993 = vmatprep.mubr.msk.bf16.mxu1 %vm8211_vm1, %v8210_v2 }
 0xad5   :  { %7997 = vmatprep.subr.bf16.mxu0 %v8210_v2  ;;  %8003 = vmatprep.subr.bf16.mxu1 %v8210_v2 }
 0xb8d   :  { %v5583_v9 = vpop.f32.mrb[204].mxu0  ;;  %v5629_v33 = vpop.f32.mrb[204].mxu1 }
 0xb8e   :  { %v5899_v50 = vmul.f32 0.17677669, %v5583_v9  ;;  %v5900_v35 = vmul.f32 0.17677669, %v5629_v33  ;;  %v7941_v8 = vpop.f32.mrb[205].mxu0  ;;  %v7947_v12 = vpop.f32.mrb[205].mxu1 }
 0xb8f   :  { %v5586_v1 = vpop.f32.mrb[206].mxu0  ;;  %v5632_v13 = vpop.f32.mrb[206].mxu1 }
 0xb90   :  { %v5907_v4 = vsub.f32 %v5899_v50, %v5899_v50  ;;  %v5908_v14 = vsub.f32 %v5900_v35, %v5900_v35  ;;  %v7942_v18 = vpop.f32.mrb[207].mxu0  ;;  %v7948_v25 = vpop.f32.mrb[207].mxu1  ;;  %v5965_v13 = vpack.c.bf16 %v9779_v52, %v9779_v52 }
 0xb91   :  { %v5966_v25 = vpack.c.bf16 %v9781_v7, %v9781_v7 }
 0xb92   :  { %v5915_v47 = vmul.f32 1.442695, %v5907_v4  ;;  %v5917_v30 = vmul.f32 1.442695, %v5908_v14 }
 0xb94   :  { %8139 = vpow2.f32 %v5915_v47 }
 0xb95   :  { %8141 = vpow2.f32 %v5917_v30  ;;  %v5675_v21 = vpop.f32.mrb[208].mxu0  ;;  %v5721_v59 = vpop.f32.mrb[208].mxu1 }
 0xb96   :  { %v5901_v22 = vmul.f32 0.17677669, %v5675_v21  ;;  %v5902_v28 = vmul.f32 0.17677669, %v5721_v59  ;;  %v7953_v0 = vpop.f32.mrb[209].mxu0  ;;  %v7959_v57 = vpop.f32.mrb[209].mxu1 }
 0xb97   :  { %v5678_v54 = vpop.f32.mrb[210].mxu0  ;;  %v5724_v61 = vpop.f32.mrb[210].mxu1  ;;  %v6113_v0 = vsel %vm4009_vm9, %v5966_v25, 0  ;;  %v5967_v57 = vpack.c.bf16 %v9790_v42, %v9790_v42  ;;  %v6827_v25 = vld [vmem:[%s10009_s6 + $0x60] sm:$0xff] }
 0xb98   :  { %v5909_v48 = vsub.f32 %v5901_v22, %v5901_v22  ;;  %v5910_v34 = vsub.f32 %v5902_v28, %v5902_v28  ;;  %v7954_v26 = vpop.f32.mrb[211].mxu0  ;;  %v7960_v15 = vpop.f32.mrb[211].mxu1  ;;  %v6067_v22 = vsel %vm4009_vm9, %v5965_v13, 0  ;;  %v5968_v61 = vpack.c.bf16 %v9793_v43, %v9793_v43 }
 0xb9a   :  { %v5919_v46 = vmul.f32 1.442695, %v5909_v48  ;;  %v5921_v17 = vmul.f32 1.442695, %v5910_v34 }
 0xb9c   :  { %8143 = vpow2.f32 %v5919_v46  ;;  %v6159_v46 = vsel %vm4009_vm9, %v5967_v57, 0 }
 0xb9d   :  { %8145 = vpow2.f32 %v5921_v17  ;;  %v5764_v62 = vpop.f32.mrb[212].mxu0  ;;  %v5807_v5 = vpop.f32.mrb[212].mxu1 }
 0xb9e   :  { %v8140_v3 = vpop.eup %8139  ;;  %v5903_v31 = vmul.f32 0.17677669, %v5764_v62  ;;  %v5904_v29 = vmul.f32 0.17677669, %v5807_v5  ;;  %v7965_v38 = vpop.f32.mrb[213].mxu0  ;;  %v6205_v62 = vsel %vm4009_vm9, %v5968_v61, 0  ;;  %v5969_v5 = vpack.c.bf16 %v9798_v20, %v9798_v20 }
 0xb9f   :  { %v7971_v32 = vpop.f32.mrb[213].mxu1  ;;  %v8142_v45 = vpop.eup %8141  ;;  %8147 = vrcp.f32 %v8140_v3 }
 0xba0   :  { %v5767_v40 = vpop.f32.mrb[214].mxu0  ;;  %v5810_v41 = vpop.f32.mrb[214].mxu1  ;;  %8149 = vrcp.f32 %v8142_v45  ;;  %v5911_v37 = vsub.f32 %v5903_v31, %v5903_v31  ;;  %v5912_v39 = vsub.f32 %v5904_v29, %v5904_v29  ;;  %v5970_v31 = vpack.c.bf16 %v9800_v63, %v9800_v63 }
 0xba1   :  { %v7966_v44 = vpop.f32.mrb[215].mxu0  ;;  %v7972_v23 = vpop.f32.mrb[215].mxu1 }
 0xba2   :  { %v5923_v10 = vmul.f32 1.442695, %v5911_v37  ;;  %v5925_v11 = vmul.f32 1.442695, %v5912_v39  ;;  %v6297_v40 = vsel %vm4009_vm9, %v5970_v31, 0 }
 0xba4   :  { %8151 = vpow2.f32 %v5923_v10 }
 0xba5   :  { %8153 = vpow2.f32 %v5925_v11  ;;  %v5850_v6 = vpop.f32.mrb[216].mxu0  ;;  %v5893_v36 = vpop.f32.mrb[216].mxu1 }
 0xba6   :  { %v8144_v49 = vpop.eup %8143  ;;  %v5905_v51 = vmul.f32 0.17677669, %v5850_v6  ;;  %v5906_v60 = vmul.f32 0.17677669, %v5893_v36  ;;  %v7977_v58 = vpop.f32.mrb[217].mxu0 }
 0xba7   :  { %v7983_v19 = vpop.f32.mrb[217].mxu1  ;;  %v8146_v24 = vpop.eup %8145  ;;  %8155 = vrcp.f32 %v8144_v49 }
 0xba8   :  { %v5853_v56 = vpop.f32.mrb[218].mxu0  ;;  %v5896_v9 = vpop.f32.mrb[218].mxu1  ;;  %8157 = vrcp.f32 %v8146_v24  ;;  %v5913_v33 = vsub.f32 %v5905_v51, %v5905_v51  ;;  %v5914_v50 = vsub.f32 %v5906_v60, %v5906_v60 }
 0xba9   :  { %v7978_v35 = vpop.f32.mrb[219].mxu0  ;;  %v7984_v8 = vpop.f32.mrb[219].mxu1 }
 0xbaa   :  { %v8148_v12 = vpop.eup %8147  ;;  %v5927_v4 = vmul.f32 1.442695, %v5913_v33  ;;  %v5929_v14 = vmul.f32 1.442695, %v5914_v50 }
 0xbab   :  { %v8150_v1 = vpop.eup %8149  ;;  %v5947_v18 = vmul.f32 %v8148_v12, %v8140_v3  ;;  %v6825_v12 = vld [vmem:[%s10009_s6 + $0x50] sm:$0xff] }
 0xbac   :  { %v5948_v47 = vmul.f32 %v8150_v1, %v8142_v45  ;;  %8159 = vpow2.f32 %v5927_v4  ;;  %v6251_v45 = vsel %vm4009_vm9, %v5969_v5, 0  ;;  %v6826_v1 = vld [vmem:[%s10009_s6 + $0x58] sm:$0xff] }
 0xbad   :  { %v5955_v30 = vpack.c.bf16 %v5947_v18, %v5947_v18  ;;  %8161 = vpow2.f32 %v5929_v14  ;;  %v6379_v13 = vpack.c.bf16 %v6826_v1, %v6825_v12 }
 0xbae   :  { %v5956_v21 = vpack.c.bf16 %v5948_v47, %v5948_v47  ;;  %v8152_v59 = vpop.eup %8151  ;;  %v6828_v47 = vld [vmem:[%s10009_s6 + $0x68] sm:$0xff] }
 0xbaf   :  { %7988 = vmatmul.mubr.msk.bf16.vlgmr.msra.gmra.mrb[220].mxu0 %vm4005_vm11, %v5955_v30  ;;  %v8154_v28 = vpop.eup %8153  ;;  %8163 = vrcp.f32 %v8152_v59 }
 0xbb0   :  { %7994 = vmatmul.mubr.msk.bf16.vlgmr.msra.gmra.mrb[220].mxu1 %vm4005_vm11, %v5956_v21  ;;  %7998 = vmatpush3.bf16.msra.mxu0 %v6067_v22  ;;  %8165 = vrcp.f32 %v8154_v28  ;;  %v6380_v22 = vpack.c.bf16 %v6828_v47, %v6827_v25 }
 0xbb1   :  { %8004 = vmatpush3.bf16.msra.mxu1 %v6113_v0  ;;  %7999 = vmatprep.mubr.msk.bf16.mxu0 %vm8211_vm1, %v8210_v2  ;;  %v8156_v52 = vpop.eup %8155 }
 0xbb2   :  { %8005 = vmatprep.mubr.msk.bf16.mxu1 %vm8211_vm1, %v8210_v2  ;;  %8009 = vmatprep.subr.bf16.mxu0 %v8210_v2  ;;  %v8158_v7 = vpop.eup %8157  ;;  %v5949_v54 = vmul.f32 %v8156_v52, %v8144_v49 }
 0xbb3   :  { %8015 = vmatprep.subr.bf16.mxu1 %v8210_v2  ;;  %v5950_v48 = vmul.f32 %v8158_v7, %v8146_v24 }
 0xbb4   :  { %v5957_v34 = vpack.c.bf16 %v5949_v54, %v5949_v54 }
 0xbb5   :  { %v5958_v26 = vpack.c.bf16 %v5950_v48, %v5950_v48 }
 0xbb6   :  { %v8160_v15 = vpop.eup %8159 }
 0xbb7   :  { %8000 = vmatmul.mubr.msk.bf16.vlgmr.msra.gmra.mrb[224].mxu0 %vm4005_vm11, %v5957_v34  ;;  %v8162_v17 = vpop.eup %8161  ;;  %8167 = vrcp.f32 %v8160_v15 }
 0xbb8   :  { %8006 = vmatmul.mubr.msk.bf16.vlgmr.msra.gmra.mrb[224].mxu1 %vm4005_vm11, %v5958_v26  ;;  %8010 = vmatpush3.bf16.msra.mxu0 %v6159_v46  ;;  %8169 = vrcp.f32 %v8162_v17 }
 0xbb9   :  { %8016 = vmatpush3.bf16.msra.mxu1 %v6205_v62  ;;  %8011 = vmatprep.mubr.msk.bf16.mxu0 %vm8211_vm1, %v8210_v2  ;;  %v8164_v42 = vpop.eup %8163 }
 0xbba   :  { %8017 = vmatprep.mubr.msk.bf16.mxu1 %vm8211_vm1, %v8210_v2  ;;  %8021 = vmatprep.subr.bf16.mxu0 %v8210_v2  ;;  %v8166_v43 = vpop.eup %8165  ;;  %v5951_v3 = vmul.f32 %v8164_v42, %v8152_v59 }
 0xbbb   :  { %8027 = vmatprep.subr.bf16.mxu1 %v8210_v2  ;;  %v5952_v29 = vmul.f32 %v8166_v43, %v8154_v28 }
 0xbbc   :  { %v5959_v38 = vpack.c.bf16 %v5951_v3, %v5951_v3 }
 0xbbd   :  { %v5960_v32 = vpack.c.bf16 %v5952_v29, %v5952_v29 }
 0xbbf   :  { %8012 = vmatmul.mubr.msk.bf16.vlgmr.msra.gmra.mrb[228].mxu0 %vm4005_vm11, %v5959_v38 }
 0xbc0   :  { %8018 = vmatmul.mubr.msk.bf16.vlgmr.msra.gmra.mrb[228].mxu1 %vm4005_vm11, %v5960_v32  ;;  %8022 = vmatpush3.bf16.msra.mxu0 %v6251_v45 }
 0xbc1   :  { %8028 = vmatpush3.bf16.msra.mxu1 %v6297_v40  ;;  %8023 = vmatprep.mubr.msk.bf16.mxu0 %vm8211_vm1, %v8210_v2  ;;  %v8168_v20 = vpop.eup %8167 }
 0xbc2   :  { %8029 = vmatprep.mubr.msk.bf16.mxu1 %vm8211_vm1, %v8210_v2  ;;  %8041 = vmatprep.subr.bf16.mxu1 %v8210_v2  ;;  %v8170_v63 = vpop.eup %8169  ;;  %v5953_v41 = vmul.f32 %v8168_v20, %v8160_v15 }
 0xbc3   :  { %8033 = vmatprep.subr.bf16.mxu0 %v8210_v2  ;;  %v5954_v37 = vmul.f32 %v8170_v63, %v8162_v17 }
 0xbc4   :  { %v5961_v39 = vpack.c.bf16 %v5953_v41, %v5953_v41 }
 0xbc5   :  { %v5962_v44 = vpack.c.bf16 %v5954_v37, %v5954_v37 }
 0xbc7   :  { %8024 = vmatmul.mubr.msk.bf16.vlgmr.msra.gmra.mrb[232].mxu0 %vm4005_vm11, %v5961_v39  ;;  %v6472_v39 = vld [vmem:[%s10006_s3 + $0x8] sm:$0xff] }
 0xbc8   :  { %8030 = vmatmul.mubr.msk.bf16.vlgmr.msra.gmra.mrb[232].mxu1 %vm4005_vm11, %v5962_v44  ;;  %8037 = vmatprep.mubr.msk.bf16.mxu0 %vm8211_vm1, %v8210_v2 }
 0xbc9   :  { %8045 = vmatprep.mubr.msk.bf16.mxu1 %vm8211_vm1, %v8210_v2  ;;  %8042 = vmatpush3.bf16.msra.mxu1 %v6379_v13 }
 0xbca   :  { %8034 = vmatpush3.bf16.msra.mxu0 %v6379_v13  ;;  %8043 = vmatprep.subr.bf16.mxu1 %v8210_v2  ;;  %v6475_v13 = vld [vmem:[%s10006_s3 + $0x20] sm:$0x1] }
 0xbcb   :  { %8035 = vmatprep.subr.bf16.mxu0 %v8210_v2 }
 0xbcd   :  { %8044 = vmatpush3.bf16.msra.mxu1 %v6380_v22 }
 0xbce   :  { %8036 = vmatpush3.bf16.msra.mxu0 %v6380_v22  ;;  %8057 = vmatprep.subr.bf16.mxu1 %v8210_v2 }
 0xbcf   :  { %8049 = vmatprep.subr.bf16.mxu0 %v8210_v2 }
 0xc82   :  { %v9924_v23 = vpop.f32.mrb[220].mxu0 }
 0xc83   :  { %v6057_v10 = vpop.f32.mrb[220].mxu1  ;;  %v7989_v11 = vpop.f32.mrb[221].mxu0  ;;  %v6339_v38 = vadd.f32 %v9924_v23, %v9808_v27  ;;  %v6473_v23 = vld [vmem:[%s10006_s3 + $0x10] sm:$0xff] }
 0xc84   :  { %v6340_v6 = vadd.f32 %v6057_v10, %v9810_v16  ;;  %v7995_v36 = vpop.f32.mrb[221].mxu1  ;;  %v6014_v49 = vpop.f32.mrb[222].mxu0  ;;  %v6474_v10 = vld [vmem:[%s10006_s3 + $0x18] sm:$0xff] }
 0xc85   :  { %v6060_v51 = vpop.f32.mrb[222].mxu1  ;;  %v7990_v60 = vpop.f32.mrb[223].mxu0  ;;  %v6479_v11 = vpack.c.bf16 %v6474_v10, %v6473_v23 }
 0xc86   :  { %6349 = vrot.lane.b32.xlu0 %v6340_v6, %s8214_s30  ;;  %v7996_v58 = vpop.f32.mrb[223].mxu1  ;;  %v6829_v6 = vld [vmem:[%s10009_s6 + $0x70] sm:$0x1] }
 0xc8a   :  { %v6103_v19 = vpop.f32.mrb[224].mxu0 }
 0xc8b   :  { %v6149_v24 = vpop.f32.mrb[224].mxu1  ;;  %v8001_v56 = vpop.f32.mrb[225].mxu0  ;;  %v6341_v7 = vadd.f32 %v6103_v19, %v9830_v55 }
 0xc8c   :  { %v8007_v9 = vpop.f32.mrb[225].mxu1  ;;  %v6106_v33 = vpop.f32.mrb[226].mxu0  ;;  %v6342_v62 = vadd.f32 %v6149_v24, %v9832_v53 }
 0xc8d   :  { %v6152_v50 = vpop.f32.mrb[226].mxu1  ;;  %v8002_v35 = vpop.f32.mrb[227].mxu0 }
 0xc8e   :  { %v8008_v8 = vpop.f32.mrb[227].mxu1 }
 0xc92   :  { %v6195_v4 = vpop.f32.mrb[228].mxu0 }
 0xc93   :  { %v6241_v14 = vpop.f32.mrb[228].mxu1  ;;  %v8013_v18 = vpop.f32.mrb[229].mxu0  ;;  %v6343_v5 = vadd.f32 %v6195_v4, %v9808_v27  ;;  %v6471_v27 = vld [vmem:[%s10006_s3] sm:$0xff] }
 0xc94   :  { %v6344_v30 = vadd.f32 %v6241_v14, %v9810_v16  ;;  %v8019_v21 = vpop.f32.mrb[229].mxu1  ;;  %v6198_v59 = vpop.f32.mrb[230].mxu0  ;;  %v6478_v44 = vpack.c.bf16 %v6472_v39, %v6471_v27 }
 0xc95   :  { %v6244_v28 = vpop.f32.mrb[230].mxu1  ;;  %v8014_v0 = vpop.f32.mrb[231].mxu0 }
 0xc96   :  { %6351 = vrot.lane.b32.xlu0 %v6344_v30, %s8214_s30  ;;  %v8020_v52 = vpop.f32.mrb[231].mxu1 }
 0xc9a   :  { %6357 = vrot.lane.b32.xlu0 %v6341_v7, %s8215_s9  ;;  %v6287_v57 = vpop.f32.mrb[232].mxu0 }
 0xc9b   :  { %v6345_v16 = vadd.f32 %v6287_v57, %v9830_v55  ;;  %v6333_v54 = vpop.f32.mrb[232].mxu1  ;;  %v8025_v61 = vpop.f32.mrb[233].mxu0 }
 0xc9c   :  { %v8031_v48 = vpop.f32.mrb[233].mxu1  ;;  %v6290_v34 = vpop.f32.mrb[234].mxu0  ;;  %v6346_v17 = vadd.f32 %v6333_v54, %v9832_v53 }
 0xc9d   :  { %v6336_v26 = vpop.f32.mrb[234].mxu1  ;;  %6359 = vrot.lane.b32.xlu1 %v6345_v16, %s8215_s9  ;;  %v8026_v15 = vpop.f32.mrb[235].mxu0 }
 0xc9e   :  { %v8032_v46 = vpop.f32.mrb[235].mxu1 }
 0xca1   :  { %6367 = vrot.lane.b32.xlu1 %v6346_v17, %s8216_s10 }
 0xca5   :  { %6365 = vrot.lane.b32.xlu1 %v6342_v62, %s8216_s10 }
 0xcf8   :  { %v6350_v42 = vpop.permute.xlu0 %6349 }
 0xcf9   :  { %v6371_v53 = vsel %vm67_vm2, %v6339_v38, %v6350_v42 }
 0xd08   :  { %v6352_v43 = vpop.permute.xlu0 %6351 }
 0xd09   :  { %v6372_v3 = vsel %vm67_vm2, %v6343_v5, %v6352_v43 }
 0xd0c   :  { %v6358_v32 = vpop.permute.xlu0 %6357 }
 0xd0d   :  { %v6373_v20 = vsel %vm2150_vm7, %v6371_v53, %v6358_v32 }
 0xd0f   :  { %v6360_v55 = vpop.permute.xlu1 %6359 }
 0xd10   :  { %v6374_v31 = vsel %vm2150_vm7, %v6372_v3, %v6360_v55 }
 0xd13   :  { %v6368_v29 = vpop.permute.xlu1 %6367 }
 0xd14   :  { %v6376_v45 = vsel %vm2153_vm8, %v6374_v31, %v6368_v29 }
 0xd15   :  { %v6378_v40 = vpack.c.bf16 %v6376_v45, %v6376_v45 }
 0xd17   :  { %8046 = vmatmul.mubr.msk.bf16.vlgmr.msra.gmra.mrb[236].mxu1 %vm310_vm5, %v6378_v40  ;;  %v6366_v63 = vpop.permute.xlu1 %6365 }
 0xd18   :  { %v6375_v41 = vsel %vm2153_vm8, %v6373_v20, %v6366_v63  ;;  %8061 = vmatprep.mubr.msk.bf16.mxu1 %vm8211_vm1, %v8210_v2  ;;  %8058 = vmatpush3.bf16.msra.mxu1 %v6478_v44 }
 0xd19   :  { %v6377_v37 = vpack.c.bf16 %v6375_v41, %v6375_v41  ;;  %8059 = vmatprep.subr.bf16.mxu1 %v8210_v2 }
 0xd1b   :  { %8038 = vmatmul.mubr.msk.bf16.vlgmr.msra.gmra.mrb[236].mxu0 %vm310_vm5, %v6377_v37 }
 0xd1c   :  { %8053 = vmatprep.mubr.msk.bf16.mxu0 %vm8211_vm1, %v8210_v2  ;;  %8050 = vmatpush3.bf16.msra.mxu0 %v6478_v44 }
 0xd1d   :  { %8051 = vmatprep.subr.bf16.mxu0 %v8210_v2  ;;  %8060 = vmatpush3.bf16.msra.mxu1 %v6479_v11 }
 0xd20   :  { %8052 = vmatpush3.bf16.msra.mxu0 %v6479_v11 }
 0xdea   :  { %v6461_v36 = vpop.f32.mrb[236].mxu1 }
 0xdeb   :  { %v6462_v49 = vadd.f32 %v6829_v6, %v6461_v36  ;;  %v8047_v51 = vpop.f32.mrb[237].mxu1 }
 0xdec   :  { %v6464_v60 = vpop.f32.mrb[238].mxu1 }
 0xded   :  { %v6468_v58 = vmax.f32 %v6462_v49, 0.0  ;;  %v8048_v19 = vpop.f32.mrb[239].mxu1 }
 0xdee   :  { %v6418_v24 = vpop.f32.mrb[236].mxu0 }
 0xdef   :  { %v6470_v56 = vadd.f32 %v6468_v58, %v6376_v45  ;;  %v6419_v9 = vadd.f32 %v6829_v6, %v6418_v24  ;;  %v8039_v33 = vpop.f32.mrb[237].mxu0 }
 0xdf0   :  { %v6421_v50 = vpop.f32.mrb[238].mxu0 }
 0xdf1   :  { %v6477_v35 = vpack.c.bf16 %v6470_v56, %v6470_v56  ;;  %v6467_v2 = vmax.f32 %v6419_v9, 0.0  ;;  %v8040_v8 = vpop.f32.mrb[239].mxu0 }
 0xdf3   :  { %v6469_v12 = vadd.f32 %v6467_v2, %v6375_v41  ;;  %8062 = vmatmul.mubr.msk.bf16.vlgmr.msra.gmra.mrb[240].mxu1 %vm310_vm5, %v6477_v35 }
 0xdf5   :  { %v6476_v1 = vpack.c.bf16 %v6469_v12, %v6469_v12 }
 0xdf7   :  { %8054 = vmatmul.mubr.msk.bf16.vlgmr.msra.gmra.mrb[240].mxu0 %vm310_vm5, %v6476_v1 }
 0xec6   :  { %v6560_v4 = vpop.f32.mrb[240].mxu1 }
 0xec7   :  { %v6561_v14 = vadd.f32 %v6560_v4, %v6475_v13  ;;  %v8063_v18 = vpop.f32.mrb[241].mxu1 }
 0xec8   :  { %v6563_v25 = vpop.f32.mrb[242].mxu1 }
 0xec9   :  { %v8064_v47 = vpop.f32.mrb[243].mxu1  ;;  %v6568_v21 = vrot.slane %v6561_v14, 7 }
 0xeca   :  { %v6517_v30 = vpop.f32.mrb[240].mxu0 }
 0xecb   :  { %v6518_v59 = vadd.f32 %v6517_v30, %v6475_v13  ;;  %v8055_v22 = vpop.f32.mrb[241].mxu0 }
 0xecc   :  { %v6520_v28 = vpop.f32.mrb[242].mxu0 }
 0xecd   :  { %v8056_v0 = vpop.f32.mrb[243].mxu0  ;;  %v6570_v52 = vsel %vm6569_vm12, %v6568_v21, %v6518_v59 }
 0xece   :  { %6573 = vst.msk [vmem:[#allocation5] sm:$0x3] %vm6572_vm13, %v6570_v52 }
 0xecf   :  { %8194 = shalt.err (!%p8191_p9)
}
 0xed0   :  { %s8195_s21 = scalar_lea.hbm %s10011_s8, 32 }
 0xed1   :  { %p8196_p10 = scmp.ne.s32.totalorder %s10011_s8, %s8195_s21  ;;  %p8199_p11 = scmp.lt.u32.totalorder %s8195_s21, %s10011_s8 }
 0xed3   :  { %p8201_p12 = pnand %p8199_p11, %p8196_p10 }
 0xed5   :  { %8204 = shalt.err (!%p8201_p12)
}
 0xed6   :  { %6583 = dma.vmem_to_hbm [thread:$0]  %s6581_s19, 32, %s10011_s8, [#allocation3]  }
 0xed7   :  { %8207 = dma.done.wait [#allocation3], 32  }
 0xed8   :  { %8208 = vsyncadd [#allocation3], 4294967264 }
 0xed9   :  { %6587 = vsyncpa [#allocation3], 1 }
 0xeda   :  { %6588 = vsyncpa [#allocation4], 1 }

</bundles_post_ra>
